<compile_context>
chip_gen: v5e
topology: v5e:2x2
jax: 0.10.0
libtpu: 0.0.40
codegen_flags: <defaults>
</compile_context>

<pallas_src>
import numpy as np
import jax
import jax.numpy as jnp
from jax.experimental import pallas as pl
from jax.experimental.pallas import tpu as pltpu


# ------------------------------------------------------------------ host-built matrices

def _interp_matrix(in_size, out_size):
    """1-D bilinear interpolation matrix, align_corners=True (PyTorch nn.Upsample)."""
    m = np.zeros((out_size, in_size), np.float32)
    if in_size == 1 or out_size == 1:
        m[:, 0] = 1.0
        return m
    src = np.arange(out_size) * (in_size - 1) / (out_size - 1)
    i0 = np.floor(src).astype(np.int64)
    i1 = np.minimum(i0 + 1, in_size - 1)
    frac = (src - i0).astype(np.float32)
    m[np.arange(out_size), i0] += 1.0 - frac
    m[np.arange(out_size), i1] += frac
    return m


def _row_select_mats(h_in, h_out, stride):
    """(3, h_out, h_in) 0/1 row-tap matrices: R_di[ho, stride*ho + di - 1] = 1."""
    r = np.zeros((3, h_out, h_in), np.float32)
    for di in range(3):
        for ho in range(h_out):
            hi = stride * ho + di - 1
            if 0 <= hi < h_in:
                r[di, ho, hi] = 1.0
    return r


def _col_tap_mats(w_in, w_out, stride, w):
    """(3, w_in*cin, w_out*cout) width-tap matrices holding the conv weights."""
    _, _, cin, cout = w.shape
    m = np.zeros((3, w_in * cin, w_out * cout), np.float32)
    for di in range(3):
        for wo in range(w_out):
            for dj in range(3):
                wi = stride * wo + dj - 1
                if 0 <= wi < w_in:
                    m[di, wi * cin:(wi + 1) * cin, wo * cout:(wo + 1) * cout] = w[di, dj]
    return m


def _conv_layer(rng, cin, cout, h_in, w_in, stride, *, with_bn, pre_upsample=False,
                eps=1e-5):
    """Random conv(+BN) layer folded into (R(3,..), M(3,..), scale_vec, bias_vec)."""
    w = (rng.standard_normal((3, 3, cin, cout)) / np.sqrt(9.0 * cin)).astype(np.float32)
    b = (0.05 * rng.standard_normal(cout)).astype(np.float32)

    h_c, w_c = (2 * h_in, 2 * w_in) if pre_upsample else (h_in, w_in)
    h_out, w_out = h_c // stride, w_c // stride
    r = _row_select_mats(h_c, h_out, stride)               # (3, h_out, h_c)
    m = _col_tap_mats(w_c, w_out, stride, w)               # (3, w_c*cin, w_out*cout)

    if pre_upsample:
        # Fuse the bilinear x2 upsample (linear) into the conv on the host:
        #   conv(upsample(X)) = sum_di (R_di @ R_up) @ X @ (M_up @ M_di)
        r_up = _interp_matrix(h_in, h_c)                                    # (h_c, h_in)
        m_up = np.kron(_interp_matrix(w_in, w_c).T,
                       np.eye(cin, dtype=np.float32))                       # (w_in*cin, w_c*cin)
        r = np.einsum("dab,bc->dac", r, r_up)              # (3, h_out, h_in)
        m = np.einsum("ab,dbc->dac", m_up, m)              # (3, w_in*cin, w_out*cout)

    if with_bn:   # eval-mode BN folded into the conv epilogue
        gamma = (1.0 + 0.1 * rng.standard_normal(cout)).astype(np.float32)
        beta = (0.05 * rng.standard_normal(cout)).astype(np.float32)
        mean = (0.05 * rng.standard_normal(cout)).astype(np.float32)
        var = rng.uniform(0.5, 1.5, cout).astype(np.float32)
        scale = gamma / np.sqrt(var + eps)
        bias = (b - mean) * scale + beta
    else:         # Add_and_conv: plain conv, bias only, no BN / no ReLU
        scale, bias = np.ones(cout, np.float32), b

    sv = np.tile(scale, w_out).reshape(1, w_out * cout)    # lane layout: wo*cout + co
    bv = np.tile(bias, w_out).reshape(1, w_out * cout)
    return (jnp.asarray(r, jnp.bfloat16), jnp.asarray(m, jnp.bfloat16),
            jnp.asarray(sv, jnp.float32), jnp.asarray(bv, jnp.float32))


def _final_layer(rng, cin, w_sp):
    """Final 1x1 conv (cin -> 1): lane matrix (w_sp*cin, w_sp) + (1, w_sp) bias row."""
    wt = (rng.standard_normal((cin, 1)) / np.sqrt(cin)).astype(np.float32)
    b = float(0.05 * rng.standard_normal())
    mf = np.kron(np.eye(w_sp, dtype=np.float32), wt)       # (w_sp*cin, w_sp)
    bv = np.full((1, w_sp), b, np.float32)
    return jnp.asarray(mf, jnp.bfloat16), jnp.asarray(bv, jnp.float32)


# ------------------------------------------------------------------------------ kernels

def _conv_apply(x_bf, r_ref, m_ref, sv_ref, bv_ref, relu):
    """y = sum_di R_di @ x @ M_di, then scale/bias (+ReLU).  x_bf: (H_in, Win*Cin) bf16."""
    acc = None
    for di in range(3):
        t = jnp.dot(r_ref[di], x_bf, preferred_element_type=jnp.float32)
        # R is 0/1 row selection -> t holds exact bf16 values, so this re-cast is lossless.
        p = jnp.dot(t.astype(jnp.bfloat16), m_ref[di], preferred_element_type=jnp.float32)
        acc = p if acc is None else acc + p
    y = acc * sv_ref[...] + bv_ref[...]
    if relu:
        y = jnp.maximum(y, 0.0)
    return y


def _down_kernel(x_ref, r1, m1, s1, b1, r2, m2, s2, b2, o_ref):
    """DownBlock: conv3x3/stride2 + BN + ReLU -> conv3x3 + BN + ReLU."""
    x = x_ref[0].astype(jnp.bfloat16)
    y1 = _conv_apply(x, r1, m1, s1, b1, relu=True)
    y2 = _conv_apply(y1.astype(jnp.bfloat16), r2, m2, s2, b2, relu=True)
    o_ref[0] = y2.astype(o_ref.dtype)


def _up_add_kernel(x_ref, skip_ref,
                   r1, m1, s1, b1, r2, m2, s2, b2, r3, m3, s3, b3, o_ref):
    """UpBlock (upsample fused into conv1) x2 conv/BN/ReLU + Add_and_conv."""
    x = x_ref[0].astype(jnp.bfloat16)
    y1 = _conv_apply(x, r1, m1, s1, b1, relu=True)         # upsample composed into r1/m1
    y2 = _conv_apply(y1.astype(jnp.bfloat16), r2, m2, s2, b2, relu=True)
    z = y2 + skip_ref[0]                                    # skip add done once, in f32
    y3 = _conv_apply(z.astype(jnp.bfloat16), r3, m3, s3, b3, relu=False)
    o_ref[0] = y3.astype(o_ref.dtype)


def _up_final_kernel(x_ref, r1, m1, s1, b1, r2, m2, s2, b2, mf, bf, o_ref):
    """UpBlock3 (upsample fused) + final 1x1 conv + sigmoid."""
    x = x_ref[0].astype(jnp.bfloat16)
    y1 = _conv_apply(x, r1, m1, s1, b1, relu=True)
    y2 = _conv_apply(y1.astype(jnp.bfloat16), r2, m2, s2, b2, relu=True)
    yf = jnp.dot(y2.astype(jnp.bfloat16), mf[...],
                 preferred_element_type=jnp.float32) + bf[...]
    o_ref[0] = jax.nn.sigmoid(yf).astype(o_ref.dtype)


# ---------------------------------------------------------------------------- launcher

def _stage(kernel, acts, consts, out_rows, out_cols):
    n = acts[0].shape[0]
    act_specs = [pl.BlockSpec((1,) + a.shape[1:], lambda i: (i, 0, 0)) for a in acts]
    const_specs = [pl.BlockSpec(c.shape, lambda i, _z=(0,) * c.ndim: _z) for c in consts]
    return pl.pallas_call(
        kernel,
        grid=(n,),
        in_specs=act_specs + const_specs,
        out_specs=pl.BlockSpec((1, out_rows, out_cols), lambda i: (i, 0, 0)),
        out_shape=jax.ShapeDtypeStruct((n, out_rows, out_cols), jnp.float32),
        compiler_params=pltpu.CompilerParams(dimension_semantics=("parallel",)),
    )(*acts, *consts)


# ------------------------------------------------------------------------------ params

def init_unet_params(seed, s):
    rng = np.random.default_rng(seed)
    return {
        "down1": _conv_layer(rng, 1, 16, s, s, 2, with_bn=True)
                 + _conv_layer(rng, 16, 16, s // 2, s // 2, 1, with_bn=True),
        "down2": _conv_layer(rng, 16, 32, s // 2, s // 2, 2, with_bn=True)
                 + _conv_layer(rng, 32, 32, s // 4, s // 4, 1, with_bn=True),
        "down3": _conv_layer(rng, 32, 64, s // 4, s // 4, 2, with_bn=True)
                 + _conv_layer(rng, 64, 64, s // 8, s // 8, 1, with_bn=True),
        "up1":   _conv_layer(rng, 64, 32, s // 8, s // 8, 1, with_bn=True, pre_upsample=True)
                 + _conv_layer(rng, 32, 32, s // 4, s // 4, 1, with_bn=True)
                 + _conv_layer(rng, 32, 32, s // 4, s // 4, 1, with_bn=False),   # Add_and_conv
        "up2":   _conv_layer(rng, 32, 16, s // 4, s // 4, 1, with_bn=True, pre_upsample=True)
                 + _conv_layer(rng, 16, 16, s // 2, s // 2, 1, with_bn=True)
                 + _conv_layer(rng, 16, 16, s // 2, s // 2, 1, with_bn=False),   # Add_and_conv
        "up3":   _conv_layer(rng, 16, 8, s // 2, s // 2, 1, with_bn=True, pre_upsample=True)
                 + _conv_layer(rng, 8, 8, s, s, 1, with_bn=True)
                 + _final_layer(rng, 8, s),                                      # 1x1 conv
    }


# ----------------------------------------------------------------------------- forward

def unet_forward(x_nchw, params, s):
    n, c = x_nchw.shape[0], x_nchw.shape[1]
    x = jnp.transpose(x_nchw, (0, 2, 3, 1)).reshape(n, s, s * c)          # -> (N, H, W*C)
    x1 = _stage(_down_kernel, [x], params["down1"], s // 2, (s // 2) * 16)
    x2 = _stage(_down_kernel, [x1], params["down2"], s // 4, (s // 4) * 32)
    x3 = _stage(_down_kernel, [x2], params["down3"], s // 8, (s // 8) * 64)
    x4 = _stage(_up_add_kernel, [x3, x2], params["up1"], s // 4, (s // 4) * 32)
    x5 = _stage(_up_add_kernel, [x4, x1], params["up2"], s // 2, (s // 2) * 16)
    y = _stage(_up_final_kernel, [x5], params["up3"], s, s)
    return y.reshape(n, 1, s, s)                                          # NCHW output


# -------------------------------------------------------------------------------- main

if __name__ == "__main__":
    input_size = 16
    params = init_unet_params(0, input_size)
    x = jax.random.normal(jax.random.PRNGKey(0), (2, 1, input_size, input_size),
                          jnp.float32)

    fwd = jax.jit(lambda inp: unet_forward(inp, params, input_size))
    out = jax.block_until_ready(fwd(x))

    assert out.shape == (2, 1, input_size, input_size), out.shape
    assert bool(jnp.all(jnp.isfinite(out)))
    assert bool(jnp.all((out >= 0.0) & (out <= 1.0)))   # sigmoid output range
    print("KERNEL_OK")
</pallas_src>

<mosaic_0001>
module attributes {stable_mosaic.version = 11 : i64} {
  func.func @_down_kernel(%arg0: i32, %arg1: memref<1x4x128xf32, #tpu.memory_space<vmem>>, %arg2: memref<3x2x4xbf16, #tpu.memory_space<vmem>>, %arg3: memref<3x128x128xbf16, #tpu.memory_space<vmem>>, %arg4: memref<1x128xf32, #tpu.memory_space<vmem>>, %arg5: memref<1x128xf32, #tpu.memory_space<vmem>>, %arg6: memref<3x2x2xbf16, #tpu.memory_space<vmem>>, %arg7: memref<3x128x128xbf16, #tpu.memory_space<vmem>>, %arg8: memref<1x128xf32, #tpu.memory_space<vmem>>, %arg9: memref<1x128xf32, #tpu.memory_space<vmem>>, %arg10: memref<1x2x128xf32, #tpu.memory_space<vmem>>) attributes {dimension_semantics = [#tpu.dimension_semantics<parallel>], iteration_bounds = array<i64: 2>, scalar_prefetch = 0 : i64, scratch_operands = 0 : i64, tpu.core_type = #tpu.core_type<tc>, window_params = [{transform_indices = @transform_0, window_bounds = array<i64: 1, 4, 128>}, {pipeline_mode = #tpu.pipeline_mode<synchronous>, transform_indices = @transform_1, window_bounds = array<i64: 3, 2, 4>}, {pipeline_mode = #tpu.pipeline_mode<synchronous>, transform_indices = @transform_2, window_bounds = array<i64: 3, 128, 128>}, {pipeline_mode = #tpu.pipeline_mode<synchronous>, transform_indices = @transform_3, window_bounds = array<i64: 1, 128>}, {pipeline_mode = #tpu.pipeline_mode<synchronous>, transform_indices = @transform_4, window_bounds = array<i64: 1, 128>}, {pipeline_mode = #tpu.pipeline_mode<synchronous>, transform_indices = @transform_5, window_bounds = array<i64: 3, 2, 2>}, {pipeline_mode = #tpu.pipeline_mode<synchronous>, transform_indices = @transform_6, window_bounds = array<i64: 3, 128, 128>}, {pipeline_mode = #tpu.pipeline_mode<synchronous>, transform_indices = @transform_7, window_bounds = array<i64: 1, 128>}, {pipeline_mode = #tpu.pipeline_mode<synchronous>, transform_indices = @transform_8, window_bounds = array<i64: 1, 128>}, {transform_indices = @transform_9, window_bounds = array<i64: 1, 2, 128>}]} {
    %c0 = arith.constant 0 : index
    %c0_0 = arith.constant 0 : index
    %c0_1 = arith.constant 0 : index
    %0 = vector.load %arg1[%c0, %c0_0, %c0_1] : memref<1x4x128xf32, #tpu.memory_space<vmem>>, vector<1x4x128xf32>
    %1 = vector.shape_cast %0 : vector<1x4x128xf32> to vector<4x128xf32>
    %2 = arith.truncf %1 : vector<4x128xf32> to vector<4x128xbf16>
    %c0_2 = arith.constant 0 : index
    %c0_3 = arith.constant 0 : index
    %c0_4 = arith.constant 0 : index
    %3 = vector.load %arg2[%c0_2, %c0_3, %c0_4] : memref<3x2x4xbf16, #tpu.memory_space<vmem>>, vector<1x2x4xbf16>
    %4 = vector.shape_cast %3 : vector<1x2x4xbf16> to vector<2x4xbf16>
    %cst = arith.constant dense<0.000000e+00> : vector<2x128xf32>
    %5 = tpu.matmul %4, %2, %cst {dimension_numbers = #tpu.dot_dimension_numbers<[1], [0], [0], [1], [0, 0, 1, 1], [], []>} : vector<2x4xbf16>, vector<4x128xbf16>, vector<2x128xf32> -> vector<2x128xf32>
    %6 = arith.truncf %5 : vector<2x128xf32> to vector<2x128xbf16>
    %c0_5 = arith.constant 0 : index
    %c0_6 = arith.constant 0 : index
    %c0_7 = arith.constant 0 : index
    %7 = vector.load %arg3[%c0_5, %c0_6, %c0_7] : memref<3x128x128xbf16, #tpu.memory_space<vmem>>, vector<1x128x128xbf16>
    %8 = vector.shape_cast %7 : vector<1x128x128xbf16> to vector<128x128xbf16>
    %cst_8 = arith.constant dense<0.000000e+00> : vector<2x128xf32>
    %9 = tpu.matmul %6, %8, %cst_8 {dimension_numbers = #tpu.dot_dimension_numbers<[1], [0], [0], [1], [0, 0, 1, 1], [], []>} : vector<2x128xbf16>, vector<128x128xbf16>, vector<2x128xf32> -> vector<2x128xf32>
    %c1 = arith.constant 1 : index
    %c0_9 = arith.constant 0 : index
    %c0_10 = arith.constant 0 : index
    %10 = vector.load %arg2[%c1, %c0_9, %c0_10] : memref<3x2x4xbf16, #tpu.memory_space<vmem>>, vector<1x2x4xbf16>
    %11 = vector.shape_cast %10 : vector<1x2x4xbf16> to vector<2x4xbf16>
    %cst_11 = arith.constant dense<0.000000e+00> : vector<2x128xf32>
    %12 = tpu.matmul %11, %2, %cst_11 {dimension_numbers = #tpu.dot_dimension_numbers<[1], [0], [0], [1], [0, 0, 1, 1], [], []>} : vector<2x4xbf16>, vector<4x128xbf16>, vector<2x128xf32> -> vector<2x128xf32>
    %13 = arith.truncf %12 : vector<2x128xf32> to vector<2x128xbf16>
    %c1_12 = arith.constant 1 : index
    %c0_13 = arith.constant 0 : index
    %c0_14 = arith.constant 0 : index
    %14 = vector.load %arg3[%c1_12, %c0_13, %c0_14] : memref<3x128x128xbf16, #tpu.memory_space<vmem>>, vector<1x128x128xbf16>
    %15 = vector.shape_cast %14 : vector<1x128x128xbf16> to vector<128x128xbf16>
    %cst_15 = arith.constant dense<0.000000e+00> : vector<2x128xf32>
    %16 = tpu.matmul %13, %15, %cst_15 {dimension_numbers = #tpu.dot_dimension_numbers<[1], [0], [0], [1], [0, 0, 1, 1], [], []>} : vector<2x128xbf16>, vector<128x128xbf16>, vector<2x128xf32> -> vector<2x128xf32>
    %17 = arith.addf %9, %16 : vector<2x128xf32>
    %c2 = arith.constant 2 : index
    %c0_16 = arith.constant 0 : index
    %c0_17 = arith.constant 0 : index
    %18 = vector.load %arg2[%c2, %c0_16, %c0_17] : memref<3x2x4xbf16, #tpu.memory_space<vmem>>, vector<1x2x4xbf16>
    %19 = vector.shape_cast %18 : vector<1x2x4xbf16> to vector<2x4xbf16>
    %cst_18 = arith.constant dense<0.000000e+00> : vector<2x128xf32>
    %20 = tpu.matmul %19, %2, %cst_18 {dimension_numbers = #tpu.dot_dimension_numbers<[1], [0], [0], [1], [0, 0, 1, 1], [], []>} : vector<2x4xbf16>, vector<4x128xbf16>, vector<2x128xf32> -> vector<2x128xf32>
    %21 = arith.truncf %20 : vector<2x128xf32> to vector<2x128xbf16>
    %c2_19 = arith.constant 2 : index
    %c0_20 = arith.constant 0 : index
    %c0_21 = arith.constant 0 : index
    %22 = vector.load %arg3[%c2_19, %c0_20, %c0_21] : memref<3x128x128xbf16, #tpu.memory_space<vmem>>, vector<1x128x128xbf16>
    %23 = vector.shape_cast %22 : vector<1x128x128xbf16> to vector<128x128xbf16>
    %cst_22 = arith.constant dense<0.000000e+00> : vector<2x128xf32>
    %24 = tpu.matmul %21, %23, %cst_22 {dimension_numbers = #tpu.dot_dimension_numbers<[1], [0], [0], [1], [0, 0, 1, 1], [], []>} : vector<2x128xbf16>, vector<128x128xbf16>, vector<2x128xf32> -> vector<2x128xf32>
    %25 = arith.addf %17, %24 : vector<2x128xf32>
    %c0_23 = arith.constant 0 : index
    %c0_24 = arith.constant 0 : index
    %26 = vector.load %arg4[%c0_23, %c0_24] : memref<1x128xf32, #tpu.memory_space<vmem>>, vector<1x128xf32>
    %27 = vector.broadcast %26 : vector<1x128xf32> to vector<2x128xf32>
    %28 = arith.mulf %25, %27 : vector<2x128xf32>
    %c0_25 = arith.constant 0 : index
    %c0_26 = arith.constant 0 : index
    %29 = vector.load %arg5[%c0_25, %c0_26] : memref<1x128xf32, #tpu.memory_space<vmem>>, vector<1x128xf32>
    %30 = vector.broadcast %29 : vector<1x128xf32> to vector<2x128xf32>
    %31 = arith.addf %28, %30 : vector<2x128xf32>
    %cst_27 = arith.constant 0.000000e+00 : f32
    %32 = vector.broadcast %cst_27 : f32 to vector<2x128xf32>
    %33 = arith.maximumf %31, %32 : vector<2x128xf32>
    %34 = arith.truncf %33 : vector<2x128xf32> to vector<2x128xbf16>
    %c0_28 = arith.constant 0 : index
    %c0_29 = arith.constant 0 : index
    %c0_30 = arith.constant 0 : index
    %35 = vector.load %arg6[%c0_28, %c0_29, %c0_30] : memref<3x2x2xbf16, #tpu.memory_space<vmem>>, vector<1x2x2xbf16>
    %36 = vector.shape_cast %35 : vector<1x2x2xbf16> to vector<2x2xbf16>
    %cst_31 = arith.constant dense<0.000000e+00> : vector<2x128xf32>
    %37 = tpu.matmul %36, %34, %cst_31 {dimension_numbers = #tpu.dot_dimension_numbers<[1], [0], [0], [1], [0, 0, 1, 1], [], []>} : vector<2x2xbf16>, vector<2x128xbf16>, vector<2x128xf32> -> vector<2x128xf32>
    %38 = arith.truncf %37 : vector<2x128xf32> to vector<2x128xbf16>
    %c0_32 = arith.constant 0 : index
    %c0_33 = arith.constant 0 : index
    %c0_34 = arith.constant 0 : index
    %39 = vector.load %arg7[%c0_32, %c0_33, %c0_34] : memref<3x128x128xbf16, #tpu.memory_space<vmem>>, vector<1x128x128xbf16>
    %40 = vector.shape_cast %39 : vector<1x128x128xbf16> to vector<128x128xbf16>
    %cst_35 = arith.constant dense<0.000000e+00> : vector<2x128xf32>
    %41 = tpu.matmul %38, %40, %cst_35 {dimension_numbers = #tpu.dot_dimension_numbers<[1], [0], [0], [1], [0, 0, 1, 1], [], []>} : vector<2x128xbf16>, vector<128x128xbf16>, vector<2x128xf32> -> vector<2x128xf32>
    %c1_36 = arith.constant 1 : index
    %c0_37 = arith.constant 0 : index
    %c0_38 = arith.constant 0 : index
    %42 = vector.load %arg6[%c1_36, %c0_37, %c0_38] : memref<3x2x2xbf16, #tpu.memory_space<vmem>>, vector<1x2x2xbf16>
    %43 = vector.shape_cast %42 : vector<1x2x2xbf16> to vector<2x2xbf16>
    %cst_39 = arith.constant dense<0.000000e+00> : vector<2x128xf32>
    %44 = tpu.matmul %43, %34, %cst_39 {dimension_numbers = #tpu.dot_dimension_numbers<[1], [0], [0], [1], [0, 0, 1, 1], [], []>} : vector<2x2xbf16>, vector<2x128xbf16>, vector<2x128xf32> -> vector<2x128xf32>
    %45 = arith.truncf %44 : vector<2x128xf32> to vector<2x128xbf16>
    %c1_40 = arith.constant 1 : index
    %c0_41 = arith.constant 0 : index
    %c0_42 = arith.constant 0 : index
    %46 = vector.load %arg7[%c1_40, %c0_41, %c0_42] : memref<3x128x128xbf16, #tpu.memory_space<vmem>>, vector<1x128x128xbf16>
    %47 = vector.shape_cast %46 : vector<1x128x128xbf16> to vector<128x128xbf16>
    %cst_43 = arith.constant dense<0.000000e+00> : vector<2x128xf32>
    %48 = tpu.matmul %45, %47, %cst_43 {dimension_numbers = #tpu.dot_dimension_numbers<[1], [0], [0], [1], [0, 0, 1, 1], [], []>} : vector<2x128xbf16>, vector<128x128xbf16>, vector<2x128xf32> -> vector<2x128xf32>
    %49 = arith.addf %41, %48 : vector<2x128xf32>
    %c2_44 = arith.constant 2 : index
    %c0_45 = arith.constant 0 : index
    %c0_46 = arith.constant 0 : index
    %50 = vector.load %arg6[%c2_44, %c0_45, %c0_46] : memref<3x2x2xbf16, #tpu.memory_space<vmem>>, vector<1x2x2xbf16>
    %51 = vector.shape_cast %50 : vector<1x2x2xbf16> to vector<2x2xbf16>
    %cst_47 = arith.constant dense<0.000000e+00> : vector<2x128xf32>
    %52 = tpu.matmul %51, %34, %cst_47 {dimension_numbers = #tpu.dot_dimension_numbers<[1], [0], [0], [1], [0, 0, 1, 1], [], []>} : vector<2x2xbf16>, vector<2x128xbf16>, vector<2x128xf32> -> vector<2x128xf32>
    %53 = arith.truncf %52 : vector<2x128xf32> to vector<2x128xbf16>
    %c2_48 = arith.constant 2 : index
    %c0_49 = arith.constant 0 : index
    %c0_50 = arith.constant 0 : index
    %54 = vector.load %arg7[%c2_48, %c0_49, %c0_50] : memref<3x128x128xbf16, #tpu.memory_space<vmem>>, vector<1x128x128xbf16>
    %55 = vector.shape_cast %54 : vector<1x128x128xbf16> to vector<128x128xbf16>
    %cst_51 = arith.constant dense<0.000000e+00> : vector<2x128xf32>
    %56 = tpu.matmul %53, %55, %cst_51 {dimension_numbers = #tpu.dot_dimension_numbers<[1], [0], [0], [1], [0, 0, 1, 1], [], []>} : vector<2x128xbf16>, vector<128x128xbf16>, vector<2x128xf32> -> vector<2x128xf32>
    %57 = arith.addf %49, %56 : vector<2x128xf32>
    %c0_52 = arith.constant 0 : index
    %c0_53 = arith.constant 0 : index
    %58 = vector.load %arg8[%c0_52, %c0_53] : memref<1x128xf32, #tpu.memory_space<vmem>>, vector<1x128xf32>
    %59 = vector.broadcast %58 : vector<1x128xf32> to vector<2x128xf32>
    %60 = arith.mulf %57, %59 : vector<2x128xf32>
    %c0_54 = arith.constant 0 : index
    %c0_55 = arith.constant 0 : index
    %61 = vector.load %arg9[%c0_54, %c0_55] : memref<1x128xf32, #tpu.memory_space<vmem>>, vector<1x128xf32>
    %62 = vector.broadcast %61 : vector<1x128xf32> to vector<2x128xf32>
    %63 = arith.addf %60, %62 : vector<2x128xf32>
    %cst_56 = arith.constant 0.000000e+00 : f32
    %64 = vector.broadcast %cst_56 : f32 to vector<2x128xf32>
    %65 = arith.maximumf %63, %64 : vector<2x128xf32>
    %c0_57 = arith.constant 0 : index
    %c0_58 = arith.constant 0 : index
    %c0_59 = arith.constant 0 : index
    %66 = vector.load %arg10[%c0_57, %c0_58, %c0_59] : memref<1x2x128xf32, #tpu.memory_space<vmem>>, vector<1x2x128xf32>
    %67 = vector.shape_cast %66 : vector<1x2x128xf32> to vector<2x128xf32>
    %68 = vector.shape_cast %65 : vector<2x128xf32> to vector<1x2x128xf32>
    tpu.vector_store %arg10[%c0_57, %c0_58, %c0_59], %68 {strides = array<i32>} : memref<1x2x128xf32, #tpu.memory_space<vmem>>, vector<1x2x128xf32>,
    return
  }
  func.func @transform_0(%arg0: i32) -> (i32, i32, i32) {
    %c0_i32 = arith.constant 0 : i32
    %c0_i32_0 = arith.constant 0 : i32
    %c0_i32_1 = arith.constant 0 : i32
    return %arg0, %c0_i32, %c0_i32_0 : i32, i32, i32
  }
  func.func @transform_1(%arg0: i32) -> (i32, i32, i32) {
    %c0_i32 = arith.constant 0 : i32
    %c0_i32_0 = arith.constant 0 : i32
    %c0_i32_1 = arith.constant 0 : i32
    %c0_i32_2 = arith.constant 0 : i32
    return %c0_i32, %c0_i32_0, %c0_i32_1 : i32, i32, i32
  }
  func.func @transform_2(%arg0: i32) -> (i32, i32, i32) {
    %c0_i32 = arith.constant 0 : i32
    %c0_i32_0 = arith.constant 0 : i32
    %c0_i32_1 = arith.constant 0 : i32
    %c0_i32_2 = arith.constant 0 : i32
    return %c0_i32, %c0_i32_0, %c0_i32_1 : i32, i32, i32
  }
  func.func @transform_3(%arg0: i32) -> (i32, i32) {
    %c0_i32 = arith.constant 0 : i32
    %c0_i32_0 = arith.constant 0 : i32
    %c0_i32_1 = arith.constant 0 : i32
    return %c0_i32, %c0_i32_0 : i32, i32
  }
  func.func @transform_4(%arg0: i32) -> (i32, i32) {
    %c0_i32 = arith.constant 0 : i32
    %c0_i32_0 = arith.constant 0 : i32
    %c0_i32_1 = arith.constant 0 : i32
    return %c0_i32, %c0_i32_0 : i32, i32
  }
  func.func @transform_5(%arg0: i32) -> (i32, i32, i32) {
    %c0_i32 = arith.constant 0 : i32
    %c0_i32_0 = arith.constant 0 : i32
    %c0_i32_1 = arith.constant 0 : i32
    %c0_i32_2 = arith.constant 0 : i32
    return %c0_i32, %c0_i32_0, %c0_i32_1 : i32, i32, i32
  }
  func.func @transform_6(%arg0: i32) -> (i32, i32, i32) {
    %c0_i32 = arith.constant 0 : i32
    %c0_i32_0 = arith.constant 0 : i32
    %c0_i32_1 = arith.constant 0 : i32
    %c0_i32_2 = arith.constant 0 : i32
    return %c0_i32, %c0_i32_0, %c0_i32_1 : i32, i32, i32
  }
  func.func @transform_7(%arg0: i32) -> (i32, i32) {
    %c0_i32 = arith.constant 0 : i32
    %c0_i32_0 = arith.constant 0 : i32
    %c0_i32_1 = arith.constant 0 : i32
    return %c0_i32, %c0_i32_0 : i32, i32
  }
  func.func @transform_8(%arg0: i32) -> (i32, i32) {
    %c0_i32 = arith.constant 0 : i32
    %c0_i32_0 = arith.constant 0 : i32
    %c0_i32_1 = arith.constant 0 : i32
    return %c0_i32, %c0_i32_0 : i32, i32
  }
  func.func @transform_9(%arg0: i32) -> (i32, i32, i32) {
    %c0_i32 = arith.constant 0 : i32
    %c0_i32_0 = arith.constant 0 : i32
    %c0_i32_1 = arith.constant 0 : i32
    return %arg0, %c0_i32, %c0_i32_0 : i32, i32, i32
  }
}

module attributes {stable_mosaic.version = 11 : i64} {
  func.func @_down_kernel(%arg0: i32, %arg1: memref<1x16x16xf32, #tpu.memory_space<vmem>>, %arg2: memref<3x8x16xbf16, #tpu.memory_space<vmem>>, %arg3: memref<3x16x128xbf16, #tpu.memory_space<vmem>>, %arg4: memref<1x128xf32, #tpu.memory_space<vmem>>, %arg5: memref<1x128xf32, #tpu.memory_space<vmem>>, %arg6: memref<3x8x8xbf16, #tpu.memory_space<vmem>>, %arg7: memref<3x128x128xbf16, #tpu.memory_space<vmem>>, %arg8: memref<1x128xf32, #tpu.memory_space<vmem>>, %arg9: memref<1x128xf32, #tpu.memory_space<vmem>>, %arg10: memref<1x8x128xf32, #tpu.memory_space<vmem>>) attributes {dimension_semantics = [#tpu.dimension_semantics<parallel>], iteration_bounds = array<i64: 2>, scalar_prefetch = 0 : i64, scratch_operands = 0 : i64, tpu.core_type = #tpu.core_type<tc>, window_params = [{transform_indices = @transform_0, window_bounds = array<i64: 1, 16, 16>}, {pipeline_mode = #tpu.pipeline_mode<synchronous>, transform_indices = @transform_1, window_bounds = array<i64: 3, 8, 16>}, {pipeline_mode = #tpu.pipeline_mode<synchronous>, transform_indices = @transform_2, window_bounds = array<i64: 3, 16, 128>}, {pipeline_mode = #tpu.pipeline_mode<synchronous>, transform_indices = @transform_3, window_bounds = array<i64: 1, 128>}, {pipeline_mode = #tpu.pipeline_mode<synchronous>, transform_indices = @transform_4, window_bounds = array<i64: 1, 128>}, {pipeline_mode = #tpu.pipeline_mode<synchronous>, transform_indices = @transform_5, window_bounds = array<i64: 3, 8, 8>}, {pipeline_mode = #tpu.pipeline_mode<synchronous>, transform_indices = @transform_6, window_bounds = array<i64: 3, 128, 128>}, {pipeline_mode = #tpu.pipeline_mode<synchronous>, transform_indices = @transform_7, window_bounds = array<i64: 1, 128>}, {pipeline_mode = #tpu.pipeline_mode<synchronous>, transform_indices = @transform_8, window_bounds = array<i64: 1, 128>}, {transform_indices = @transform_9, window_bounds = array<i64: 1, 8, 128>}]} {
    %c0 = arith.constant 0 : index
    %c0_0 = arith.constant 0 : index
    %c0_1 = arith.constant 0 : index
    %0 = vector.load %arg1[%c0, %c0_0, %c0_1] : memref<1x16x16xf32, #tpu.memory_space<vmem>>, vector<1x16x16xf32>
    %1 = vector.shape_cast %0 : vector<1x16x16xf32> to vector<16x16xf32>
    %2 = arith.truncf %1 : vector<16x16xf32> to vector<16x16xbf16>
    %c0_2 = arith.constant 0 : index
    %c0_3 = arith.constant 0 : index
    %c0_4 = arith.constant 0 : index
    %3 = vector.load %arg2[%c0_2, %c0_3, %c0_4] : memref<3x8x16xbf16, #tpu.memory_space<vmem>>, vector<1x8x16xbf16>
    %4 = vector.shape_cast %3 : vector<1x8x16xbf16> to vector<8x16xbf16>
    %cst = arith.constant dense<0.000000e+00> : vector<8x16xf32>
    %5 = tpu.matmul %4, %2, %cst {dimension_numbers = #tpu.dot_dimension_numbers<[1], [0], [0], [1], [0, 0, 1, 1], [], []>} : vector<8x16xbf16>, vector<16x16xbf16>, vector<8x16xf32> -> vector<8x16xf32>
    %6 = arith.truncf %5 : vector<8x16xf32> to vector<8x16xbf16>
    %c0_5 = arith.constant 0 : index
    %c0_6 = arith.constant 0 : index
    %c0_7 = arith.constant 0 : index
    %7 = vector.load %arg3[%c0_5, %c0_6, %c0_7] : memref<3x16x128xbf16, #tpu.memory_space<vmem>>, vector<1x16x128xbf16>
    %8 = vector.shape_cast %7 : vector<1x16x128xbf16> to vector<16x128xbf16>
    %cst_8 = arith.constant dense<0.000000e+00> : vector<8x128xf32>
    %9 = tpu.matmul %6, %8, %cst_8 {dimension_numbers = #tpu.dot_dimension_numbers<[1], [0], [0], [1], [0, 0, 1, 1], [], []>} : vector<8x16xbf16>, vector<16x128xbf16>, vector<8x128xf32> -> vector<8x128xf32>
    %c1 = arith.constant 1 : index
    %c0_9 = arith.constant 0 : index
    %c0_10 = arith.constant 0 : index
    %10 = vector.load %arg2[%c1, %c0_9, %c0_10] : memref<3x8x16xbf16, #tpu.memory_space<vmem>>, vector<1x8x16xbf16>
    %11 = vector.shape_cast %10 : vector<1x8x16xbf16> to vector<8x16xbf16>
    %cst_11 = arith.constant dense<0.000000e+00> : vector<8x16xf32>
    %12 = tpu.matmul %11, %2, %cst_11 {dimension_numbers = #tpu.dot_dimension_numbers<[1], [0], [0], [1], [0, 0, 1, 1], [], []>} : vector<8x16xbf16>, vector<16x16xbf16>, vector<8x16xf32> -> vector<8x16xf32>
    %13 = arith.truncf %12 : vector<8x16xf32> to vector<8x16xbf16>
    %c1_12 = arith.constant 1 : index
    %c0_13 = arith.constant 0 : index
    %c0_14 = arith.constant 0 : index
    %14 = vector.load %arg3[%c1_12, %c0_13, %c0_14] : memref<3x16x128xbf16, #tpu.memory_space<vmem>>, vector<1x16x128xbf16>
    %15 = vector.shape_cast %14 : vector<1x16x128xbf16> to vector<16x128xbf16>
    %cst_15 = arith.constant dense<0.000000e+00> : vector<8x128xf32>
    %16 = tpu.matmul %13, %15, %cst_15 {dimension_numbers = #tpu.dot_dimension_numbers<[1], [0], [0], [1], [0, 0, 1, 1], [], []>} : vector<8x16xbf16>, vector<16x128xbf16>, vector<8x128xf32> -> vector<8x128xf32>
    %17 = arith.addf %9, %16 : vector<8x128xf32>
    %c2 = arith.constant 2 : index
    %c0_16 = arith.constant 0 : index
    %c0_17 = arith.constant 0 : index
    %18 = vector.load %arg2[%c2, %c0_16, %c0_17] : memref<3x8x16xbf16, #tpu.memory_space<vmem>>, vector<1x8x16xbf16>
    %19 = vector.shape_cast %18 : vector<1x8x16xbf16> to vector<8x16xbf16>
    %cst_18 = arith.constant dense<0.000000e+00> : vector<8x16xf32>
    %20 = tpu.matmul %19, %2, %cst_18 {dimension_numbers = #tpu.dot_dimension_numbers<[1], [0], [0], [1], [0, 0, 1, 1], [], []>} : vector<8x16xbf16>, vector<16x16xbf16>, vector<8x16xf32> -> vector<8x16xf32>
    %21 = arith.truncf %20 : vector<8x16xf32> to vector<8x16xbf16>
    %c2_19 = arith.constant 2 : index
    %c0_20 = arith.constant 0 : index
    %c0_21 = arith.constant 0 : index
    %22 = vector.load %arg3[%c2_19, %c0_20, %c0_21] : memref<3x16x128xbf16, #tpu.memory_space<vmem>>, vector<1x16x128xbf16>
    %23 = vector.shape_cast %22 : vector<1x16x128xbf16> to vector<16x128xbf16>
    %cst_22 = arith.constant dense<0.000000e+00> : vector<8x128xf32>
    %24 = tpu.matmul %21, %23, %cst_22 {dimension_numbers = #tpu.dot_dimension_numbers<[1], [0], [0], [1], [0, 0, 1, 1], [], []>} : vector<8x16xbf16>, vector<16x128xbf16>, vector<8x128xf32> -> vector<8x128xf32>
    %25 = arith.addf %17, %24 : vector<8x128xf32>
    %c0_23 = arith.constant 0 : index
    %c0_24 = arith.constant 0 : index
    %26 = vector.load %arg4[%c0_23, %c0_24] : memref<1x128xf32, #tpu.memory_space<vmem>>, vector<1x128xf32>
    %27 = vector.broadcast %26 : vector<1x128xf32> to vector<8x128xf32>
    %28 = arith.mulf %25, %27 : vector<8x128xf32>
    %c0_25 = arith.constant 0 : index
    %c0_26 = arith.constant 0 : index
    %29 = vector.load %arg5[%c0_25, %c0_26] : memref<1x128xf32, #tpu.memory_space<vmem>>, vector<1x128xf32>
    %30 = vector.broadcast %29 : vector<1x128xf32> to vector<8x128xf32>
    %31 = arith.addf %28, %30 : vector<8x128xf32>
    %cst_27 = arith.constant 0.000000e+00 : f32
    %32 = vector.broadcast %cst_27 : f32 to vector<8x128xf32>
    %33 = arith.maximumf %31, %32 : vector<8x128xf32>
    %34 = arith.truncf %33 : vector<8x128xf32> to vector<8x128xbf16>
    %c0_28 = arith.constant 0 : index
    %c0_29 = arith.constant 0 : index
    %c0_30 = arith.constant 0 : index
    %35 = vector.load %arg6[%c0_28, %c0_29, %c0_30] : memref<3x8x8xbf16, #tpu.memory_space<vmem>>, vector<1x8x8xbf16>
    %36 = vector.shape_cast %35 : vector<1x8x8xbf16> to vector<8x8xbf16>
    %cst_31 = arith.constant dense<0.000000e+00> : vector<8x128xf32>
    %37 = tpu.matmul %36, %34, %cst_31 {dimension_numbers = #tpu.dot_dimension_numbers<[1], [0], [0], [1], [0, 0, 1, 1], [], []>} : vector<8x8xbf16>, vector<8x128xbf16>, vector<8x128xf32> -> vector<8x128xf32>
    %38 = arith.truncf %37 : vector<8x128xf32> to vector<8x128xbf16>
    %c0_32 = arith.constant 0 : index
    %c0_33 = arith.constant 0 : index
    %c0_34 = arith.constant 0 : index
    %39 = vector.load %arg7[%c0_32, %c0_33, %c0_34] : memref<3x128x128xbf16, #tpu.memory_space<vmem>>, vector<1x128x128xbf16>
    %40 = vector.shape_cast %39 : vector<1x128x128xbf16> to vector<128x128xbf16>
    %cst_35 = arith.constant dense<0.000000e+00> : vector<8x128xf32>
    %41 = tpu.matmul %38, %40, %cst_35 {dimension_numbers = #tpu.dot_dimension_numbers<[1], [0], [0], [1], [0, 0, 1, 1], [], []>} : vector<8x128xbf16>, vector<128x128xbf16>, vector<8x128xf32> -> vector<8x128xf32>
    %c1_36 = arith.constant 1 : index
    %c0_37 = arith.constant 0 : index
    %c0_38 = arith.constant 0 : index
    %42 = vector.load %arg6[%c1_36, %c0_37, %c0_38] : memref<3x8x8xbf16, #tpu.memory_space<vmem>>, vector<1x8x8xbf16>
    %43 = vector.shape_cast %42 : vector<1x8x8xbf16> to vector<8x8xbf16>
    %cst_39 = arith.constant dense<0.000000e+00> : vector<8x128xf32>
    %44 = tpu.matmul %43, %34, %cst_39 {dimension_numbers = #tpu.dot_dimension_numbers<[1], [0], [0], [1], [0, 0, 1, 1], [], []>} : vector<8x8xbf16>, vector<8x128xbf16>, vector<8x128xf32> -> vector<8x128xf32>
    %45 = arith.truncf %44 : vector<8x128xf32> to vector<8x128xbf16>
    %c1_40 = arith.constant 1 : index
    %c0_41 = arith.constant 0 : index
    %c0_42 = arith.constant 0 : index
    %46 = vector.load %arg7[%c1_40, %c0_41, %c0_42] : memref<3x128x128xbf16, #tpu.memory_space<vmem>>, vector<1x128x128xbf16>
    %47 = vector.shape_cast %46 : vector<1x128x128xbf16> to vector<128x128xbf16>
    %cst_43 = arith.constant dense<0.000000e+00> : vector<8x128xf32>
    %48 = tpu.matmul %45, %47, %cst_43 {dimension_numbers = #tpu.dot_dimension_numbers<[1], [0], [0], [1], [0, 0, 1, 1], [], []>} : vector<8x128xbf16>, vector<128x128xbf16>, vector<8x128xf32> -> vector<8x128xf32>
    %49 = arith.addf %41, %48 : vector<8x128xf32>
    %c2_44 = arith.constant 2 : index
    %c0_45 = arith.constant 0 : index
    %c0_46 = arith.constant 0 : index
    %50 = vector.load %arg6[%c2_44, %c0_45, %c0_46] : memref<3x8x8xbf16, #tpu.memory_space<vmem>>, vector<1x8x8xbf16>
    %51 = vector.shape_cast %50 : vector<1x8x8xbf16> to vector<8x8xbf16>
    %cst_47 = arith.constant dense<0.000000e+00> : vector<8x128xf32>
    %52 = tpu.matmul %51, %34, %cst_47 {dimension_numbers = #tpu.dot_dimension_numbers<[1], [0], [0], [1], [0, 0, 1, 1], [], []>} : vector<8x8xbf16>, vector<8x128xbf16>, vector<8x128xf32> -> vector<8x128xf32>
    %53 = arith.truncf %52 : vector<8x128xf32> to vector<8x128xbf16>
    %c2_48 = arith.constant 2 : index
    %c0_49 = arith.constant 0 : index
    %c0_50 = arith.constant 0 : index
    %54 = vector.load %arg7[%c2_48, %c0_49, %c0_50] : memref<3x128x128xbf16, #tpu.memory_space<vmem>>, vector<1x128x128xbf16>
    %55 = vector.shape_cast %54 : vector<1x128x128xbf16> to vector<128x128xbf16>
    %cst_51 = arith.constant dense<0.000000e+00> : vector<8x128xf32>
    %56 = tpu.matmul %53, %55, %cst_51 {dimension_numbers = #tpu.dot_dimension_numbers<[1], [0], [0], [1], [0, 0, 1, 1], [], []>} : vector<8x128xbf16>, vector<128x128xbf16>, vector<8x128xf32> -> vector<8x128xf32>
    %57 = arith.addf %49, %56 : vector<8x128xf32>
    %c0_52 = arith.constant 0 : index
    %c0_53 = arith.constant 0 : index
    %58 = vector.load %arg8[%c0_52, %c0_53] : memref<1x128xf32, #tpu.memory_space<vmem>>, vector<1x128xf32>
    %59 = vector.broadcast %58 : vector<1x128xf32> to vector<8x128xf32>
    %60 = arith.mulf %57, %59 : vector<8x128xf32>
    %c0_54 = arith.constant 0 : index
    %c0_55 = arith.constant 0 : index
    %61 = vector.load %arg9[%c0_54, %c0_55] : memref<1x128xf32, #tpu.memory_space<vmem>>, vector<1x128xf32>
    %62 = vector.broadcast %61 : vector<1x128xf32> to vector<8x128xf32>
    %63 = arith.addf %60, %62 : vector<8x128xf32>
    %cst_56 = arith.constant 0.000000e+00 : f32
    %64 = vector.broadcast %cst_56 : f32 to vector<8x128xf32>
    %65 = arith.maximumf %63, %64 : vector<8x128xf32>
    %c0_57 = arith.constant 0 : index
    %c0_58 = arith.constant 0 : index
    %c0_59 = arith.constant 0 : index
    %66 = vector.load %arg10[%c0_57, %c0_58, %c0_59] : memref<1x8x128xf32, #tpu.memory_space<vmem>>, vector<1x8x128xf32>
    %67 = vector.shape_cast %66 : vector<1x8x128xf32> to vector<8x128xf32>
    %68 = vector.shape_cast %65 : vector<8x128xf32> to vector<1x8x128xf32>
    tpu.vector_store %arg10[%c0_57, %c0_58, %c0_59], %68 {strides = array<i32>} : memref<1x8x128xf32, #tpu.memory_space<vmem>>, vector<1x8x128xf32>,
    return
  }
  func.func @transform_0(%arg0: i32) -> (i32, i32, i32) {
    %c0_i32 = arith.constant 0 : i32
    %c0_i32_0 = arith.constant 0 : i32
    %c0_i32_1 = arith.constant 0 : i32
    return %arg0, %c0_i32, %c0_i32_0 : i32, i32, i32
  }
  func.func @transform_1(%arg0: i32) -> (i32, i32, i32) {
    %c0_i32 = arith.constant 0 : i32
    %c0_i32_0 = arith.constant 0 : i32
    %c0_i32_1 = arith.constant 0 : i32
    %c0_i32_2 = arith.constant 0 : i32
    return %c0_i32, %c0_i32_0, %c0_i32_1 : i32, i32, i32
  }
  func.func @transform_2(%arg0: i32) -> (i32, i32, i32) {
    %c0_i32 = arith.constant 0 : i32
    %c0_i32_0 = arith.constant 0 : i32
    %c0_i32_1 = arith.constant 0 : i32
    %c0_i32_2 = arith.constant 0 : i32
    return %c0_i32, %c0_i32_0, %c0_i32_1 : i32, i32, i32
  }
  func.func @transform_3(%arg0: i32) -> (i32, i32) {
    %c0_i32 = arith.constant 0 : i32
    %c0_i32_0 = arith.constant 0 : i32
    %c0_i32_1 = arith.constant 0 : i32
    return %c0_i32, %c0_i32_0 : i32, i32
  }
  func.func @transform_4(%arg0: i32) -> (i32, i32) {
    %c0_i32 = arith.constant 0 : i32
    %c0_i32_0 = arith.constant 0 : i32
    %c0_i32_1 = arith.constant 0 : i32
    return %c0_i32, %c0_i32_0 : i32, i32
  }
  func.func @transform_5(%arg0: i32) -> (i32, i32, i32) {
    %c0_i32 = arith.constant 0 : i32
    %c0_i32_0 = arith.constant 0 : i32
    %c0_i32_1 = arith.constant 0 : i32
    %c0_i32_2 = arith.constant 0 : i32
    return %c0_i32, %c0_i32_0, %c0_i32_1 : i32, i32, i32
  }
  func.func @transform_6(%arg0: i32) -> (i32, i32, i32) {
    %c0_i32 = arith.constant 0 : i32
    %c0_i32_0 = arith.constant 0 : i32
    %c0_i32_1 = arith.constant 0 : i32
    %c0_i32_2 = arith.constant 0 : i32
    return %c0_i32, %c0_i32_0, %c0_i32_1 : i32, i32, i32
  }
  func.func @transform_7(%arg0: i32) -> (i32, i32) {
    %c0_i32 = arith.constant 0 : i32
    %c0_i32_0 = arith.constant 0 : i32
    %c0_i32_1 = arith.constant 0 : i32
    return %c0_i32, %c0_i32_0 : i32, i32
  }
  func.func @transform_8(%arg0: i32) -> (i32, i32) {
    %c0_i32 = arith.constant 0 : i32
    %c0_i32_0 = arith.constant 0 : i32
    %c0_i32_1 = arith.constant 0 : i32
    return %c0_i32, %c0_i32_0 : i32, i32
  }
  func.func @transform_9(%arg0: i32) -> (i32, i32, i32) {
    %c0_i32 = arith.constant 0 : i32
    %c0_i32_0 = arith.constant 0 : i32
    %c0_i32_1 = arith.constant 0 : i32
    return %arg0, %c0_i32, %c0_i32_0 : i32, i32, i32
  }
}

module attributes {stable_mosaic.version = 11 : i64} {
  func.func @_down_kernel(%arg0: i32, %arg1: memref<1x8x128xf32, #tpu.memory_space<vmem>>, %arg2: memref<3x4x8xbf16, #tpu.memory_space<vmem>>, %arg3: memref<3x128x128xbf16, #tpu.memory_space<vmem>>, %arg4: memref<1x128xf32, #tpu.memory_space<vmem>>, %arg5: memref<1x128xf32, #tpu.memory_space<vmem>>, %arg6: memref<3x4x4xbf16, #tpu.memory_space<vmem>>, %arg7: memref<3x128x128xbf16, #tpu.memory_space<vmem>>, %arg8: memref<1x128xf32, #tpu.memory_space<vmem>>, %arg9: memref<1x128xf32, #tpu.memory_space<vmem>>, %arg10: memref<1x4x128xf32, #tpu.memory_space<vmem>>) attributes {dimension_semantics = [#tpu.dimension_semantics<parallel>], iteration_bounds = array<i64: 2>, scalar_prefetch = 0 : i64, scratch_operands = 0 : i64, tpu.core_type = #tpu.core_type<tc>, window_params = [{transform_indices = @transform_0, window_bounds = array<i64: 1, 8, 128>}, {pipeline_mode = #tpu.pipeline_mode<synchronous>, transform_indices = @transform_1, window_bounds = array<i64: 3, 4, 8>}, {pipeline_mode = #tpu.pipeline_mode<synchronous>, transform_indices = @transform_2, window_bounds = array<i64: 3, 128, 128>}, {pipeline_mode = #tpu.pipeline_mode<synchronous>, transform_indices = @transform_3, window_bounds = array<i64: 1, 128>}, {pipeline_mode = #tpu.pipeline_mode<synchronous>, transform_indices = @transform_4, window_bounds = array<i64: 1, 128>}, {pipeline_mode = #tpu.pipeline_mode<synchronous>, transform_indices = @transform_5, window_bounds = array<i64: 3, 4, 4>}, {pipeline_mode = #tpu.pipeline_mode<synchronous>, transform_indices = @transform_6, window_bounds = array<i64: 3, 128, 128>}, {pipeline_mode = #tpu.pipeline_mode<synchronous>, transform_indices = @transform_7, window_bounds = array<i64: 1, 128>}, {pipeline_mode = #tpu.pipeline_mode<synchronous>, transform_indices = @transform_8, window_bounds = array<i64: 1, 128>}, {transform_indices = @transform_9, window_bounds = array<i64: 1, 4, 128>}]} {
    %c0 = arith.constant 0 : index
    %c0_0 = arith.constant 0 : index
    %c0_1 = arith.constant 0 : index
    %0 = vector.load %arg1[%c0, %c0_0, %c0_1] : memref<1x8x128xf32, #tpu.memory_space<vmem>>, vector<1x8x128xf32>
    %1 = vector.shape_cast %0 : vector<1x8x128xf32> to vector<8x128xf32>
    %2 = arith.truncf %1 : vector<8x128xf32> to vector<8x128xbf16>
    %c0_2 = arith.constant 0 : index
    %c0_3 = arith.constant 0 : index
    %c0_4 = arith.constant 0 : index
    %3 = vector.load %arg2[%c0_2, %c0_3, %c0_4] : memref<3x4x8xbf16, #tpu.memory_space<vmem>>, vector<1x4x8xbf16>
    %4 = vector.shape_cast %3 : vector<1x4x8xbf16> to vector<4x8xbf16>
    %cst = arith.constant dense<0.000000e+00> : vector<4x128xf32>
    %5 = tpu.matmul %4, %2, %cst {dimension_numbers = #tpu.dot_dimension_numbers<[1], [0], [0], [1], [0, 0, 1, 1], [], []>} : vector<4x8xbf16>, vector<8x128xbf16>, vector<4x128xf32> -> vector<4x128xf32>
    %6 = arith.truncf %5 : vector<4x128xf32> to vector<4x128xbf16>
    %c0_5 = arith.constant 0 : index
    %c0_6 = arith.constant 0 : index
    %c0_7 = arith.constant 0 : index
    %7 = vector.load %arg3[%c0_5, %c0_6, %c0_7] : memref<3x128x128xbf16, #tpu.memory_space<vmem>>, vector<1x128x128xbf16>
    %8 = vector.shape_cast %7 : vector<1x128x128xbf16> to vector<128x128xbf16>
    %cst_8 = arith.constant dense<0.000000e+00> : vector<4x128xf32>
    %9 = tpu.matmul %6, %8, %cst_8 {dimension_numbers = #tpu.dot_dimension_numbers<[1], [0], [0], [1], [0, 0, 1, 1], [], []>} : vector<4x128xbf16>, vector<128x128xbf16>, vector<4x128xf32> -> vector<4x128xf32>
    %c1 = arith.constant 1 : index
    %c0_9 = arith.constant 0 : index
    %c0_10 = arith.constant 0 : index
    %10 = vector.load %arg2[%c1, %c0_9, %c0_10] : memref<3x4x8xbf16, #tpu.memory_space<vmem>>, vector<1x4x8xbf16>
    %11 = vector.shape_cast %10 : vector<1x4x8xbf16> to vector<4x8xbf16>
    %cst_11 = arith.constant dense<0.000000e+00> : vector<4x128xf32>
    %12 = tpu.matmul %11, %2, %cst_11 {dimension_numbers = #tpu.dot_dimension_numbers<[1], [0], [0], [1], [0, 0, 1, 1], [], []>} : vector<4x8xbf16>, vector<8x128xbf16>, vector<4x128xf32> -> vector<4x128xf32>
    %13 = arith.truncf %12 : vector<4x128xf32> to vector<4x128xbf16>
    %c1_12 = arith.constant 1 : index
    %c0_13 = arith.constant 0 : index
    %c0_14 = arith.constant 0 : index
    %14 = vector.load %arg3[%c1_12, %c0_13, %c0_14] : memref<3x128x128xbf16, #tpu.memory_space<vmem>>, vector<1x128x128xbf16>
    %15 = vector.shape_cast %14 : vector<1x128x128xbf16> to vector<128x128xbf16>
    %cst_15 = arith.constant dense<0.000000e+00> : vector<4x128xf32>
    %16 = tpu.matmul %13, %15, %cst_15 {dimension_numbers = #tpu.dot_dimension_numbers<[1], [0], [0], [1], [0, 0, 1, 1], [], []>} : vector<4x128xbf16>, vector<128x128xbf16>, vector<4x128xf32> -> vector<4x128xf32>
    %17 = arith.addf %9, %16 : vector<4x128xf32>
    %c2 = arith.constant 2 : index
    %c0_16 = arith.constant 0 : index
    %c0_17 = arith.constant 0 : index
    %18 = vector.load %arg2[%c2, %c0_16, %c0_17] : memref<3x4x8xbf16, #tpu.memory_space<vmem>>, vector<1x4x8xbf16>
    %19 = vector.shape_cast %18 : vector<1x4x8xbf16> to vector<4x8xbf16>
    %cst_18 = arith.constant dense<0.000000e+00> : vector<4x128xf32>
    %20 = tpu.matmul %19, %2, %cst_18 {dimension_numbers = #tpu.dot_dimension_numbers<[1], [0], [0], [1], [0, 0, 1, 1], [], []>} : vector<4x8xbf16>, vector<8x128xbf16>, vector<4x128xf32> -> vector<4x128xf32>
    %21 = arith.truncf %20 : vector<4x128xf32> to vector<4x128xbf16>
    %c2_19 = arith.constant 2 : index
    %c0_20 = arith.constant 0 : index
    %c0_21 = arith.constant 0 : index
    %22 = vector.load %arg3[%c2_19, %c0_20, %c0_21] : memref<3x128x128xbf16, #tpu.memory_space<vmem>>, vector<1x128x128xbf16>
    %23 = vector.shape_cast %22 : vector<1x128x128xbf16> to vector<128x128xbf16>
    %cst_22 = arith.constant dense<0.000000e+00> : vector<4x128xf32>
    %24 = tpu.matmul %21, %23, %cst_22 {dimension_numbers = #tpu.dot_dimension_numbers<[1], [0], [0], [1], [0, 0, 1, 1], [], []>} : vector<4x128xbf16>, vector<128x128xbf16>, vector<4x128xf32> -> vector<4x128xf32>
    %25 = arith.addf %17, %24 : vector<4x128xf32>
    %c0_23 = arith.constant 0 : index
    %c0_24 = arith.constant 0 : index
    %26 = vector.load %arg4[%c0_23, %c0_24] : memref<1x128xf32, #tpu.memory_space<vmem>>, vector<1x128xf32>
    %27 = vector.broadcast %26 : vector<1x128xf32> to vector<4x128xf32>
    %28 = arith.mulf %25, %27 : vector<4x128xf32>
    %c0_25 = arith.constant 0 : index
    %c0_26 = arith.constant 0 : index
    %29 = vector.load %arg5[%c0_25, %c0_26] : memref<1x128xf32, #tpu.memory_space<vmem>>, vector<1x128xf32>
    %30 = vector.broadcast %29 : vector<1x128xf32> to vector<4x128xf32>
    %31 = arith.addf %28, %30 : vector<4x128xf32>
    %cst_27 = arith.constant 0.000000e+00 : f32
    %32 = vector.broadcast %cst_27 : f32 to vector<4x128xf32>
    %33 = arith.maximumf %31, %32 : vector<4x128xf32>
    %34 = arith.truncf %33 : vector<4x128xf32> to vector<4x128xbf16>
    %c0_28 = arith.constant 0 : index
    %c0_29 = arith.constant 0 : index
    %c0_30 = arith.constant 0 : index
    %35 = vector.load %arg6[%c0_28, %c0_29, %c0_30] : memref<3x4x4xbf16, #tpu.memory_space<vmem>>, vector<1x4x4xbf16>
    %36 = vector.shape_cast %35 : vector<1x4x4xbf16> to vector<4x4xbf16>
    %cst_31 = arith.constant dense<0.000000e+00> : vector<4x128xf32>
    %37 = tpu.matmul %36, %34, %cst_31 {dimension_numbers = #tpu.dot_dimension_numbers<[1], [0], [0], [1], [0, 0, 1, 1], [], []>} : vector<4x4xbf16>, vector<4x128xbf16>, vector<4x128xf32> -> vector<4x128xf32>
    %38 = arith.truncf %37 : vector<4x128xf32> to vector<4x128xbf16>
    %c0_32 = arith.constant 0 : index
    %c0_33 = arith.constant 0 : index
    %c0_34 = arith.constant 0 : index
    %39 = vector.load %arg7[%c0_32, %c0_33, %c0_34] : memref<3x128x128xbf16, #tpu.memory_space<vmem>>, vector<1x128x128xbf16>
    %40 = vector.shape_cast %39 : vector<1x128x128xbf16> to vector<128x128xbf16>
    %cst_35 = arith.constant dense<0.000000e+00> : vector<4x128xf32>
    %41 = tpu.matmul %38, %40, %cst_35 {dimension_numbers = #tpu.dot_dimension_numbers<[1], [0], [0], [1], [0, 0, 1, 1], [], []>} : vector<4x128xbf16>, vector<128x128xbf16>, vector<4x128xf32> -> vector<4x128xf32>
    %c1_36 = arith.constant 1 : index
    %c0_37 = arith.constant 0 : index
    %c0_38 = arith.constant 0 : index
    %42 = vector.load %arg6[%c1_36, %c0_37, %c0_38] : memref<3x4x4xbf16, #tpu.memory_space<vmem>>, vector<1x4x4xbf16>
    %43 = vector.shape_cast %42 : vector<1x4x4xbf16> to vector<4x4xbf16>
    %cst_39 = arith.constant dense<0.000000e+00> : vector<4x128xf32>
    %44 = tpu.matmul %43, %34, %cst_39 {dimension_numbers = #tpu.dot_dimension_numbers<[1], [0], [0], [1], [0, 0, 1, 1], [], []>} : vector<4x4xbf16>, vector<4x128xbf16>, vector<4x128xf32> -> vector<4x128xf32>
    %45 = arith.truncf %44 : vector<4x128xf32> to vector<4x128xbf16>
    %c1_40 = arith.constant 1 : index
    %c0_41 = arith.constant 0 : index
    %c0_42 = arith.constant 0 : index
    %46 = vector.load %arg7[%c1_40, %c0_41, %c0_42] : memref<3x128x128xbf16, #tpu.memory_space<vmem>>, vector<1x128x128xbf16>
    %47 = vector.shape_cast %46 : vector<1x128x128xbf16> to vector<128x128xbf16>
    %cst_43 = arith.constant dense<0.000000e+00> : vector<4x128xf32>
    %48 = tpu.matmul %45, %47, %cst_43 {dimension_numbers = #tpu.dot_dimension_numbers<[1], [0], [0], [1], [0, 0, 1, 1], [], []>} : vector<4x128xbf16>, vector<128x128xbf16>, vector<4x128xf32> -> vector<4x128xf32>
    %49 = arith.addf %41, %48 : vector<4x128xf32>
    %c2_44 = arith.constant 2 : index
    %c0_45 = arith.constant 0 : index
    %c0_46 = arith.constant 0 : index
    %50 = vector.load %arg6[%c2_44, %c0_45, %c0_46] : memref<3x4x4xbf16, #tpu.memory_space<vmem>>, vector<1x4x4xbf16>
    %51 = vector.shape_cast %50 : vector<1x4x4xbf16> to vector<4x4xbf16>
    %cst_47 = arith.constant dense<0.000000e+00> : vector<4x128xf32>
    %52 = tpu.matmul %51, %34, %cst_47 {dimension_numbers = #tpu.dot_dimension_numbers<[1], [0], [0], [1], [0, 0, 1, 1], [], []>} : vector<4x4xbf16>, vector<4x128xbf16>, vector<4x128xf32> -> vector<4x128xf32>
    %53 = arith.truncf %52 : vector<4x128xf32> to vector<4x128xbf16>
    %c2_48 = arith.constant 2 : index
    %c0_49 = arith.constant 0 : index
    %c0_50 = arith.constant 0 : index
    %54 = vector.load %arg7[%c2_48, %c0_49, %c0_50] : memref<3x128x128xbf16, #tpu.memory_space<vmem>>, vector<1x128x128xbf16>
    %55 = vector.shape_cast %54 : vector<1x128x128xbf16> to vector<128x128xbf16>
    %cst_51 = arith.constant dense<0.000000e+00> : vector<4x128xf32>
    %56 = tpu.matmul %53, %55, %cst_51 {dimension_numbers = #tpu.dot_dimension_numbers<[1], [0], [0], [1], [0, 0, 1, 1], [], []>} : vector<4x128xbf16>, vector<128x128xbf16>, vector<4x128xf32> -> vector<4x128xf32>
    %57 = arith.addf %49, %56 : vector<4x128xf32>
    %c0_52 = arith.constant 0 : index
    %c0_53 = arith.constant 0 : index
    %58 = vector.load %arg8[%c0_52, %c0_53] : memref<1x128xf32, #tpu.memory_space<vmem>>, vector<1x128xf32>
    %59 = vector.broadcast %58 : vector<1x128xf32> to vector<4x128xf32>
    %60 = arith.mulf %57, %59 : vector<4x128xf32>
    %c0_54 = arith.constant 0 : index
    %c0_55 = arith.constant 0 : index
    %61 = vector.load %arg9[%c0_54, %c0_55] : memref<1x128xf32, #tpu.memory_space<vmem>>, vector<1x128xf32>
    %62 = vector.broadcast %61 : vector<1x128xf32> to vector<4x128xf32>
    %63 = arith.addf %60, %62 : vector<4x128xf32>
    %cst_56 = arith.constant 0.000000e+00 : f32
    %64 = vector.broadcast %cst_56 : f32 to vector<4x128xf32>
    %65 = arith.maximumf %63, %64 : vector<4x128xf32>
    %c0_57 = arith.constant 0 : index
    %c0_58 = arith.constant 0 : index
    %c0_59 = arith.constant 0 : index
    %66 = vector.load %arg10[%c0_57, %c0_58, %c0_59] : memref<1x4x128xf32, #tpu.memory_space<vmem>>, vector<1x4x128xf32>
    %67 = vector.shape_cast %66 : vector<1x4x128xf32> to vector<4x128xf32>
    %68 = vector.shape_cast %65 : vector<4x128xf32> to vector<1x4x128xf32>
    tpu.vector_store %arg10[%c0_57, %c0_58, %c0_59], %68 {strides = array<i32>} : memref<1x4x128xf32, #tpu.memory_space<vmem>>, vector<1x4x128xf32>,
    return
  }
  func.func @transform_0(%arg0: i32) -> (i32, i32, i32) {
    %c0_i32 = arith.constant 0 : i32
    %c0_i32_0 = arith.constant 0 : i32
    %c0_i32_1 = arith.constant 0 : i32
    return %arg0, %c0_i32, %c0_i32_0 : i32, i32, i32
  }
  func.func @transform_1(%arg0: i32) -> (i32, i32, i32) {
    %c0_i32 = arith.constant 0 : i32
    %c0_i32_0 = arith.constant 0 : i32
    %c0_i32_1 = arith.constant 0 : i32
    %c0_i32_2 = arith.constant 0 : i32
    return %c0_i32, %c0_i32_0, %c0_i32_1 : i32, i32, i32
  }
  func.func @transform_2(%arg0: i32) -> (i32, i32, i32) {
    %c0_i32 = arith.constant 0 : i32
    %c0_i32_0 = arith.constant 0 : i32
    %c0_i32_1 = arith.constant 0 : i32
    %c0_i32_2 = arith.constant 0 : i32
    return %c0_i32, %c0_i32_0, %c0_i32_1 : i32, i32, i32
  }
  func.func @transform_3(%arg0: i32) -> (i32, i32) {
    %c0_i32 = arith.constant 0 : i32
    %c0_i32_0 = arith.constant 0 : i32
    %c0_i32_1 = arith.constant 0 : i32
    return %c0_i32, %c0_i32_0 : i32, i32
  }
  func.func @transform_4(%arg0: i32) -> (i32, i32) {
    %c0_i32 = arith.constant 0 : i32
    %c0_i32_0 = arith.constant 0 : i32
    %c0_i32_1 = arith.constant 0 : i32
    return %c0_i32, %c0_i32_0 : i32, i32
  }
  func.func @transform_5(%arg0: i32) -> (i32, i32, i32) {
    %c0_i32 = arith.constant 0 : i32
    %c0_i32_0 = arith.constant 0 : i32
    %c0_i32_1 = arith.constant 0 : i32
    %c0_i32_2 = arith.constant 0 : i32
    return %c0_i32, %c0_i32_0, %c0_i32_1 : i32, i32, i32
  }
  func.func @transform_6(%arg0: i32) -> (i32, i32, i32) {
    %c0_i32 = arith.constant 0 : i32
    %c0_i32_0 = arith.constant 0 : i32
    %c0_i32_1 = arith.constant 0 : i32
    %c0_i32_2 = arith.constant 0 : i32
    return %c0_i32, %c0_i32_0, %c0_i32_1 : i32, i32, i32
  }
  func.func @transform_7(%arg0: i32) -> (i32, i32) {
    %c0_i32 = arith.constant 0 : i32
    %c0_i32_0 = arith.constant 0 : i32
    %c0_i32_1 = arith.constant 0 : i32
    return %c0_i32, %c0_i32_0 : i32, i32
  }
  func.func @transform_8(%arg0: i32) -> (i32, i32) {
    %c0_i32 = arith.constant 0 : i32
    %c0_i32_0 = arith.constant 0 : i32
    %c0_i32_1 = arith.constant 0 : i32
    return %c0_i32, %c0_i32_0 : i32, i32
  }
  func.func @transform_9(%arg0: i32) -> (i32, i32, i32) {
    %c0_i32 = arith.constant 0 : i32
    %c0_i32_0 = arith.constant 0 : i32
    %c0_i32_1 = arith.constant 0 : i32
    return %arg0, %c0_i32, %c0_i32_0 : i32, i32, i32
  }
}

module attributes {stable_mosaic.version = 11 : i64} {
  func.func @_up_add_kernel(%arg0: i32, %arg1: memref<1x2x128xf32, #tpu.memory_space<vmem>>, %arg2: memref<1x4x128xf32, #tpu.memory_space<vmem>>, %arg3: memref<3x4x2xbf16, #tpu.memory_space<vmem>>, %arg4: memref<3x128x128xbf16, #tpu.memory_space<vmem>>, %arg5: memref<1x128xf32, #tpu.memory_space<vmem>>, %arg6: memref<1x128xf32, #tpu.memory_space<vmem>>, %arg7: memref<3x4x4xbf16, #tpu.memory_space<vmem>>, %arg8: memref<3x128x128xbf16, #tpu.memory_space<vmem>>, %arg9: memref<1x128xf32, #tpu.memory_space<vmem>>, %arg10: memref<1x128xf32, #tpu.memory_space<vmem>>, %arg11: memref<3x4x4xbf16, #tpu.memory_space<vmem>>, %arg12: memref<3x128x128xbf16, #tpu.memory_space<vmem>>, %arg13: memref<1x128xf32, #tpu.memory_space<vmem>>, %arg14: memref<1x128xf32, #tpu.memory_space<vmem>>, %arg15: memref<1x4x128xf32, #tpu.memory_space<vmem>>) attributes {dimension_semantics = [#tpu.dimension_semantics<parallel>], iteration_bounds = array<i64: 2>, scalar_prefetch = 0 : i64, scratch_operands = 0 : i64, tpu.core_type = #tpu.core_type<tc>, window_params = [{transform_indices = @transform_0, window_bounds = array<i64: 1, 2, 128>}, {transform_indices = @transform_1, window_bounds = array<i64: 1, 4, 128>}, {pipeline_mode = #tpu.pipeline_mode<synchronous>, transform_indices = @transform_2, window_bounds = array<i64: 3, 4, 2>}, {pipeline_mode = #tpu.pipeline_mode<synchronous>, transform_indices = @transform_3, window_bounds = array<i64: 3, 128, 128>}, {pipeline_mode = #tpu.pipeline_mode<synchronous>, transform_indices = @transform_4, window_bounds = array<i64: 1, 128>}, {pipeline_mode = #tpu.pipeline_mode<synchronous>, transform_indices = @transform_5, window_bounds = array<i64: 1, 128>}, {pipeline_mode = #tpu.pipeline_mode<synchronous>, transform_indices = @transform_6, window_bounds = array<i64: 3, 4, 4>}, {pipeline_mode = #tpu.pipeline_mode<synchronous>, transform_indices = @transform_7, window_bounds = array<i64: 3, 128, 128>}, {pipeline_mode = #tpu.pipeline_mode<synchronous>, transform_indices = @transform_8, window_bounds = array<i64: 1, 128>}, {pipeline_mode = #tpu.pipeline_mode<synchronous>, transform_indices = @transform_9, window_bounds = array<i64: 1, 128>}, {pipeline_mode = #tpu.pipeline_mode<synchronous>, transform_indices = @transform_10, window_bounds = array<i64: 3, 4, 4>}, {pipeline_mode = #tpu.pipeline_mode<synchronous>, transform_indices = @transform_11, window_bounds = array<i64: 3, 128, 128>}, {pipeline_mode = #tpu.pipeline_mode<synchronous>, transform_indices = @transform_12, window_bounds = array<i64: 1, 128>}, {pipeline_mode = #tpu.pipeline_mode<synchronous>, transform_indices = @transform_13, window_bounds = array<i64: 1, 128>}, {transform_indices = @transform_14, window_bounds = array<i64: 1, 4, 128>}]} {
    %c0 = arith.constant 0 : index
    %c0_0 = arith.constant 0 : index
    %c0_1 = arith.constant 0 : index
    %0 = vector.load %arg1[%c0, %c0_0, %c0_1] : memref<1x2x128xf32, #tpu.memory_space<vmem>>, vector<1x2x128xf32>
    %1 = vector.shape_cast %0 : vector<1x2x128xf32> to vector<2x128xf32>
    %2 = arith.truncf %1 : vector<2x128xf32> to vector<2x128xbf16>
    %c0_2 = arith.constant 0 : index
    %c0_3 = arith.constant 0 : index
    %c0_4 = arith.constant 0 : index
    %3 = vector.load %arg3[%c0_2, %c0_3, %c0_4] : memref<3x4x2xbf16, #tpu.memory_space<vmem>>, vector<1x4x2xbf16>
    %4 = vector.shape_cast %3 : vector<1x4x2xbf16> to vector<4x2xbf16>
    %cst = arith.constant dense<0.000000e+00> : vector<4x128xf32>
    %5 = tpu.matmul %4, %2, %cst {dimension_numbers = #tpu.dot_dimension_numbers<[1], [0], [0], [1], [0, 0, 1, 1], [], []>} : vector<4x2xbf16>, vector<2x128xbf16>, vector<4x128xf32> -> vector<4x128xf32>
    %6 = arith.truncf %5 : vector<4x128xf32> to vector<4x128xbf16>
    %c0_5 = arith.constant 0 : index
    %c0_6 = arith.constant 0 : index
    %c0_7 = arith.constant 0 : index
    %7 = vector.load %arg4[%c0_5, %c0_6, %c0_7] : memref<3x128x128xbf16, #tpu.memory_space<vmem>>, vector<1x128x128xbf16>
    %8 = vector.shape_cast %7 : vector<1x128x128xbf16> to vector<128x128xbf16>
    %cst_8 = arith.constant dense<0.000000e+00> : vector<4x128xf32>
    %9 = tpu.matmul %6, %8, %cst_8 {dimension_numbers = #tpu.dot_dimension_numbers<[1], [0], [0], [1], [0, 0, 1, 1], [], []>} : vector<4x128xbf16>, vector<128x128xbf16>, vector<4x128xf32> -> vector<4x128xf32>
    %c1 = arith.constant 1 : index
    %c0_9 = arith.constant 0 : index
    %c0_10 = arith.constant 0 : index
    %10 = vector.load %arg3[%c1, %c0_9, %c0_10] : memref<3x4x2xbf16, #tpu.memory_space<vmem>>, vector<1x4x2xbf16>
    %11 = vector.shape_cast %10 : vector<1x4x2xbf16> to vector<4x2xbf16>
    %cst_11 = arith.constant dense<0.000000e+00> : vector<4x128xf32>
    %12 = tpu.matmul %11, %2, %cst_11 {dimension_numbers = #tpu.dot_dimension_numbers<[1], [0], [0], [1], [0, 0, 1, 1], [], []>} : vector<4x2xbf16>, vector<2x128xbf16>, vector<4x128xf32> -> vector<4x128xf32>
    %13 = arith.truncf %12 : vector<4x128xf32> to vector<4x128xbf16>
    %c1_12 = arith.constant 1 : index
    %c0_13 = arith.constant 0 : index
    %c0_14 = arith.constant 0 : index
    %14 = vector.load %arg4[%c1_12, %c0_13, %c0_14] : memref<3x128x128xbf16, #tpu.memory_space<vmem>>, vector<1x128x128xbf16>
    %15 = vector.shape_cast %14 : vector<1x128x128xbf16> to vector<128x128xbf16>
    %cst_15 = arith.constant dense<0.000000e+00> : vector<4x128xf32>
    %16 = tpu.matmul %13, %15, %cst_15 {dimension_numbers = #tpu.dot_dimension_numbers<[1], [0], [0], [1], [0, 0, 1, 1], [], []>} : vector<4x128xbf16>, vector<128x128xbf16>, vector<4x128xf32> -> vector<4x128xf32>
    %17 = arith.addf %9, %16 : vector<4x128xf32>
    %c2 = arith.constant 2 : index
    %c0_16 = arith.constant 0 : index
    %c0_17 = arith.constant 0 : index
    %18 = vector.load %arg3[%c2, %c0_16, %c0_17] : memref<3x4x2xbf16, #tpu.memory_space<vmem>>, vector<1x4x2xbf16>
    %19 = vector.shape_cast %18 : vector<1x4x2xbf16> to vector<4x2xbf16>
    %cst_18 = arith.constant dense<0.000000e+00> : vector<4x128xf32>
    %20 = tpu.matmul %19, %2, %cst_18 {dimension_numbers = #tpu.dot_dimension_numbers<[1], [0], [0], [1], [0, 0, 1, 1], [], []>} : vector<4x2xbf16>, vector<2x128xbf16>, vector<4x128xf32> -> vector<4x128xf32>
    %21 = arith.truncf %20 : vector<4x128xf32> to vector<4x128xbf16>
    %c2_19 = arith.constant 2 : index
    %c0_20 = arith.constant 0 : index
    %c0_21 = arith.constant 0 : index
    %22 = vector.load %arg4[%c2_19, %c0_20, %c0_21] : memref<3x128x128xbf16, #tpu.memory_space<vmem>>, vector<1x128x128xbf16>
    %23 = vector.shape_cast %22 : vector<1x128x128xbf16> to vector<128x128xbf16>
    %cst_22 = arith.constant dense<0.000000e+00> : vector<4x128xf32>
    %24 = tpu.matmul %21, %23, %cst_22 {dimension_numbers = #tpu.dot_dimension_numbers<[1], [0], [0], [1], [0, 0, 1, 1], [], []>} : vector<4x128xbf16>, vector<128x128xbf16>, vector<4x128xf32> -> vector<4x128xf32>
    %25 = arith.addf %17, %24 : vector<4x128xf32>
    %c0_23 = arith.constant 0 : index
    %c0_24 = arith.constant 0 : index
    %26 = vector.load %arg5[%c0_23, %c0_24] : memref<1x128xf32, #tpu.memory_space<vmem>>, vector<1x128xf32>
    %27 = vector.broadcast %26 : vector<1x128xf32> to vector<4x128xf32>
    %28 = arith.mulf %25, %27 : vector<4x128xf32>
    %c0_25 = arith.constant 0 : index
    %c0_26 = arith.constant 0 : index
    %29 = vector.load %arg6[%c0_25, %c0_26] : memref<1x128xf32, #tpu.memory_space<vmem>>, vector<1x128xf32>
    %30 = vector.broadcast %29 : vector<1x128xf32> to vector<4x128xf32>
    %31 = arith.addf %28, %30 : vector<4x128xf32>
    %cst_27 = arith.constant 0.000000e+00 : f32
    %32 = vector.broadcast %cst_27 : f32 to vector<4x128xf32>
    %33 = arith.maximumf %31, %32 : vector<4x128xf32>
    %34 = arith.truncf %33 : vector<4x128xf32> to vector<4x128xbf16>
    %c0_28 = arith.constant 0 : index
    %c0_29 = arith.constant 0 : index
    %c0_30 = arith.constant 0 : index
    %35 = vector.load %arg7[%c0_28, %c0_29, %c0_30] : memref<3x4x4xbf16, #tpu.memory_space<vmem>>, vector<1x4x4xbf16>
    %36 = vector.shape_cast %35 : vector<1x4x4xbf16> to vector<4x4xbf16>
    %cst_31 = arith.constant dense<0.000000e+00> : vector<4x128xf32>
    %37 = tpu.matmul %36, %34, %cst_31 {dimension_numbers = #tpu.dot_dimension_numbers<[1], [0], [0], [1], [0, 0, 1, 1], [], []>} : vector<4x4xbf16>, vector<4x128xbf16>, vector<4x128xf32> -> vector<4x128xf32>
    %38 = arith.truncf %37 : vector<4x128xf32> to vector<4x128xbf16>
    %c0_32 = arith.constant 0 : index
    %c0_33 = arith.constant 0 : index
    %c0_34 = arith.constant 0 : index
    %39 = vector.load %arg8[%c0_32, %c0_33, %c0_34] : memref<3x128x128xbf16, #tpu.memory_space<vmem>>, vector<1x128x128xbf16>
    %40 = vector.shape_cast %39 : vector<1x128x128xbf16> to vector<128x128xbf16>
    %cst_35 = arith.constant dense<0.000000e+00> : vector<4x128xf32>
    %41 = tpu.matmul %38, %40, %cst_35 {dimension_numbers = #tpu.dot_dimension_numbers<[1], [0], [0], [1], [0, 0, 1, 1], [], []>} : vector<4x128xbf16>, vector<128x128xbf16>, vector<4x128xf32> -> vector<4x128xf32>
    %c1_36 = arith.constant 1 : index
    %c0_37 = arith.constant 0 : index
    %c0_38 = arith.constant 0 : index
    %42 = vector.load %arg7[%c1_36, %c0_37, %c0_38] : memref<3x4x4xbf16, #tpu.memory_space<vmem>>, vector<1x4x4xbf16>
    %43 = vector.shape_cast %42 : vector<1x4x4xbf16> to vector<4x4xbf16>
    %cst_39 = arith.constant dense<0.000000e+00> : vector<4x128xf32>
    %44 = tpu.matmul %43, %34, %cst_39 {dimension_numbers = #tpu.dot_dimension_numbers<[1], [0], [0], [1], [0, 0, 1, 1], [], []>} : vector<4x4xbf16>, vector<4x128xbf16>, vector<4x128xf32> -> vector<4x128xf32>
    %45 = arith.truncf %44 : vector<4x128xf32> to vector<4x128xbf16>
    %c1_40 = arith.constant 1 : index
    %c0_41 = arith.constant 0 : index
    %c0_42 = arith.constant 0 : index
    %46 = vector.load %arg8[%c1_40, %c0_41, %c0_42] : memref<3x128x128xbf16, #tpu.memory_space<vmem>>, vector<1x128x128xbf16>
    %47 = vector.shape_cast %46 : vector<1x128x128xbf16> to vector<128x128xbf16>
    %cst_43 = arith.constant dense<0.000000e+00> : vector<4x128xf32>
    %48 = tpu.matmul %45, %47, %cst_43 {dimension_numbers = #tpu.dot_dimension_numbers<[1], [0], [0], [1], [0, 0, 1, 1], [], []>} : vector<4x128xbf16>, vector<128x128xbf16>, vector<4x128xf32> -> vector<4x128xf32>
    %49 = arith.addf %41, %48 : vector<4x128xf32>
    %c2_44 = arith.constant 2 : index
    %c0_45 = arith.constant 0 : index
    %c0_46 = arith.constant 0 : index
    %50 = vector.load %arg7[%c2_44, %c0_45, %c0_46] : memref<3x4x4xbf16, #tpu.memory_space<vmem>>, vector<1x4x4xbf16>
    %51 = vector.shape_cast %50 : vector<1x4x4xbf16> to vector<4x4xbf16>
    %cst_47 = arith.constant dense<0.000000e+00> : vector<4x128xf32>
    %52 = tpu.matmul %51, %34, %cst_47 {dimension_numbers = #tpu.dot_dimension_numbers<[1], [0], [0], [1], [0, 0, 1, 1], [], []>} : vector<4x4xbf16>, vector<4x128xbf16>, vector<4x128xf32> -> vector<4x128xf32>
    %53 = arith.truncf %52 : vector<4x128xf32> to vector<4x128xbf16>
    %c2_48 = arith.constant 2 : index
    %c0_49 = arith.constant 0 : index
    %c0_50 = arith.constant 0 : index
    %54 = vector.load %arg8[%c2_48, %c0_49, %c0_50] : memref<3x128x128xbf16, #tpu.memory_space<vmem>>, vector<1x128x128xbf16>
    %55 = vector.shape_cast %54 : vector<1x128x128xbf16> to vector<128x128xbf16>
    %cst_51 = arith.constant dense<0.000000e+00> : vector<4x128xf32>
    %56 = tpu.matmul %53, %55, %cst_51 {dimension_numbers = #tpu.dot_dimension_numbers<[1], [0], [0], [1], [0, 0, 1, 1], [], []>} : vector<4x128xbf16>, vector<128x128xbf16>, vector<4x128xf32> -> vector<4x128xf32>
    %57 = arith.addf %49, %56 : vector<4x128xf32>
    %c0_52 = arith.constant 0 : index
    %c0_53 = arith.constant 0 : index
    %58 = vector.load %arg9[%c0_52, %c0_53] : memref<1x128xf32, #tpu.memory_space<vmem>>, vector<1x128xf32>
    %59 = vector.broadcast %58 : vector<1x128xf32> to vector<4x128xf32>
    %60 = arith.mulf %57, %59 : vector<4x128xf32>
    %c0_54 = arith.constant 0 : index
    %c0_55 = arith.constant 0 : index
    %61 = vector.load %arg10[%c0_54, %c0_55] : memref<1x128xf32, #tpu.memory_space<vmem>>, vector<1x128xf32>
    %62 = vector.broadcast %61 : vector<1x128xf32> to vector<4x128xf32>
    %63 = arith.addf %60, %62 : vector<4x128xf32>
    %cst_56 = arith.constant 0.000000e+00 : f32
    %64 = vector.broadcast %cst_56 : f32 to vector<4x128xf32>
    %65 = arith.maximumf %63, %64 : vector<4x128xf32>
    %c0_57 = arith.constant 0 : index
    %c0_58 = arith.constant 0 : index
    %c0_59 = arith.constant 0 : index
    %66 = vector.load %arg2[%c0_57, %c0_58, %c0_59] : memref<1x4x128xf32, #tpu.memory_space<vmem>>, vector<1x4x128xf32>
    %67 = vector.shape_cast %66 : vector<1x4x128xf32> to vector<4x128xf32>
    %68 = arith.addf %65, %67 : vector<4x128xf32>
    %69 = arith.truncf %68 : vector<4x128xf32> to vector<4x128xbf16>
    %c0_60 = arith.constant 0 : index
    %c0_61 = arith.constant 0 : index
    %c0_62 = arith.constant 0 : index
    %70 = vector.load %arg11[%c0_60, %c0_61, %c0_62] : memref<3x4x4xbf16, #tpu.memory_space<vmem>>, vector<1x4x4xbf16>
    %71 = vector.shape_cast %70 : vector<1x4x4xbf16> to vector<4x4xbf16>
    %cst_63 = arith.constant dense<0.000000e+00> : vector<4x128xf32>
    %72 = tpu.matmul %71, %69, %cst_63 {dimension_numbers = #tpu.dot_dimension_numbers<[1], [0], [0], [1], [0, 0, 1, 1], [], []>} : vector<4x4xbf16>, vector<4x128xbf16>, vector<4x128xf32> -> vector<4x128xf32>
    %73 = arith.truncf %72 : vector<4x128xf32> to vector<4x128xbf16>
    %c0_64 = arith.constant 0 : index
    %c0_65 = arith.constant 0 : index
    %c0_66 = arith.constant 0 : index
    %74 = vector.load %arg12[%c0_64, %c0_65, %c0_66] : memref<3x128x128xbf16, #tpu.memory_space<vmem>>, vector<1x128x128xbf16>
    %75 = vector.shape_cast %74 : vector<1x128x128xbf16> to vector<128x128xbf16>
    %cst_67 = arith.constant dense<0.000000e+00> : vector<4x128xf32>
    %76 = tpu.matmul %73, %75, %cst_67 {dimension_numbers = #tpu.dot_dimension_numbers<[1], [0], [0], [1], [0, 0, 1, 1], [], []>} : vector<4x128xbf16>, vector<128x128xbf16>, vector<4x128xf32> -> vector<4x128xf32>
    %c1_68 = arith.constant 1 : index
    %c0_69 = arith.constant 0 : index
    %c0_70 = arith.constant 0 : index
    %77 = vector.load %arg11[%c1_68, %c0_69, %c0_70] : memref<3x4x4xbf16, #tpu.memory_space<vmem>>, vector<1x4x4xbf16>
    %78 = vector.shape_cast %77 : vector<1x4x4xbf16> to vector<4x4xbf16>
    %cst_71 = arith.constant dense<0.000000e+00> : vector<4x128xf32>
    %79 = tpu.matmul %78, %69, %cst_71 {dimension_numbers = #tpu.dot_dimension_numbers<[1], [0], [0], [1], [0, 0, 1, 1], [], []>} : vector<4x4xbf16>, vector<4x128xbf16>, vector<4x128xf32> -> vector<4x128xf32>
    %80 = arith.truncf %79 : vector<4x128xf32> to vector<4x128xbf16>
    %c1_72 = arith.constant 1 : index
    %c0_73 = arith.constant 0 : index
    %c0_74 = arith.constant 0 : index
    %81 = vector.load %arg12[%c1_72, %c0_73, %c0_74] : memref<3x128x128xbf16, #tpu.memory_space<vmem>>, vector<1x128x128xbf16>
    %82 = vector.shape_cast %81 : vector<1x128x128xbf16> to vector<128x128xbf16>
    %cst_75 = arith.constant dense<0.000000e+00> : vector<4x128xf32>
    %83 = tpu.matmul %80, %82, %cst_75 {dimension_numbers = #tpu.dot_dimension_numbers<[1], [0], [0], [1], [0, 0, 1, 1], [], []>} : vector<4x128xbf16>, vector<128x128xbf16>, vector<4x128xf32> -> vector<4x128xf32>
    %84 = arith.addf %76, %83 : vector<4x128xf32>
    %c2_76 = arith.constant 2 : index
    %c0_77 = arith.constant 0 : index
    %c0_78 = arith.constant 0 : index
    %85 = vector.load %arg11[%c2_76, %c0_77, %c0_78] : memref<3x4x4xbf16, #tpu.memory_space<vmem>>, vector<1x4x4xbf16>
    %86 = vector.shape_cast %85 : vector<1x4x4xbf16> to vector<4x4xbf16>
    %cst_79 = arith.constant dense<0.000000e+00> : vector<4x128xf32>
    %87 = tpu.matmul %86, %69, %cst_79 {dimension_numbers = #tpu.dot_dimension_numbers<[1], [0], [0], [1], [0, 0, 1, 1], [], []>} : vector<4x4xbf16>, vector<4x128xbf16>, vector<4x128xf32> -> vector<4x128xf32>
    %88 = arith.truncf %87 : vector<4x128xf32> to vector<4x128xbf16>
    %c2_80 = arith.constant 2 : index
    %c0_81 = arith.constant 0 : index
    %c0_82 = arith.constant 0 : index
    %89 = vector.load %arg12[%c2_80, %c0_81, %c0_82] : memref<3x128x128xbf16, #tpu.memory_space<vmem>>, vector<1x128x128xbf16>
    %90 = vector.shape_cast %89 : vector<1x128x128xbf16> to vector<128x128xbf16>
    %cst_83 = arith.constant dense<0.000000e+00> : vector<4x128xf32>
    %91 = tpu.matmul %88, %90, %cst_83 {dimension_numbers = #tpu.dot_dimension_numbers<[1], [0], [0], [1], [0, 0, 1, 1], [], []>} : vector<4x128xbf16>, vector<128x128xbf16>, vector<4x128xf32> -> vector<4x128xf32>
    %92 = arith.addf %84, %91 : vector<4x128xf32>
    %c0_84 = arith.constant 0 : index
    %c0_85 = arith.constant 0 : index
    %93 = vector.load %arg13[%c0_84, %c0_85] : memref<1x128xf32, #tpu.memory_space<vmem>>, vector<1x128xf32>
    %94 = vector.broadcast %93 : vector<1x128xf32> to vector<4x128xf32>
    %95 = arith.mulf %92, %94 : vector<4x128xf32>
    %c0_86 = arith.constant 0 : index
    %c0_87 = arith.constant 0 : index
    %96 = vector.load %arg14[%c0_86, %c0_87] : memref<1x128xf32, #tpu.memory_space<vmem>>, vector<1x128xf32>
    %97 = vector.broadcast %96 : vector<1x128xf32> to vector<4x128xf32>
    %98 = arith.addf %95, %97 : vector<4x128xf32>
    %c0_88 = arith.constant 0 : index
    %c0_89 = arith.constant 0 : index
    %c0_90 = arith.constant 0 : index
    %99 = vector.load %arg15[%c0_88, %c0_89, %c0_90] : memref<1x4x128xf32, #tpu.memory_space<vmem>>, vector<1x4x128xf32>
    %100 = vector.shape_cast %99 : vector<1x4x128xf32> to vector<4x128xf32>
    %101 = vector.shape_cast %98 : vector<4x128xf32> to vector<1x4x128xf32>
    tpu.vector_store %arg15[%c0_88, %c0_89, %c0_90], %101 {strides = array<i32>} : memref<1x4x128xf32, #tpu.memory_space<vmem>>, vector<1x4x128xf32>,
    return
  }
  func.func @transform_0(%arg0: i32) -> (i32, i32, i32) {
    %c0_i32 = arith.constant 0 : i32
    %c0_i32_0 = arith.constant 0 : i32
    %c0_i32_1 = arith.constant 0 : i32
    return %arg0, %c0_i32, %c0_i32_0 : i32, i32, i32
  }
  func.func @transform_1(%arg0: i32) -> (i32, i32, i32) {
    %c0_i32 = arith.constant 0 : i32
    %c0_i32_0 = arith.constant 0 : i32
    %c0_i32_1 = arith.constant 0 : i32
    return %arg0, %c0_i32, %c0_i32_0 : i32, i32, i32
  }
  func.func @transform_2(%arg0: i32) -> (i32, i32, i32) {
    %c0_i32 = arith.constant 0 : i32
    %c0_i32_0 = arith.constant 0 : i32
    %c0_i32_1 = arith.constant 0 : i32
    %c0_i32_2 = arith.constant 0 : i32
    return %c0_i32, %c0_i32_0, %c0_i32_1 : i32, i32, i32
  }
  func.func @transform_3(%arg0: i32) -> (i32, i32, i32) {
    %c0_i32 = arith.constant 0 : i32
    %c0_i32_0 = arith.constant 0 : i32
    %c0_i32_1 = arith.constant 0 : i32
    %c0_i32_2 = arith.constant 0 : i32
    return %c0_i32, %c0_i32_0, %c0_i32_1 : i32, i32, i32
  }
  func.func @transform_4(%arg0: i32) -> (i32, i32) {
    %c0_i32 = arith.constant 0 : i32
    %c0_i32_0 = arith.constant 0 : i32
    %c0_i32_1 = arith.constant 0 : i32
    return %c0_i32, %c0_i32_0 : i32, i32
  }
  func.func @transform_5(%arg0: i32) -> (i32, i32) {
    %c0_i32 = arith.constant 0 : i32
    %c0_i32_0 = arith.constant 0 : i32
    %c0_i32_1 = arith.constant 0 : i32
    return %c0_i32, %c0_i32_0 : i32, i32
  }
  func.func @transform_6(%arg0: i32) -> (i32, i32, i32) {
    %c0_i32 = arith.constant 0 : i32
    %c0_i32_0 = arith.constant 0 : i32
    %c0_i32_1 = arith.constant 0 : i32
    %c0_i32_2 = arith.constant 0 : i32
    return %c0_i32, %c0_i32_0, %c0_i32_1 : i32, i32, i32
  }
  func.func @transform_7(%arg0: i32) -> (i32, i32, i32) {
    %c0_i32 = arith.constant 0 : i32
    %c0_i32_0 = arith.constant 0 : i32
    %c0_i32_1 = arith.constant 0 : i32
    %c0_i32_2 = arith.constant 0 : i32
    return %c0_i32, %c0_i32_0, %c0_i32_1 : i32, i32, i32
  }
  func.func @transform_8(%arg0: i32) -> (i32, i32) {
    %c0_i32 = arith.constant 0 : i32
    %c0_i32_0 = arith.constant 0 : i32
    %c0_i32_1 = arith.constant 0 : i32
    return %c0_i32, %c0_i32_0 : i32, i32
  }
  func.func @transform_9(%arg0: i32) -> (i32, i32) {
    %c0_i32 = arith.constant 0 : i32
    %c0_i32_0 = arith.constant 0 : i32
    %c0_i32_1 = arith.constant 0 : i32
    return %c0_i32, %c0_i32_0 : i32, i32
  }
  func.func @transform_10(%arg0: i32) -> (i32, i32, i32) {
    %c0_i32 = arith.constant 0 : i32
    %c0_i32_0 = arith.constant 0 : i32
    %c0_i32_1 = arith.constant 0 : i32
    %c0_i32_2 = arith.constant 0 : i32
    return %c0_i32, %c0_i32_0, %c0_i32_1 : i32, i32, i32
  }
  func.func @transform_11(%arg0: i32) -> (i32, i32, i32) {
    %c0_i32 = arith.constant 0 : i32
    %c0_i32_0 = arith.constant 0 : i32
    %c0_i32_1 = arith.constant 0 : i32
    %c0_i32_2 = arith.constant 0 : i32
    return %c0_i32, %c0_i32_0, %c0_i32_1 : i32, i32, i32
  }
  func.func @transform_12(%arg0: i32) -> (i32, i32) {
    %c0_i32 = arith.constant 0 : i32
    %c0_i32_0 = arith.constant 0 : i32
    %c0_i32_1 = arith.constant 0 : i32
    return %c0_i32, %c0_i32_0 : i32, i32
  }
  func.func @transform_13(%arg0: i32) -> (i32, i32) {
    %c0_i32 = arith.constant 0 : i32
    %c0_i32_0 = arith.constant 0 : i32
    %c0_i32_1 = arith.constant 0 : i32
    return %c0_i32, %c0_i32_0 : i32, i32
  }
  func.func @transform_14(%arg0: i32) -> (i32, i32, i32) {
    %c0_i32 = arith.constant 0 : i32
    %c0_i32_0 = arith.constant 0 : i32
    %c0_i32_1 = arith.constant 0 : i32
    return %arg0, %c0_i32, %c0_i32_0 : i32, i32, i32
  }
}

module attributes {stable_mosaic.version = 11 : i64} {
  func.func @_up_add_kernel(%arg0: i32, %arg1: memref<1x4x128xf32, #tpu.memory_space<vmem>>, %arg2: memref<1x8x128xf32, #tpu.memory_space<vmem>>, %arg3: memref<3x8x4xbf16, #tpu.memory_space<vmem>>, %arg4: memref<3x128x128xbf16, #tpu.memory_space<vmem>>, %arg5: memref<1x128xf32, #tpu.memory_space<vmem>>, %arg6: memref<1x128xf32, #tpu.memory_space<vmem>>, %arg7: memref<3x8x8xbf16, #tpu.memory_space<vmem>>, %arg8: memref<3x128x128xbf16, #tpu.memory_space<vmem>>, %arg9: memref<1x128xf32, #tpu.memory_space<vmem>>, %arg10: memref<1x128xf32, #tpu.memory_space<vmem>>, %arg11: memref<3x8x8xbf16, #tpu.memory_space<vmem>>, %arg12: memref<3x128x128xbf16, #tpu.memory_space<vmem>>, %arg13: memref<1x128xf32, #tpu.memory_space<vmem>>, %arg14: memref<1x128xf32, #tpu.memory_space<vmem>>, %arg15: memref<1x8x128xf32, #tpu.memory_space<vmem>>) attributes {dimension_semantics = [#tpu.dimension_semantics<parallel>], iteration_bounds = array<i64: 2>, scalar_prefetch = 0 : i64, scratch_operands = 0 : i64, tpu.core_type = #tpu.core_type<tc>, window_params = [{transform_indices = @transform_0, window_bounds = array<i64: 1, 4, 128>}, {transform_indices = @transform_1, window_bounds = array<i64: 1, 8, 128>}, {pipeline_mode = #tpu.pipeline_mode<synchronous>, transform_indices = @transform_2, window_bounds = array<i64: 3, 8, 4>}, {pipeline_mode = #tpu.pipeline_mode<synchronous>, transform_indices = @transform_3, window_bounds = array<i64: 3, 128, 128>}, {pipeline_mode = #tpu.pipeline_mode<synchronous>, transform_indices = @transform_4, window_bounds = array<i64: 1, 128>}, {pipeline_mode = #tpu.pipeline_mode<synchronous>, transform_indices = @transform_5, window_bounds = array<i64: 1, 128>}, {pipeline_mode = #tpu.pipeline_mode<synchronous>, transform_indices = @transform_6, window_bounds = array<i64: 3, 8, 8>}, {pipeline_mode = #tpu.pipeline_mode<synchronous>, transform_indices = @transform_7, window_bounds = array<i64: 3, 128, 128>}, {pipeline_mode = #tpu.pipeline_mode<synchronous>, transform_indices = @transform_8, window_bounds = array<i64: 1, 128>}, {pipeline_mode = #tpu.pipeline_mode<synchronous>, transform_indices = @transform_9, window_bounds = array<i64: 1, 128>}, {pipeline_mode = #tpu.pipeline_mode<synchronous>, transform_indices = @transform_10, window_bounds = array<i64: 3, 8, 8>}, {pipeline_mode = #tpu.pipeline_mode<synchronous>, transform_indices = @transform_11, window_bounds = array<i64: 3, 128, 128>}, {pipeline_mode = #tpu.pipeline_mode<synchronous>, transform_indices = @transform_12, window_bounds = array<i64: 1, 128>}, {pipeline_mode = #tpu.pipeline_mode<synchronous>, transform_indices = @transform_13, window_bounds = array<i64: 1, 128>}, {transform_indices = @transform_14, window_bounds = array<i64: 1, 8, 128>}]} {
    %c0 = arith.constant 0 : index
    %c0_0 = arith.constant 0 : index
    %c0_1 = arith.constant 0 : index
    %0 = vector.load %arg1[%c0, %c0_0, %c0_1] : memref<1x4x128xf32, #tpu.memory_space<vmem>>, vector<1x4x128xf32>
    %1 = vector.shape_cast %0 : vector<1x4x128xf32> to vector<4x128xf32>
    %2 = arith.truncf %1 : vector<4x128xf32> to vector<4x128xbf16>
    %c0_2 = arith.constant 0 : index
    %c0_3 = arith.constant 0 : index
    %c0_4 = arith.constant 0 : index
    %3 = vector.load %arg3[%c0_2, %c0_3, %c0_4] : memref<3x8x4xbf16, #tpu.memory_space<vmem>>, vector<1x8x4xbf16>
    %4 = vector.shape_cast %3 : vector<1x8x4xbf16> to vector<8x4xbf16>
    %cst = arith.constant dense<0.000000e+00> : vector<8x128xf32>
    %5 = tpu.matmul %4, %2, %cst {dimension_numbers = #tpu.dot_dimension_numbers<[1], [0], [0], [1], [0, 0, 1, 1], [], []>} : vector<8x4xbf16>, vector<4x128xbf16>, vector<8x128xf32> -> vector<8x128xf32>
    %6 = arith.truncf %5 : vector<8x128xf32> to vector<8x128xbf16>
    %c0_5 = arith.constant 0 : index
    %c0_6 = arith.constant 0 : index
    %c0_7 = arith.constant 0 : index
    %7 = vector.load %arg4[%c0_5, %c0_6, %c0_7] : memref<3x128x128xbf16, #tpu.memory_space<vmem>>, vector<1x128x128xbf16>
    %8 = vector.shape_cast %7 : vector<1x128x128xbf16> to vector<128x128xbf16>
    %cst_8 = arith.constant dense<0.000000e+00> : vector<8x128xf32>
    %9 = tpu.matmul %6, %8, %cst_8 {dimension_numbers = #tpu.dot_dimension_numbers<[1], [0], [0], [1], [0, 0, 1, 1], [], []>} : vector<8x128xbf16>, vector<128x128xbf16>, vector<8x128xf32> -> vector<8x128xf32>
    %c1 = arith.constant 1 : index
    %c0_9 = arith.constant 0 : index
    %c0_10 = arith.constant 0 : index
    %10 = vector.load %arg3[%c1, %c0_9, %c0_10] : memref<3x8x4xbf16, #tpu.memory_space<vmem>>, vector<1x8x4xbf16>
    %11 = vector.shape_cast %10 : vector<1x8x4xbf16> to vector<8x4xbf16>
    %cst_11 = arith.constant dense<0.000000e+00> : vector<8x128xf32>
    %12 = tpu.matmul %11, %2, %cst_11 {dimension_numbers = #tpu.dot_dimension_numbers<[1], [0], [0], [1], [0, 0, 1, 1], [], []>} : vector<8x4xbf16>, vector<4x128xbf16>, vector<8x128xf32> -> vector<8x128xf32>
    %13 = arith.truncf %12 : vector<8x128xf32> to vector<8x128xbf16>
    %c1_12 = arith.constant 1 : index
    %c0_13 = arith.constant 0 : index
    %c0_14 = arith.constant 0 : index
    %14 = vector.load %arg4[%c1_12, %c0_13, %c0_14] : memref<3x128x128xbf16, #tpu.memory_space<vmem>>, vector<1x128x128xbf16>
    %15 = vector.shape_cast %14 : vector<1x128x128xbf16> to vector<128x128xbf16>
    %cst_15 = arith.constant dense<0.000000e+00> : vector<8x128xf32>
    %16 = tpu.matmul %13, %15, %cst_15 {dimension_numbers = #tpu.dot_dimension_numbers<[1], [0], [0], [1], [0, 0, 1, 1], [], []>} : vector<8x128xbf16>, vector<128x128xbf16>, vector<8x128xf32> -> vector<8x128xf32>
    %17 = arith.addf %9, %16 : vector<8x128xf32>
    %c2 = arith.constant 2 : index
    %c0_16 = arith.constant 0 : index
    %c0_17 = arith.constant 0 : index
    %18 = vector.load %arg3[%c2, %c0_16, %c0_17] : memref<3x8x4xbf16, #tpu.memory_space<vmem>>, vector<1x8x4xbf16>
    %19 = vector.shape_cast %18 : vector<1x8x4xbf16> to vector<8x4xbf16>
    %cst_18 = arith.constant dense<0.000000e+00> : vector<8x128xf32>
    %20 = tpu.matmul %19, %2, %cst_18 {dimension_numbers = #tpu.dot_dimension_numbers<[1], [0], [0], [1], [0, 0, 1, 1], [], []>} : vector<8x4xbf16>, vector<4x128xbf16>, vector<8x128xf32> -> vector<8x128xf32>
    %21 = arith.truncf %20 : vector<8x128xf32> to vector<8x128xbf16>
    %c2_19 = arith.constant 2 : index
    %c0_20 = arith.constant 0 : index
    %c0_21 = arith.constant 0 : index
    %22 = vector.load %arg4[%c2_19, %c0_20, %c0_21] : memref<3x128x128xbf16, #tpu.memory_space<vmem>>, vector<1x128x128xbf16>
    %23 = vector.shape_cast %22 : vector<1x128x128xbf16> to vector<128x128xbf16>
    %cst_22 = arith.constant dense<0.000000e+00> : vector<8x128xf32>
    %24 = tpu.matmul %21, %23, %cst_22 {dimension_numbers = #tpu.dot_dimension_numbers<[1], [0], [0], [1], [0, 0, 1, 1], [], []>} : vector<8x128xbf16>, vector<128x128xbf16>, vector<8x128xf32> -> vector<8x128xf32>
    %25 = arith.addf %17, %24 : vector<8x128xf32>
    %c0_23 = arith.constant 0 : index
    %c0_24 = arith.constant 0 : index
    %26 = vector.load %arg5[%c0_23, %c0_24] : memref<1x128xf32, #tpu.memory_space<vmem>>, vector<1x128xf32>
    %27 = vector.broadcast %26 : vector<1x128xf32> to vector<8x128xf32>
    %28 = arith.mulf %25, %27 : vector<8x128xf32>
    %c0_25 = arith.constant 0 : index
    %c0_26 = arith.constant 0 : index
    %29 = vector.load %arg6[%c0_25, %c0_26] : memref<1x128xf32, #tpu.memory_space<vmem>>, vector<1x128xf32>
    %30 = vector.broadcast %29 : vector<1x128xf32> to vector<8x128xf32>
    %31 = arith.addf %28, %30 : vector<8x128xf32>
    %cst_27 = arith.constant 0.000000e+00 : f32
    %32 = vector.broadcast %cst_27 : f32 to vector<8x128xf32>
    %33 = arith.maximumf %31, %32 : vector<8x128xf32>
    %34 = arith.truncf %33 : vector<8x128xf32> to vector<8x128xbf16>
    %c0_28 = arith.constant 0 : index
    %c0_29 = arith.constant 0 : index
    %c0_30 = arith.constant 0 : index
    %35 = vector.load %arg7[%c0_28, %c0_29, %c0_30] : memref<3x8x8xbf16, #tpu.memory_space<vmem>>, vector<1x8x8xbf16>
    %36 = vector.shape_cast %35 : vector<1x8x8xbf16> to vector<8x8xbf16>
    %cst_31 = arith.constant dense<0.000000e+00> : vector<8x128xf32>
    %37 = tpu.matmul %36, %34, %cst_31 {dimension_numbers = #tpu.dot_dimension_numbers<[1], [0], [0], [1], [0, 0, 1, 1], [], []>} : vector<8x8xbf16>, vector<8x128xbf16>, vector<8x128xf32> -> vector<8x128xf32>
    %38 = arith.truncf %37 : vector<8x128xf32> to vector<8x128xbf16>
    %c0_32 = arith.constant 0 : index
    %c0_33 = arith.constant 0 : index
    %c0_34 = arith.constant 0 : index
    %39 = vector.load %arg8[%c0_32, %c0_33, %c0_34] : memref<3x128x128xbf16, #tpu.memory_space<vmem>>, vector<1x128x128xbf16>
    %40 = vector.shape_cast %39 : vector<1x128x128xbf16> to vector<128x128xbf16>
    %cst_35 = arith.constant dense<0.000000e+00> : vector<8x128xf32>
    %41 = tpu.matmul %38, %40, %cst_35 {dimension_numbers = #tpu.dot_dimension_numbers<[1], [0], [0], [1], [0, 0, 1, 1], [], []>} : vector<8x128xbf16>, vector<128x128xbf16>, vector<8x128xf32> -> vector<8x128xf32>
    %c1_36 = arith.constant 1 : index
    %c0_37 = arith.constant 0 : index
    %c0_38 = arith.constant 0 : index
    %42 = vector.load %arg7[%c1_36, %c0_37, %c0_38] : memref<3x8x8xbf16, #tpu.memory_space<vmem>>, vector<1x8x8xbf16>
    %43 = vector.shape_cast %42 : vector<1x8x8xbf16> to vector<8x8xbf16>
    %cst_39 = arith.constant dense<0.000000e+00> : vector<8x128xf32>
    %44 = tpu.matmul %43, %34, %cst_39 {dimension_numbers = #tpu.dot_dimension_numbers<[1], [0], [0], [1], [0, 0, 1, 1], [], []>} : vector<8x8xbf16>, vector<8x128xbf16>, vector<8x128xf32> -> vector<8x128xf32>
    %45 = arith.truncf %44 : vector<8x128xf32> to vector<8x128xbf16>
    %c1_40 = arith.constant 1 : index
    %c0_41 = arith.constant 0 : index
    %c0_42 = arith.constant 0 : index
    %46 = vector.load %arg8[%c1_40, %c0_41, %c0_42] : memref<3x128x128xbf16, #tpu.memory_space<vmem>>, vector<1x128x128xbf16>
    %47 = vector.shape_cast %46 : vector<1x128x128xbf16> to vector<128x128xbf16>
    %cst_43 = arith.constant dense<0.000000e+00> : vector<8x128xf32>
    %48 = tpu.matmul %45, %47, %cst_43 {dimension_numbers = #tpu.dot_dimension_numbers<[1], [0], [0], [1], [0, 0, 1, 1], [], []>} : vector<8x128xbf16>, vector<128x128xbf16>, vector<8x128xf32> -> vector<8x128xf32>
    %49 = arith.addf %41, %48 : vector<8x128xf32>
    %c2_44 = arith.constant 2 : index
    %c0_45 = arith.constant 0 : index
    %c0_46 = arith.constant 0 : index
    %50 = vector.load %arg7[%c2_44, %c0_45, %c0_46] : memref<3x8x8xbf16, #tpu.memory_space<vmem>>, vector<1x8x8xbf16>
    %51 = vector.shape_cast %50 : vector<1x8x8xbf16> to vector<8x8xbf16>
    %cst_47 = arith.constant dense<0.000000e+00> : vector<8x128xf32>
    %52 = tpu.matmul %51, %34, %cst_47 {dimension_numbers = #tpu.dot_dimension_numbers<[1], [0], [0], [1], [0, 0, 1, 1], [], []>} : vector<8x8xbf16>, vector<8x128xbf16>, vector<8x128xf32> -> vector<8x128xf32>
    %53 = arith.truncf %52 : vector<8x128xf32> to vector<8x128xbf16>
    %c2_48 = arith.constant 2 : index
    %c0_49 = arith.constant 0 : index
    %c0_50 = arith.constant 0 : index
    %54 = vector.load %arg8[%c2_48, %c0_49, %c0_50] : memref<3x128x128xbf16, #tpu.memory_space<vmem>>, vector<1x128x128xbf16>
    %55 = vector.shape_cast %54 : vector<1x128x128xbf16> to vector<128x128xbf16>
    %cst_51 = arith.constant dense<0.000000e+00> : vector<8x128xf32>
    %56 = tpu.matmul %53, %55, %cst_51 {dimension_numbers = #tpu.dot_dimension_numbers<[1], [0], [0], [1], [0, 0, 1, 1], [], []>} : vector<8x128xbf16>, vector<128x128xbf16>, vector<8x128xf32> -> vector<8x128xf32>
    %57 = arith.addf %49, %56 : vector<8x128xf32>
    %c0_52 = arith.constant 0 : index
    %c0_53 = arith.constant 0 : index
    %58 = vector.load %arg9[%c0_52, %c0_53] : memref<1x128xf32, #tpu.memory_space<vmem>>, vector<1x128xf32>
    %59 = vector.broadcast %58 : vector<1x128xf32> to vector<8x128xf32>
    %60 = arith.mulf %57, %59 : vector<8x128xf32>
    %c0_54 = arith.constant 0 : index
    %c0_55 = arith.constant 0 : index
    %61 = vector.load %arg10[%c0_54, %c0_55] : memref<1x128xf32, #tpu.memory_space<vmem>>, vector<1x128xf32>
    %62 = vector.broadcast %61 : vector<1x128xf32> to vector<8x128xf32>
    %63 = arith.addf %60, %62 : vector<8x128xf32>
    %cst_56 = arith.constant 0.000000e+00 : f32
    %64 = vector.broadcast %cst_56 : f32 to vector<8x128xf32>
    %65 = arith.maximumf %63, %64 : vector<8x128xf32>
    %c0_57 = arith.constant 0 : index
    %c0_58 = arith.constant 0 : index
    %c0_59 = arith.constant 0 : index
    %66 = vector.load %arg2[%c0_57, %c0_58, %c0_59] : memref<1x8x128xf32, #tpu.memory_space<vmem>>, vector<1x8x128xf32>
    %67 = vector.shape_cast %66 : vector<1x8x128xf32> to vector<8x128xf32>
    %68 = arith.addf %65, %67 : vector<8x128xf32>
    %69 = arith.truncf %68 : vector<8x128xf32> to vector<8x128xbf16>
    %c0_60 = arith.constant 0 : index
    %c0_61 = arith.constant 0 : index
    %c0_62 = arith.constant 0 : index
    %70 = vector.load %arg11[%c0_60, %c0_61, %c0_62] : memref<3x8x8xbf16, #tpu.memory_space<vmem>>, vector<1x8x8xbf16>
    %71 = vector.shape_cast %70 : vector<1x8x8xbf16> to vector<8x8xbf16>
    %cst_63 = arith.constant dense<0.000000e+00> : vector<8x128xf32>
    %72 = tpu.matmul %71, %69, %cst_63 {dimension_numbers = #tpu.dot_dimension_numbers<[1], [0], [0], [1], [0, 0, 1, 1], [], []>} : vector<8x8xbf16>, vector<8x128xbf16>, vector<8x128xf32> -> vector<8x128xf32>
    %73 = arith.truncf %72 : vector<8x128xf32> to vector<8x128xbf16>
    %c0_64 = arith.constant 0 : index
    %c0_65 = arith.constant 0 : index
    %c0_66 = arith.constant 0 : index
    %74 = vector.load %arg12[%c0_64, %c0_65, %c0_66] : memref<3x128x128xbf16, #tpu.memory_space<vmem>>, vector<1x128x128xbf16>
    %75 = vector.shape_cast %74 : vector<1x128x128xbf16> to vector<128x128xbf16>
    %cst_67 = arith.constant dense<0.000000e+00> : vector<8x128xf32>
    %76 = tpu.matmul %73, %75, %cst_67 {dimension_numbers = #tpu.dot_dimension_numbers<[1], [0], [0], [1], [0, 0, 1, 1], [], []>} : vector<8x128xbf16>, vector<128x128xbf16>, vector<8x128xf32> -> vector<8x128xf32>
    %c1_68 = arith.constant 1 : index
    %c0_69 = arith.constant 0 : index
    %c0_70 = arith.constant 0 : index
    %77 = vector.load %arg11[%c1_68, %c0_69, %c0_70] : memref<3x8x8xbf16, #tpu.memory_space<vmem>>, vector<1x8x8xbf16>
    %78 = vector.shape_cast %77 : vector<1x8x8xbf16> to vector<8x8xbf16>
    %cst_71 = arith.constant dense<0.000000e+00> : vector<8x128xf32>
    %79 = tpu.matmul %78, %69, %cst_71 {dimension_numbers = #tpu.dot_dimension_numbers<[1], [0], [0], [1], [0, 0, 1, 1], [], []>} : vector<8x8xbf16>, vector<8x128xbf16>, vector<8x128xf32> -> vector<8x128xf32>
    %80 = arith.truncf %79 : vector<8x128xf32> to vector<8x128xbf16>
    %c1_72 = arith.constant 1 : index
    %c0_73 = arith.constant 0 : index
    %c0_74 = arith.constant 0 : index
    %81 = vector.load %arg12[%c1_72, %c0_73, %c0_74] : memref<3x128x128xbf16, #tpu.memory_space<vmem>>, vector<1x128x128xbf16>
    %82 = vector.shape_cast %81 : vector<1x128x128xbf16> to vector<128x128xbf16>
    %cst_75 = arith.constant dense<0.000000e+00> : vector<8x128xf32>
    %83 = tpu.matmul %80, %82, %cst_75 {dimension_numbers = #tpu.dot_dimension_numbers<[1], [0], [0], [1], [0, 0, 1, 1], [], []>} : vector<8x128xbf16>, vector<128x128xbf16>, vector<8x128xf32> -> vector<8x128xf32>
    %84 = arith.addf %76, %83 : vector<8x128xf32>
    %c2_76 = arith.constant 2 : index
    %c0_77 = arith.constant 0 : index
    %c0_78 = arith.constant 0 : index
    %85 = vector.load %arg11[%c2_76, %c0_77, %c0_78] : memref<3x8x8xbf16, #tpu.memory_space<vmem>>, vector<1x8x8xbf16>
    %86 = vector.shape_cast %85 : vector<1x8x8xbf16> to vector<8x8xbf16>
    %cst_79 = arith.constant dense<0.000000e+00> : vector<8x128xf32>
    %87 = tpu.matmul %86, %69, %cst_79 {dimension_numbers = #tpu.dot_dimension_numbers<[1], [0], [0], [1], [0, 0, 1, 1], [], []>} : vector<8x8xbf16>, vector<8x128xbf16>, vector<8x128xf32> -> vector<8x128xf32>
    %88 = arith.truncf %87 : vector<8x128xf32> to vector<8x128xbf16>
    %c2_80 = arith.constant 2 : index
    %c0_81 = arith.constant 0 : index
    %c0_82 = arith.constant 0 : index
    %89 = vector.load %arg12[%c2_80, %c0_81, %c0_82] : memref<3x128x128xbf16, #tpu.memory_space<vmem>>, vector<1x128x128xbf16>
    %90 = vector.shape_cast %89 : vector<1x128x128xbf16> to vector<128x128xbf16>
    %cst_83 = arith.constant dense<0.000000e+00> : vector<8x128xf32>
    %91 = tpu.matmul %88, %90, %cst_83 {dimension_numbers = #tpu.dot_dimension_numbers<[1], [0], [0], [1], [0, 0, 1, 1], [], []>} : vector<8x128xbf16>, vector<128x128xbf16>, vector<8x128xf32> -> vector<8x128xf32>
    %92 = arith.addf %84, %91 : vector<8x128xf32>
    %c0_84 = arith.constant 0 : index
    %c0_85 = arith.constant 0 : index
    %93 = vector.load %arg13[%c0_84, %c0_85] : memref<1x128xf32, #tpu.memory_space<vmem>>, vector<1x128xf32>
    %94 = vector.broadcast %93 : vector<1x128xf32> to vector<8x128xf32>
    %95 = arith.mulf %92, %94 : vector<8x128xf32>
    %c0_86 = arith.constant 0 : index
    %c0_87 = arith.constant 0 : index
    %96 = vector.load %arg14[%c0_86, %c0_87] : memref<1x128xf32, #tpu.memory_space<vmem>>, vector<1x128xf32>
    %97 = vector.broadcast %96 : vector<1x128xf32> to vector<8x128xf32>
    %98 = arith.addf %95, %97 : vector<8x128xf32>
    %c0_88 = arith.constant 0 : index
    %c0_89 = arith.constant 0 : index
    %c0_90 = arith.constant 0 : index
    %99 = vector.load %arg15[%c0_88, %c0_89, %c0_90] : memref<1x8x128xf32, #tpu.memory_space<vmem>>, vector<1x8x128xf32>
    %100 = vector.shape_cast %99 : vector<1x8x128xf32> to vector<8x128xf32>
    %101 = vector.shape_cast %98 : vector<8x128xf32> to vector<1x8x128xf32>
    tpu.vector_store %arg15[%c0_88, %c0_89, %c0_90], %101 {strides = array<i32>} : memref<1x8x128xf32, #tpu.memory_space<vmem>>, vector<1x8x128xf32>,
    return
  }
  func.func @transform_0(%arg0: i32) -> (i32, i32, i32) {
    %c0_i32 = arith.constant 0 : i32
    %c0_i32_0 = arith.constant 0 : i32
    %c0_i32_1 = arith.constant 0 : i32
    return %arg0, %c0_i32, %c0_i32_0 : i32, i32, i32
  }
  func.func @transform_1(%arg0: i32) -> (i32, i32, i32) {
    %c0_i32 = arith.constant 0 : i32
    %c0_i32_0 = arith.constant 0 : i32
    %c0_i32_1 = arith.constant 0 : i32
    return %arg0, %c0_i32, %c0_i32_0 : i32, i32, i32
  }
  func.func @transform_2(%arg0: i32) -> (i32, i32, i32) {
    %c0_i32 = arith.constant 0 : i32
    %c0_i32_0 = arith.constant 0 : i32
    %c0_i32_1 = arith.constant 0 : i32
    %c0_i32_2 = arith.constant 0 : i32
    return %c0_i32, %c0_i32_0, %c0_i32_1 : i32, i32, i32
  }
  func.func @transform_3(%arg0: i32) -> (i32, i32, i32) {
    %c0_i32 = arith.constant 0 : i32
    %c0_i32_0 = arith.constant 0 : i32
    %c0_i32_1 = arith.constant 0 : i32
    %c0_i32_2 = arith.constant 0 : i32
    return %c0_i32, %c0_i32_0, %c0_i32_1 : i32, i32, i32
  }
  func.func @transform_4(%arg0: i32) -> (i32, i32) {
    %c0_i32 = arith.constant 0 : i32
    %c0_i32_0 = arith.constant 0 : i32
    %c0_i32_1 = arith.constant 0 : i32
    return %c0_i32, %c0_i32_0 : i32, i32
  }
  func.func @transform_5(%arg0: i32) -> (i32, i32) {
    %c0_i32 = arith.constant 0 : i32
    %c0_i32_0 = arith.constant 0 : i32
    %c0_i32_1 = arith.constant 0 : i32
    return %c0_i32, %c0_i32_0 : i32, i32
  }
  func.func @transform_6(%arg0: i32) -> (i32, i32, i32) {
    %c0_i32 = arith.constant 0 : i32
    %c0_i32_0 = arith.constant 0 : i32
    %c0_i32_1 = arith.constant 0 : i32
    %c0_i32_2 = arith.constant 0 : i32
    return %c0_i32, %c0_i32_0, %c0_i32_1 : i32, i32, i32
  }
  func.func @transform_7(%arg0: i32) -> (i32, i32, i32) {
    %c0_i32 = arith.constant 0 : i32
    %c0_i32_0 = arith.constant 0 : i32
    %c0_i32_1 = arith.constant 0 : i32
    %c0_i32_2 = arith.constant 0 : i32
    return %c0_i32, %c0_i32_0, %c0_i32_1 : i32, i32, i32
  }
  func.func @transform_8(%arg0: i32) -> (i32, i32) {
    %c0_i32 = arith.constant 0 : i32
    %c0_i32_0 = arith.constant 0 : i32
    %c0_i32_1 = arith.constant 0 : i32
    return %c0_i32, %c0_i32_0 : i32, i32
  }
  func.func @transform_9(%arg0: i32) -> (i32, i32) {
    %c0_i32 = arith.constant 0 : i32
    %c0_i32_0 = arith.constant 0 : i32
    %c0_i32_1 = arith.constant 0 : i32
    return %c0_i32, %c0_i32_0 : i32, i32
  }
  func.func @transform_10(%arg0: i32) -> (i32, i32, i32) {
    %c0_i32 = arith.constant 0 : i32
    %c0_i32_0 = arith.constant 0 : i32
    %c0_i32_1 = arith.constant 0 : i32
    %c0_i32_2 = arith.constant 0 : i32
    return %c0_i32, %c0_i32_0, %c0_i32_1 : i32, i32, i32
  }
  func.func @transform_11(%arg0: i32) -> (i32, i32, i32) {
    %c0_i32 = arith.constant 0 : i32
    %c0_i32_0 = arith.constant 0 : i32
    %c0_i32_1 = arith.constant 0 : i32
    %c0_i32_2 = arith.constant 0 : i32
    return %c0_i32, %c0_i32_0, %c0_i32_1 : i32, i32, i32
  }
  func.func @transform_12(%arg0: i32) -> (i32, i32) {
    %c0_i32 = arith.constant 0 : i32
    %c0_i32_0 = arith.constant 0 : i32
    %c0_i32_1 = arith.constant 0 : i32
    return %c0_i32, %c0_i32_0 : i32, i32
  }
  func.func @transform_13(%arg0: i32) -> (i32, i32) {
    %c0_i32 = arith.constant 0 : i32
    %c0_i32_0 = arith.constant 0 : i32
    %c0_i32_1 = arith.constant 0 : i32
    return %c0_i32, %c0_i32_0 : i32, i32
  }
  func.func @transform_14(%arg0: i32) -> (i32, i32, i32) {
    %c0_i32 = arith.constant 0 : i32
    %c0_i32_0 = arith.constant 0 : i32
    %c0_i32_1 = arith.constant 0 : i32
    return %arg0, %c0_i32, %c0_i32_0 : i32, i32, i32
  }
}

module attributes {stable_mosaic.version = 11 : i64} {
  func.func @_up_final_kernel(%arg0: i32, %arg1: memref<1x8x128xf32, #tpu.memory_space<vmem>>, %arg2: memref<3x16x8xbf16, #tpu.memory_space<vmem>>, %arg3: memref<3x128x128xbf16, #tpu.memory_space<vmem>>, %arg4: memref<1x128xf32, #tpu.memory_space<vmem>>, %arg5: memref<1x128xf32, #tpu.memory_space<vmem>>, %arg6: memref<3x16x16xbf16, #tpu.memory_space<vmem>>, %arg7: memref<3x128x128xbf16, #tpu.memory_space<vmem>>, %arg8: memref<1x128xf32, #tpu.memory_space<vmem>>, %arg9: memref<1x128xf32, #tpu.memory_space<vmem>>, %arg10: memref<128x16xbf16, #tpu.memory_space<vmem>>, %arg11: memref<1x16xf32, #tpu.memory_space<vmem>>, %arg12: memref<1x16x16xf32, #tpu.memory_space<vmem>>) attributes {dimension_semantics = [#tpu.dimension_semantics<parallel>], iteration_bounds = array<i64: 2>, scalar_prefetch = 0 : i64, scratch_operands = 0 : i64, tpu.core_type = #tpu.core_type<tc>, window_params = [{transform_indices = @transform_0, window_bounds = array<i64: 1, 8, 128>}, {pipeline_mode = #tpu.pipeline_mode<synchronous>, transform_indices = @transform_1, window_bounds = array<i64: 3, 16, 8>}, {pipeline_mode = #tpu.pipeline_mode<synchronous>, transform_indices = @transform_2, window_bounds = array<i64: 3, 128, 128>}, {pipeline_mode = #tpu.pipeline_mode<synchronous>, transform_indices = @transform_3, window_bounds = array<i64: 1, 128>}, {pipeline_mode = #tpu.pipeline_mode<synchronous>, transform_indices = @transform_4, window_bounds = array<i64: 1, 128>}, {pipeline_mode = #tpu.pipeline_mode<synchronous>, transform_indices = @transform_5, window_bounds = array<i64: 3, 16, 16>}, {pipeline_mode = #tpu.pipeline_mode<synchronous>, transform_indices = @transform_6, window_bounds = array<i64: 3, 128, 128>}, {pipeline_mode = #tpu.pipeline_mode<synchronous>, transform_indices = @transform_7, window_bounds = array<i64: 1, 128>}, {pipeline_mode = #tpu.pipeline_mode<synchronous>, transform_indices = @transform_8, window_bounds = array<i64: 1, 128>}, {pipeline_mode = #tpu.pipeline_mode<synchronous>, transform_indices = @transform_9, window_bounds = array<i64: 128, 16>}, {pipeline_mode = #tpu.pipeline_mode<synchronous>, transform_indices = @transform_10, window_bounds = array<i64: 1, 16>}, {transform_indices = @transform_11, window_bounds = array<i64: 1, 16, 16>}]} {
    %c0 = arith.constant 0 : index
    %c0_0 = arith.constant 0 : index
    %c0_1 = arith.constant 0 : index
    %0 = vector.load %arg1[%c0, %c0_0, %c0_1] : memref<1x8x128xf32, #tpu.memory_space<vmem>>, vector<1x8x128xf32>
    %1 = vector.shape_cast %0 : vector<1x8x128xf32> to vector<8x128xf32>
    %2 = arith.truncf %1 : vector<8x128xf32> to vector<8x128xbf16>
    %c0_2 = arith.constant 0 : index
    %c0_3 = arith.constant 0 : index
    %c0_4 = arith.constant 0 : index
    %3 = vector.load %arg2[%c0_2, %c0_3, %c0_4] : memref<3x16x8xbf16, #tpu.memory_space<vmem>>, vector<1x16x8xbf16>
    %4 = vector.shape_cast %3 : vector<1x16x8xbf16> to vector<16x8xbf16>
    %cst = arith.constant dense<0.000000e+00> : vector<16x128xf32>
    %5 = tpu.matmul %4, %2, %cst {dimension_numbers = #tpu.dot_dimension_numbers<[1], [0], [0], [1], [0, 0, 1, 1], [], []>} : vector<16x8xbf16>, vector<8x128xbf16>, vector<16x128xf32> -> vector<16x128xf32>
    %6 = arith.truncf %5 : vector<16x128xf32> to vector<16x128xbf16>
    %c0_5 = arith.constant 0 : index
    %c0_6 = arith.constant 0 : index
    %c0_7 = arith.constant 0 : index
    %7 = vector.load %arg3[%c0_5, %c0_6, %c0_7] : memref<3x128x128xbf16, #tpu.memory_space<vmem>>, vector<1x128x128xbf16>
    %8 = vector.shape_cast %7 : vector<1x128x128xbf16> to vector<128x128xbf16>
    %cst_8 = arith.constant dense<0.000000e+00> : vector<16x128xf32>
    %9 = tpu.matmul %6, %8, %cst_8 {dimension_numbers = #tpu.dot_dimension_numbers<[1], [0], [0], [1], [0, 0, 1, 1], [], []>} : vector<16x128xbf16>, vector<128x128xbf16>, vector<16x128xf32> -> vector<16x128xf32>
    %c1 = arith.constant 1 : index
    %c0_9 = arith.constant 0 : index
    %c0_10 = arith.constant 0 : index
    %10 = vector.load %arg2[%c1, %c0_9, %c0_10] : memref<3x16x8xbf16, #tpu.memory_space<vmem>>, vector<1x16x8xbf16>
    %11 = vector.shape_cast %10 : vector<1x16x8xbf16> to vector<16x8xbf16>
    %cst_11 = arith.constant dense<0.000000e+00> : vector<16x128xf32>
    %12 = tpu.matmul %11, %2, %cst_11 {dimension_numbers = #tpu.dot_dimension_numbers<[1], [0], [0], [1], [0, 0, 1, 1], [], []>} : vector<16x8xbf16>, vector<8x128xbf16>, vector<16x128xf32> -> vector<16x128xf32>
    %13 = arith.truncf %12 : vector<16x128xf32> to vector<16x128xbf16>
    %c1_12 = arith.constant 1 : index
    %c0_13 = arith.constant 0 : index
    %c0_14 = arith.constant 0 : index
    %14 = vector.load %arg3[%c1_12, %c0_13, %c0_14] : memref<3x128x128xbf16, #tpu.memory_space<vmem>>, vector<1x128x128xbf16>
    %15 = vector.shape_cast %14 : vector<1x128x128xbf16> to vector<128x128xbf16>
    %cst_15 = arith.constant dense<0.000000e+00> : vector<16x128xf32>
    %16 = tpu.matmul %13, %15, %cst_15 {dimension_numbers = #tpu.dot_dimension_numbers<[1], [0], [0], [1], [0, 0, 1, 1], [], []>} : vector<16x128xbf16>, vector<128x128xbf16>, vector<16x128xf32> -> vector<16x128xf32>
    %17 = arith.addf %9, %16 : vector<16x128xf32>
    %c2 = arith.constant 2 : index
    %c0_16 = arith.constant 0 : index
    %c0_17 = arith.constant 0 : index
    %18 = vector.load %arg2[%c2, %c0_16, %c0_17] : memref<3x16x8xbf16, #tpu.memory_space<vmem>>, vector<1x16x8xbf16>
    %19 = vector.shape_cast %18 : vector<1x16x8xbf16> to vector<16x8xbf16>
    %cst_18 = arith.constant dense<0.000000e+00> : vector<16x128xf32>
    %20 = tpu.matmul %19, %2, %cst_18 {dimension_numbers = #tpu.dot_dimension_numbers<[1], [0], [0], [1], [0, 0, 1, 1], [], []>} : vector<16x8xbf16>, vector<8x128xbf16>, vector<16x128xf32> -> vector<16x128xf32>
    %21 = arith.truncf %20 : vector<16x128xf32> to vector<16x128xbf16>
    %c2_19 = arith.constant 2 : index
    %c0_20 = arith.constant 0 : index
    %c0_21 = arith.constant 0 : index
    %22 = vector.load %arg3[%c2_19, %c0_20, %c0_21] : memref<3x128x128xbf16, #tpu.memory_space<vmem>>, vector<1x128x128xbf16>
    %23 = vector.shape_cast %22 : vector<1x128x128xbf16> to vector<128x128xbf16>
    %cst_22 = arith.constant dense<0.000000e+00> : vector<16x128xf32>
    %24 = tpu.matmul %21, %23, %cst_22 {dimension_numbers = #tpu.dot_dimension_numbers<[1], [0], [0], [1], [0, 0, 1, 1], [], []>} : vector<16x128xbf16>, vector<128x128xbf16>, vector<16x128xf32> -> vector<16x128xf32>
    %25 = arith.addf %17, %24 : vector<16x128xf32>
    %c0_23 = arith.constant 0 : index
    %c0_24 = arith.constant 0 : index
    %26 = vector.load %arg4[%c0_23, %c0_24] : memref<1x128xf32, #tpu.memory_space<vmem>>, vector<1x128xf32>
    %27 = vector.broadcast %26 : vector<1x128xf32> to vector<16x128xf32>
    %28 = arith.mulf %25, %27 : vector<16x128xf32>
    %c0_25 = arith.constant 0 : index
    %c0_26 = arith.constant 0 : index
    %29 = vector.load %arg5[%c0_25, %c0_26] : memref<1x128xf32, #tpu.memory_space<vmem>>, vector<1x128xf32>
    %30 = vector.broadcast %29 : vector<1x128xf32> to vector<16x128xf32>
    %31 = arith.addf %28, %30 : vector<16x128xf32>
    %cst_27 = arith.constant 0.000000e+00 : f32
    %32 = vector.broadcast %cst_27 : f32 to vector<16x128xf32>
    %33 = arith.maximumf %31, %32 : vector<16x128xf32>
    %34 = arith.truncf %33 : vector<16x128xf32> to vector<16x128xbf16>
    %c0_28 = arith.constant 0 : index
    %c0_29 = arith.constant 0 : index
    %c0_30 = arith.constant 0 : index
    %35 = vector.load %arg6[%c0_28, %c0_29, %c0_30] : memref<3x16x16xbf16, #tpu.memory_space<vmem>>, vector<1x16x16xbf16>
    %36 = vector.shape_cast %35 : vector<1x16x16xbf16> to vector<16x16xbf16>
    %cst_31 = arith.constant dense<0.000000e+00> : vector<16x128xf32>
    %37 = tpu.matmul %36, %34, %cst_31 {dimension_numbers = #tpu.dot_dimension_numbers<[1], [0], [0], [1], [0, 0, 1, 1], [], []>} : vector<16x16xbf16>, vector<16x128xbf16>, vector<16x128xf32> -> vector<16x128xf32>
    %38 = arith.truncf %37 : vector<16x128xf32> to vector<16x128xbf16>
    %c0_32 = arith.constant 0 : index
    %c0_33 = arith.constant 0 : index
    %c0_34 = arith.constant 0 : index
    %39 = vector.load %arg7[%c0_32, %c0_33, %c0_34] : memref<3x128x128xbf16, #tpu.memory_space<vmem>>, vector<1x128x128xbf16>
    %40 = vector.shape_cast %39 : vector<1x128x128xbf16> to vector<128x128xbf16>
    %cst_35 = arith.constant dense<0.000000e+00> : vector<16x128xf32>
    %41 = tpu.matmul %38, %40, %cst_35 {dimension_numbers = #tpu.dot_dimension_numbers<[1], [0], [0], [1], [0, 0, 1, 1], [], []>} : vector<16x128xbf16>, vector<128x128xbf16>, vector<16x128xf32> -> vector<16x128xf32>
    %c1_36 = arith.constant 1 : index
    %c0_37 = arith.constant 0 : index
    %c0_38 = arith.constant 0 : index
    %42 = vector.load %arg6[%c1_36, %c0_37, %c0_38] : memref<3x16x16xbf16, #tpu.memory_space<vmem>>, vector<1x16x16xbf16>
    %43 = vector.shape_cast %42 : vector<1x16x16xbf16> to vector<16x16xbf16>
    %cst_39 = arith.constant dense<0.000000e+00> : vector<16x128xf32>
    %44 = tpu.matmul %43, %34, %cst_39 {dimension_numbers = #tpu.dot_dimension_numbers<[1], [0], [0], [1], [0, 0, 1, 1], [], []>} : vector<16x16xbf16>, vector<16x128xbf16>, vector<16x128xf32> -> vector<16x128xf32>
    %45 = arith.truncf %44 : vector<16x128xf32> to vector<16x128xbf16>
    %c1_40 = arith.constant 1 : index
    %c0_41 = arith.constant 0 : index
    %c0_42 = arith.constant 0 : index
    %46 = vector.load %arg7[%c1_40, %c0_41, %c0_42] : memref<3x128x128xbf16, #tpu.memory_space<vmem>>, vector<1x128x128xbf16>
    %47 = vector.shape_cast %46 : vector<1x128x128xbf16> to vector<128x128xbf16>
    %cst_43 = arith.constant dense<0.000000e+00> : vector<16x128xf32>
    %48 = tpu.matmul %45, %47, %cst_43 {dimension_numbers = #tpu.dot_dimension_numbers<[1], [0], [0], [1], [0, 0, 1, 1], [], []>} : vector<16x128xbf16>, vector<128x128xbf16>, vector<16x128xf32> -> vector<16x128xf32>
    %49 = arith.addf %41, %48 : vector<16x128xf32>
    %c2_44 = arith.constant 2 : index
    %c0_45 = arith.constant 0 : index
    %c0_46 = arith.constant 0 : index
    %50 = vector.load %arg6[%c2_44, %c0_45, %c0_46] : memref<3x16x16xbf16, #tpu.memory_space<vmem>>, vector<1x16x16xbf16>
    %51 = vector.shape_cast %50 : vector<1x16x16xbf16> to vector<16x16xbf16>
    %cst_47 = arith.constant dense<0.000000e+00> : vector<16x128xf32>
    %52 = tpu.matmul %51, %34, %cst_47 {dimension_numbers = #tpu.dot_dimension_numbers<[1], [0], [0], [1], [0, 0, 1, 1], [], []>} : vector<16x16xbf16>, vector<16x128xbf16>, vector<16x128xf32> -> vector<16x128xf32>
    %53 = arith.truncf %52 : vector<16x128xf32> to vector<16x128xbf16>
    %c2_48 = arith.constant 2 : index
    %c0_49 = arith.constant 0 : index
    %c0_50 = arith.constant 0 : index
    %54 = vector.load %arg7[%c2_48, %c0_49, %c0_50] : memref<3x128x128xbf16, #tpu.memory_space<vmem>>, vector<1x128x128xbf16>
    %55 = vector.shape_cast %54 : vector<1x128x128xbf16> to vector<128x128xbf16>
    %cst_51 = arith.constant dense<0.000000e+00> : vector<16x128xf32>
    %56 = tpu.matmul %53, %55, %cst_51 {dimension_numbers = #tpu.dot_dimension_numbers<[1], [0], [0], [1], [0, 0, 1, 1], [], []>} : vector<16x128xbf16>, vector<128x128xbf16>, vector<16x128xf32> -> vector<16x128xf32>
    %57 = arith.addf %49, %56 : vector<16x128xf32>
    %c0_52 = arith.constant 0 : index
    %c0_53 = arith.constant 0 : index
    %58 = vector.load %arg8[%c0_52, %c0_53] : memref<1x128xf32, #tpu.memory_space<vmem>>, vector<1x128xf32>
    %59 = vector.broadcast %58 : vector<1x128xf32> to vector<16x128xf32>
    %60 = arith.mulf %57, %59 : vector<16x128xf32>
    %c0_54 = arith.constant 0 : index
    %c0_55 = arith.constant 0 : index
    %61 = vector.load %arg9[%c0_54, %c0_55] : memref<1x128xf32, #tpu.memory_space<vmem>>, vector<1x128xf32>
    %62 = vector.broadcast %61 : vector<1x128xf32> to vector<16x128xf32>
    %63 = arith.addf %60, %62 : vector<16x128xf32>
    %cst_56 = arith.constant 0.000000e+00 : f32
    %64 = vector.broadcast %cst_56 : f32 to vector<16x128xf32>
    %65 = arith.maximumf %63, %64 : vector<16x128xf32>
    %66 = arith.truncf %65 : vector<16x128xf32> to vector<16x128xbf16>
    %c0_57 = arith.constant 0 : index
    %c0_58 = arith.constant 0 : index
    %67 = vector.load %arg10[%c0_57, %c0_58] : memref<128x16xbf16, #tpu.memory_space<vmem>>, vector<128x16xbf16>
    %cst_59 = arith.constant dense<0.000000e+00> : vector<16x16xf32>
    %68 = tpu.matmul %66, %67, %cst_59 {dimension_numbers = #tpu.dot_dimension_numbers<[1], [0], [0], [1], [0, 0, 1, 1], [], []>} : vector<16x128xbf16>, vector<128x16xbf16>, vector<16x16xf32> -> vector<16x16xf32>
    %c0_60 = arith.constant 0 : index
    %c0_61 = arith.constant 0 : index
    %69 = vector.load %arg11[%c0_60, %c0_61] : memref<1x16xf32, #tpu.memory_space<vmem>>, vector<1x16xf32>
    %70 = vector.broadcast %69 : vector<1x16xf32> to vector<16x16xf32>
    %71 = arith.addf %68, %70 : vector<16x16xf32>
    %72 = arith.negf %71 : vector<16x16xf32>
    %73 = math.exp %72 : vector<16x16xf32>
    %cst_62 = arith.constant 1.000000e+00 : f32
    %74 = vector.broadcast %cst_62 : f32 to vector<16x16xf32>
    %75 = arith.addf %74, %73 : vector<16x16xf32>
    %76 = arith.divf %74, %75 : vector<16x16xf32>
    %c0_63 = arith.constant 0 : index
    %c0_64 = arith.constant 0 : index
    %c0_65 = arith.constant 0 : index
    %77 = vector.load %arg12[%c0_63, %c0_64, %c0_65] : memref<1x16x16xf32, #tpu.memory_space<vmem>>, vector<1x16x16xf32>
    %78 = vector.shape_cast %77 : vector<1x16x16xf32> to vector<16x16xf32>
    %79 = vector.shape_cast %76 : vector<16x16xf32> to vector<1x16x16xf32>
    tpu.vector_store %arg12[%c0_63, %c0_64, %c0_65], %79 {strides = array<i32>} : memref<1x16x16xf32, #tpu.memory_space<vmem>>, vector<1x16x16xf32>,
    return
  }
  func.func @transform_0(%arg0: i32) -> (i32, i32, i32) {
    %c0_i32 = arith.constant 0 : i32
    %c0_i32_0 = arith.constant 0 : i32
    %c0_i32_1 = arith.constant 0 : i32
    return %arg0, %c0_i32, %c0_i32_0 : i32, i32, i32
  }
  func.func @transform_1(%arg0: i32) -> (i32, i32, i32) {
    %c0_i32 = arith.constant 0 : i32
    %c0_i32_0 = arith.constant 0 : i32
    %c0_i32_1 = arith.constant 0 : i32
    %c0_i32_2 = arith.constant 0 : i32
    return %c0_i32, %c0_i32_0, %c0_i32_1 : i32, i32, i32
  }
  func.func @transform_2(%arg0: i32) -> (i32, i32, i32) {
    %c0_i32 = arith.constant 0 : i32
    %c0_i32_0 = arith.constant 0 : i32
    %c0_i32_1 = arith.constant 0 : i32
    %c0_i32_2 = arith.constant 0 : i32
    return %c0_i32, %c0_i32_0, %c0_i32_1 : i32, i32, i32
  }
  func.func @transform_3(%arg0: i32) -> (i32, i32) {
    %c0_i32 = arith.constant 0 : i32
    %c0_i32_0 = arith.constant 0 : i32
    %c0_i32_1 = arith.constant 0 : i32
    return %c0_i32, %c0_i32_0 : i32, i32
  }
  func.func @transform_4(%arg0: i32) -> (i32, i32) {
    %c0_i32 = arith.constant 0 : i32
    %c0_i32_0 = arith.constant 0 : i32
    %c0_i32_1 = arith.constant 0 : i32
    return %c0_i32, %c0_i32_0 : i32, i32
  }
  func.func @transform_5(%arg0: i32) -> (i32, i32, i32) {
    %c0_i32 = arith.constant 0 : i32
    %c0_i32_0 = arith.constant 0 : i32
    %c0_i32_1 = arith.constant 0 : i32
    %c0_i32_2 = arith.constant 0 : i32
    return %c0_i32, %c0_i32_0, %c0_i32_1 : i32, i32, i32
  }
  func.func @transform_6(%arg0: i32) -> (i32, i32, i32) {
    %c0_i32 = arith.constant 0 : i32
    %c0_i32_0 = arith.constant 0 : i32
    %c0_i32_1 = arith.constant 0 : i32
    %c0_i32_2 = arith.constant 0 : i32
    return %c0_i32, %c0_i32_0, %c0_i32_1 : i32, i32, i32
  }
  func.func @transform_7(%arg0: i32) -> (i32, i32) {
    %c0_i32 = arith.constant 0 : i32
    %c0_i32_0 = arith.constant 0 : i32
    %c0_i32_1 = arith.constant 0 : i32
    return %c0_i32, %c0_i32_0 : i32, i32
  }
  func.func @transform_8(%arg0: i32) -> (i32, i32) {
    %c0_i32 = arith.constant 0 : i32
    %c0_i32_0 = arith.constant 0 : i32
    %c0_i32_1 = arith.constant 0 : i32
    return %c0_i32, %c0_i32_0 : i32, i32
  }
  func.func @transform_9(%arg0: i32) -> (i32, i32) {
    %c0_i32 = arith.constant 0 : i32
    %c0_i32_0 = arith.constant 0 : i32
    %c0_i32_1 = arith.constant 0 : i32
    return %c0_i32, %c0_i32_0 : i32, i32
  }
  func.func @transform_10(%arg0: i32) -> (i32, i32) {
    %c0_i32 = arith.constant 0 : i32
    %c0_i32_0 = arith.constant 0 : i32
    %c0_i32_1 = arith.constant 0 : i32
    return %c0_i32, %c0_i32_0 : i32, i32
  }
  func.func @transform_11(%arg0: i32) -> (i32, i32, i32) {
    %c0_i32 = arith.constant 0 : i32
    %c0_i32_0 = arith.constant 0 : i32
    %c0_i32_1 = arith.constant 0 : i32
    return %arg0, %c0_i32, %c0_i32_0 : i32, i32, i32
  }
}

</mosaic_0001>

<bundles_post_ra>
// kernel: _lambda_.6
= control target key start
LH: loop header
LB: loop body
LE: loop exit
PB: predicated region body
PF: predicated region fallthrough
CT: control target
= control target key end

     0   :  { %s1644_s0 = inlined_call_operand.hbm [shape: f32[2,16,16], index: 0, kind: input, shape index: {}]   ;;  %s1645_s1 = inlined_call_operand.hbm [shape: bf16[3,8,16], index: 1, kind: input, shape index: {}]   ;;  %s1646_s2 = inlined_call_operand.vmem [shape: bf16[3,16,128], index: 2, kind: input, shape index: {}]   ;;  %s1647_s3 = inlined_call_operand.hbm [shape: f32[1,128], index: 3, kind: input, shape index: {}]   ;;  %s1648_s4 = inlined_call_operand.hbm [shape: f32[1,128], index: 4, kind: input, shape index: {}]   ;;  %s1649_s5 = inlined_call_operand.vmem [shape: bf16[3,8,8], index: 5, kind: input, shape index: {}]   ;;  %s1650_s6 = inlined_call_operand.hbm [shape: bf16[3,128,128], index: 6, kind: input, shape index: {}]   ;;  %s1651_s7 = inlined_call_operand.vmem [shape: f32[1,128], index: 7, kind: input, shape index: {}]   ;;  %s1652_s8 = inlined_call_operand.vmem [shape: f32[1,128], index: 8, kind: input, shape index: {}]   ;;  %s1653_s9 = inlined_call_operand.vmem [shape: f32[2,8,128], index: 9, kind: output, shape index: {}]  }
   0x1   :  { %1654 = sst [smem:[#allocation13_spill]] %s1645_s1 }
   0x2   :  { %14 = vsyncpa [#allocation3], 0 }
   0x3   :  { %16 = vsyncpa [#allocation3 + $0x1], 0 }
   0x4   :  { %17 = vsyncpa [#allocation5], 0 }
   0x5   :  { %18 = vsyncpa [#allocation8], 0  ;;  %s1483_s30 = smov 0   ;;  %s1485_s10 = smov 0  }
   0x6   :  { %s1487_s11 = smov 0   ;;  %s1489_s12 = smov 0  }
   0x7 LB: > { %s1502_s13 = sadd.s32 4294967295, %s1423_s12   ;;  %p44_p0 = scmp.ne.s32.totalorder %s1415_s10, %s1411_s30  ;;  %s1423_s12 = sphi %s1489_s12, %s1663_s12   ;;  %s1419_s11 = sphi %s1487_s11, %s1662_s11   ;;  %s1415_s10 = sphi %s1485_s10, %s1661_s10   ;;  %s1411_s30 = sphi %s1483_s30, %s1660_s30  }
   0x8   : > { %p45_p1 = scmp.eq.s32.totalorder %s1502_s13, 0  ;;  %p974_p2 = scmp.ge.s32.totalorder %s1423_s12, 1 }
   0x9   : > { %p249_p3 = scmp.lt.s32.totalorder %s1423_s12, 3  ;;  %s1656_s1 = sld [smem:[#allocation13_spill]] }
   0xa   : > { %p1510_p4 = por %p45_p1, %p44_p0  ;;  %s1425_s19 = smov [#allocation4]  }
   0xb   : > { %p1517_p5 = pnand %p974_p2, %p249_p3  ;;  %s262_s20 = sshll.u32 %s1425_s19, 4  ;;  %s263_s20 = int_to_ptr.vmem [resolvable:$true] %s262_s20 }
   0xc   : > { %s290_s24 = sshll.u32 %s1648_s4, 4  ;;  %s1426_s25 = smov 64   ;;  %s291_s24 = int_to_ptr.hbm [resolvable:$true] %s290_s24 }
   0xd   : > { %p1161_p6 = pneg %p1517_p5  ;;  %s1427_s26 = smov 4  }
   0xe   : > { %s1428_s27 = smov [#allocation7]   ;;  %s278_s15 = sshll.u32 %s1647_s3, 4  ;;  %s279_s15 = int_to_ptr.hbm [resolvable:$true] %s278_s15 }
   0xf   : > { %s260_s17 = sshll.u32 %s1656_s1, 4  ;;  %p1525_p7 = pnand %p1161_p6, %p45_p1  ;;  %s261_s17 = int_to_ptr.hbm [resolvable:$true] %s260_s17 }
  0x10   : > { %s292_s28 = sshll.u32 %s1428_s27, 4  ;;  %s1430_s23 = smov [#allocation9]   ;;  %s293_s28 = int_to_ptr.vmem [resolvable:$true] %s292_s28 }
  0x11   : > { %1164 = dma.hbm_to_vmem [thread:$0]  (!%p1525_p7), %s261_s17, 192, %s263_s20, [#allocation5], %s1426_s25, %s1426_s25, %s1427_s26  }
  0x12   : > { %1170 = dma.hbm_to_vmem [thread:$0]  (!%p1525_p7), %s291_s24, 16, %s293_s28, [#allocation8]  }
  0x13   : > { %s304_s17 = sshll.u32 %s1650_s6, 4  ;;  %s1429_s20 = smov [#allocation6]   ;;  %s305_s17 = int_to_ptr.hbm [resolvable:$true] %s304_s17 }
  0x14   : > { %s280_s22 = sshll.u32 %s1429_s20, 4  ;;  %s306_s27 = sshll.u32 %s1430_s23, 4  ;;  %s281_s22 = int_to_ptr.vmem [resolvable:$true] %s280_s22  ;;  %s307_s27 = int_to_ptr.vmem [resolvable:$true] %s306_s27 }
  0x15   : > { %1167 = dma.hbm_to_vmem [thread:$0]  (!%p1525_p7), %s279_s15, 16, %s281_s22, [#allocation5]  }
  0x16   : > { %1173 = dma.hbm_to_vmem [thread:$0]  (!%p1525_p7), %s305_s17, 3072, %s307_s27, [#allocation8], %s1426_s25, %s1426_s25, %s1427_s26  }
  0x17   : > { %s1547_s24 = sadd.s32 1, %s1423_s12   ;;  %s31_s28 = sadd.s32 1, %s1419_s11 }
  0x18   : > { %s28_s29 = ssub.s32 %s1423_s12, %s1547_s24  ;;  %p38_p8 = scmp.ne.s32.totalorder %s1419_s11, %s1415_s10 }
  0x19   : > { %p29_p9 = scmp.eq.s32.totalorder %s28_s29, 0  ;;  %p39_p10 = scmp.eq.s32.totalorder %s1423_s12, 0 }
  0x1a   : > { %p1182_p11 = scmp.lt.s32.totalorder %s1423_s12, 2  ;;  %s326_s30 = sand.u32 1, %s1419_s11  }
  0x1b   : > { %s1558_s16 = scalar_select %p29_p9, %s1419_s11, %s31_s28  }
  0x1c   : > { %p40_p12 = por %p39_p10, %p38_p8  ;;  %s980_s15 = sshll.u32 %s326_s30, 4 }
  0x1d   : > { %s1115_s19 = sshll.u32 %s1423_s12, 4  ;;  %s330_s26 = scalar_lea.vmem [#allocation2], %s980_s15 }
  0x1e   : > { %s335_s21 = scalar_lea.hbm %s1644_s0, %s1115_s19  ;;  %s338_s17 = sshll.u32 %s330_s26, 4  ;;  %s339_s17 = int_to_ptr.vmem [resolvable:$true] %s338_s17 }
  0x1f   : > { %s336_s25 = sshll.u32 %s335_s21, 4  ;;  %p1564_p13 = pnand %p1182_p11, %p40_p12  ;;  %s337_s25 = int_to_ptr.hbm [resolvable:$true] %s336_s25 }
  0x20   : > { %s327_s27 = scalar_lea.sflag [#allocation3], %s326_s30  ;;  %s1351_s28 = sshra.s32 %s337_s25, 4  ;;  %s1352_s28 = int_to_ptr.hbm [resolvable:$true] %s1351_s28 }
  0x21   : > { %s1353_s29 = scalar_lea.hbm %s1352_s28, 16  ;;  %p1355_p2 = pneg %p1564_p13 }
  0x22   : > { %p1354_p0 = scmp.ne.s32.totalorder %s1352_s28, %s1353_s29  ;;  %s1358_s15 = scalar_lea.hbm %s1644_s0, 32 }
  0x23   : > { %p1359_p7 = scmp.lt.s32.totalorder %s1352_s28, %s1644_s0  ;;  %p1360_p8 = scmp.lt.s32.totalorder %s1358_s15, %s1353_s29 }
  0x24   : > { %p1356_p3 = pnand %p1355_p2, %p1354_p0 }
  0x25   : > { %p1361_p9 = por %p1360_p8, %p1359_p7 }
  0x26   : > { %p1357_p6 = pneg %p1356_p3 }
  0x28   : > { %p1362_p10 = pnand %p1361_p9, %p1357_p6 }
  0x2a   : > { %1365 = shalt.err (!%p1362_p10)
}
  0x2b   : > { %s1431_s30 = smov 128   ;;  %s1432_s21 = smov 8  }
  0x2c   : > { %1177 = dma.hbm_to_vmem [thread:$0]  (!%p1564_p13), %s337_s25, 256, %s339_s17, %s327_s27, %s1431_s30, %s1431_s30, %s1432_s21  }
  0x2d   : > { %350 = sbr.rel (%p1517_p5) target bundleno = 636 (0x27c), region = 56  ;;  %s352_s26 = sand.u32 (!%p1517_p5), 1, %s1415_s10  }
  0x2e   : > { %s984_s12 = sshll.u32 (!%p1517_p5), %s352_s26, 4  ;;  %s353_s19 = scalar_lea.sflag (!%p1517_p5), [#allocation3], %s352_s26 }
  0x2f   : > { %s356_s1 = scalar_lea.vmem (!%p1517_p5), [#allocation2], %s984_s12 }
  0x32   : > { %1398 = dma.done.wait (%p1510_p4), %s353_s19, 256  }
  0x33   : > { %1400 = vsyncadd (%p1510_p4), %s353_s19, 4294967040 }
  0x34   : > { %1402 = dma.done.wait (%p45_p1), [#allocation5], 208  }
  0x35   : > { %1404 = vsyncadd (%p45_p1), [#allocation5], 4294967088 }
  0x36   : > { %1406 = dma.done.wait (%p45_p1), [#allocation8], 3088  }
  0x37   : > { %1408 = vsyncadd (%p45_p1), [#allocation8], 4294964208  ;;  %v416_v0 = vld [vmem:[%s356_s1] sm:$0xff]  ;;  %v417_v1 = vld [vmem:[%s356_s1 + $0x8] sm:$0xff]  ;;  %vm420_vm0 = vcmask 130048   ;;  %vm568_vm1 = vcmask 1043456  }
  0x38   : > { %v418_v2 = vpack.c.bf16 %v417_v1, %v416_v0  ;;  %v419_v3 = vld [vmem:[#allocation4] sm:$0xf]  ;;  %v441_v4 = vld [vmem:[#allocation4 + $0x4] sm:$0xf]  ;;  %v507_v5 = vld [vmem:[#allocation4 + $0x8] sm:$0xf] }
  0x39   : > { %v1117_v6 = vld [vmem:[%s1646_s2 + $0x8] sm:$0xff]  ;;  %v1116_v7 = vld [vmem:[%s1646_s2] sm:$0xff]  ;;  %v1118_v8 = vld [vmem:[%s1646_s2 + $0x10] sm:$0xff]  ;;  %vm564_vm2 = vcmask 64512   ;;  %p411_p1 = scmp.lt.s32.totalorder %s1502_s13, 1 }
  0x3a   : > { %431 = vmatpush.bf16.msra.mxu0 %v418_v2  ;;  %452 = vmatpush.bf16.msra.mxu1 %v418_v2  ;;  %v1227_v23 = vld [vmem:[#allocation6] ss:$0 sm:$0xff]  ;;  %v1228_v28 = vld [vmem:[#allocation7] ss:$0 sm:$0xff]  ;;  %v1125_v29 = vld [vmem:[#allocation9 + $0x30] sm:$0xff] }
  0x3b   : > { %478 = vmatpush.bf16.msra.mxu2 %v1117_v6  ;;  %500 = vmatpush.bf16.msra.mxu3 %v1116_v7  ;;  %v1126_v24 = vld [vmem:[#allocation9 + $0x38] sm:$0xff]  ;;  %v1133_v30 = vld [vmem:[#allocation9 + $0x70] sm:$0xff]  ;;  %v1124_v33 = vld [vmem:[#allocation9 + $0x28] sm:$0xff]  ;;  %s1665_s13 = smov (!%p411_p1, %s1502_s13), 1 }
  0x3c   : > { %v1134_v25 = vld [vmem:[#allocation9 + $0x78] sm:$0xff]  ;;  %v1132_v34 = vld [vmem:[#allocation9 + $0x68] sm:$0xff]  ;;  %v1123_v39 = vld [vmem:[#allocation9 + $0x20] sm:$0xff]  ;;  %s989_s19 = sshll.u32 %s1665_s13, 3 }
  0x3d   : > { %990 = vmatmul.msk.bf16.vlgmr.msra.gmra.mxu0 %vm420_vm0, %v419_v3  ;;  %991 = vmatmul.msk.bf16.vlgmr.msra.gmra.mxu1 %vm420_vm0, %v441_v4  ;;  %v1142_v38 = vld [vmem:[#allocation9 + $0xb8] sm:$0xff]  ;;  %v1131_v40 = vld [vmem:[#allocation9 + $0x60] sm:$0xff]  ;;  %v563_v42 = vld [vmem:[%s1649_s5] sm:$0xf]  ;;  %s414_s25 = scalar_lea.vmem %s1653_s9, %s989_s19 }
  0x3e   : > { %518 = vmatpush.bf16.msrb.mxu0 %v418_v2  ;;  %544 = vmatpush.bf16.msrb.mxu1 %v1118_v8  ;;  %v1013_v43 = vld [vmem:[%s1649_s5 + $0x4] sm:$0xf]  ;;  %v1122_v45 = vld [vmem:[#allocation9 + $0x18] sm:$0xff]  ;;  %v1140_v46 = vld [vmem:[#allocation9 + $0xa8] sm:$0xff] }
  0x3f   : > { %v1141_v44 = vld [vmem:[#allocation9 + $0xb0] sm:$0xff]  ;;  %v1079_v48 = vld [vmem:[%s1649_s5 + $0x8] sm:$0xf]  ;;  %v1120_v51 = vld [vmem:[#allocation9 + $0x8] sm:$0xff] }
  0x40   : > { %v1121_v47 = vld [vmem:[#allocation9 + $0x10] sm:$0xff]  ;;  %v1130_v49 = vld [vmem:[#allocation9 + $0x58] sm:$0xff]  ;;  %v1128_v52 = vld [vmem:[#allocation9 + $0x48] sm:$0xff] }
  0x41   : > { %v1129_v50 = vld [vmem:[#allocation9 + $0x50] sm:$0xff]  ;;  %v1139_v53 = vld [vmem:[#allocation9 + $0xa0] sm:$0xff]  ;;  %v1138_v56 = vld [vmem:[#allocation9 + $0x98] sm:$0xff] }
  0x42   : > { %747 = vmatpush.bf16.msra.mxu1 %v1126_v24  ;;  %686 = vmatpush.bf16.msra.mxu0 %v1134_v25  ;;  %v1119_v54 = vld [vmem:[#allocation9] sm:$0xff]  ;;  %v1137_v57 = vld [vmem:[#allocation9 + $0x90] sm:$0xff]  ;;  %v1136_v58 = vld [vmem:[#allocation9 + $0x88] sm:$0xff] }
  0x43   : > { %v1127_v55 = vld [vmem:[#allocation9 + $0x40] sm:$0xff] }
  0x44   : > { %v1135_v59 = vld [vmem:[#allocation9 + $0x80] sm:$0xff] }
  0x46   : > { %748 = vmatpush.bf16.msra.mxu1 %v1125_v29  ;;  %687 = vmatpush.bf16.msra.mxu0 %v1133_v30 }
  0x4a   : > { %749 = vmatpush.bf16.msra.mxu1 %v1124_v33  ;;  %688 = vmatpush.bf16.msra.mxu0 %v1132_v34 }
  0x4d   : > { %1004 = vmatmul.msk.bf16.vlgmr.msrb.gmra.mxu0 %vm420_vm0, %v507_v5 }
  0x4e   : > { %750 = vmatpush.bf16.msra.mxu1 %v1123_v39  ;;  %689 = vmatpush.bf16.msra.mxu0 %v1131_v40 }
  0x52   : > { %751 = vmatpush.bf16.msra.mxu1 %v1122_v45  ;;  %690 = vmatpush.bf16.msra.mxu0 %v1130_v49 }
  0x56   : > { %752 = vmatpush.bf16.msra.mxu1 %v1121_v47  ;;  %691 = vmatpush.bf16.msra.mxu0 %v1129_v50 }
  0x5a   : > { %753 = vmatpush.bf16.msra.mxu1 %v1120_v51  ;;  %692 = vmatpush.bf16.msra.mxu0 %v1128_v52 }
  0x5e   : > { %754 = vmatpush.bf16.msra.mxu1 %v1119_v54  ;;  %693 = vmatpush.bf16.msra.mxu0 %v1127_v55 }
  0xba   : > { %v433_v9 = vpop.f32.mrf.mxu0  ;;  %v454_v10 = vpop.f32.mrf.mxu1 }
  0xbb   : > { %v437_v11 = vpack.c.bf16 %v433_v9, %v433_v9  ;;  %v458_v12 = vpack.c.bf16 %v454_v10, %v454_v10  ;;  %v1229_v10 = vld [vmem:[%s1651_s7] ss:$0 sm:$0xff] }
  0xbd   : > { %998 = vmatmul.msk.bf16.vlgmr.msra.gmra.mxu2 %vm420_vm0, %v458_v12  ;;  %1003 = vmatmul.msk.bf16.vlgmr.msra.gmra.mxu3 %vm420_vm0, %v437_v11 }
  0xc2   : > { %v435_v13 = vpop.f32.mrf.mxu0  ;;  %v456_v14 = vpop.f32.mrf.mxu1 }
  0xc3   : > { %v1230_v13 = vld [vmem:[%s1652_s8] ss:$0 sm:$0xff] }
  0xca   : > { %v520_v15 = vpop.f32.mrf.mxu0 }
  0xcb   : > { %v524_v16 = vpack.c.bf16 %v520_v15, %v520_v15 }
  0xcd   : > { %1011 = vmatmul.msk.bf16.vlgmr.msrb.gmra.mxu1 %vm420_vm0, %v524_v16 }
  0xd2   : > { %v522_v17 = vpop.f32.mrf.mxu0 }
 0x140   : > { %v480_v18 = vpop.f32.mrf.mxu2  ;;  %v502_v19 = vpop.f32.mrf.mxu3 }
 0x141   : > { %v503_v22 = vadd.f32 %v502_v19, %v480_v18 }
 0x148   : > { %v482_v20 = vpop.f32.mrf.mxu2  ;;  %v504_v21 = vpop.f32.mrf.mxu3 }
 0x14a   : > { %v546_v26 = vpop.f32.mrf.mxu1 }
 0x14b   : > { %v550_v27 = vadd.f32 %v546_v26, %v503_v22 }
 0x14d   : > { %v555_v31 = vmul.f32 %v1227_v23, %v550_v27 }
 0x14f   : > { %v560_v32 = vadd.f32 %v1228_v28, %v555_v31 }
 0x151   : > { %v561_v35 = vmax.f32 %v560_v32, 0.0 }
 0x152   : > { %v548_v36 = vpop.f32.mrf.mxu1 }
 0x153   : > { %v562_v37 = vpack.c.bf16 %v561_v35, %v561_v35 }
 0x155   : > { %v570_v41 = vsel %vm568_vm1, %v562_v37, 0 }
 0x156   : > { %579 = vmatpush.bf16.msrb.mxu2 %v570_v41  ;;  %614 = vmatpush.bf16.msrb.mxu3 %v570_v41 }
 0x159   : > { %1012 = vmatmul.msk.bf16.vlgmr.msrb.gmra.mxu2 %vm564_vm2, %v563_v42  ;;  %1014 = vmatmul.msk.bf16.vlgmr.msrb.gmra.mxu3 %vm564_vm2, %v1013_v43 }
 0x15a   : > { %772 = vmatpush.bf16.msra.mxu2 %v570_v41  ;;  %844 = vmatpush.bf16.msra.mxu3 %v1142_v38 }
 0x15e   : > { %845 = vmatpush.bf16.msra.mxu3 %v1141_v44 }
 0x162   : > { %846 = vmatpush.bf16.msra.mxu3 %v1140_v46 }
 0x166   : > { %847 = vmatpush.bf16.msra.mxu3 %v1139_v53 }
 0x169   : > { %1080 = vmatmul.msk.bf16.vlgmr.msra.gmra.mxu2 %vm564_vm2, %v1079_v48 }
 0x16a   : > { %848 = vmatpush.bf16.msra.mxu3 %v1138_v56 }
 0x16e   : > { %849 = vmatpush.bf16.msra.mxu3 %v1137_v57 }
 0x172   : > { %850 = vmatpush.bf16.msra.mxu3 %v1136_v58 }
 0x176   : > { %851 = vmatpush.bf16.msra.mxu3 %v1135_v59 }
 0x1dc   : > { %v581_v60 = vpop.f32.mrf.mxu2  ;;  %v616_v61 = vpop.f32.mrf.mxu3 }
 0x1dd   : > { %v585_v62 = vpack.c.bf16 %v581_v60, %v581_v60  ;;  %v620_v63 = vpack.c.bf16 %v616_v61, %v616_v61 }
 0x1df   : > { %755 = vmatmul.bf16.vlgmr.msra.gmra.mxu1 %v585_v62  ;;  %694 = vmatmul.bf16.vlgmr.msra.gmra.mxu0 %v620_v63 }
 0x1e4   : > { %v583_v0 = vpop.f32.mrf.mxu2  ;;  %v618_v1 = vpop.f32.mrf.mxu3 }
 0x1ec   : > { %v774_v2 = vpop.f32.mrf.mxu2 }
 0x1ed   : > { %v778_v3 = vpack.c.bf16 %v774_v2, %v774_v2 }
 0x1ef   : > { %852 = vmatmul.bf16.vlgmr.msra.gmra.mxu3 %v778_v3 }
 0x1f4   : > { %v776_v4 = vpop.f32.mrf.mxu2 }
 0x25c   : > { %v756_v5 = vpop.f32.mrf.mxu1  ;;  %v695_v6 = vpop.f32.mrf.mxu0 }
 0x25d   : > { %v757_v9 = vadd.f32 %v756_v5, %v695_v6 }
 0x264   : > { %v758_v7 = vpop.f32.mrf.mxu1  ;;  %v697_v8 = vpop.f32.mrf.mxu0 }
 0x272   : > { %v853_v11 = vpop.f32.mrf.mxu3 }
 0x273   : > { %v857_v12 = vadd.f32 %v853_v11, %v757_v9 }
 0x275   : > { %v862_v14 = vmul.f32 %v1229_v10, %v857_v12 }
 0x277   : > { %v867_v15 = vadd.f32 %v1230_v13, %v862_v14 }
 0x279   : > { %v868_v16 = vmax.f32 %v867_v15, 0.0 }
 0x27a   : > { %v855_v17 = vpop.f32.mrf.mxu3 }
 0x27b   : > { %869 = vst [vmem:[%s414_s25] sm:$0xff] %v868_v16 }
 0x27c PF: > { %p21_p4 = scmp.ge.s32.totalorder %s1547_s24, 4   ;;  %s1660_s30 = smov %s1415_s10 }
 0x27d   : > { %s1661_s10 = smov %s1419_s11  ;;  %s1662_s11 = smov %s1558_s16 }
 0x27e   : > { %s1663_s12 = smov %s1547_s24  ;;  %23 = sbr.rel (!%p21_p4) target bundleno = 7 (0x7), region = 120 }
 0x283   :  { %889 = vsyncpa [#allocation3], 1 }
 0x284   :  { %891 = vsyncpa [#allocation3 + $0x1], 1 }
 0x285   :  { %892 = vsyncpa [#allocation5], 1 }
 0x286   :  { %893 = vsyncpa [#allocation8], 1 }

// kernel: _lambda_.8
= control target key start
LH: loop header
LB: loop body
LE: loop exit
PB: predicated region body
PF: predicated region fallthrough
CT: control target
= control target key end

     0   :  { %14 = vsyncpa [#allocation3], 0  ;;  %s1940_s0 = inlined_call_operand.vmem [shape: f32[2,4,128], index: 0, kind: input, shape index: {}]   ;;  %s1941_s1 = inlined_call_operand.hbm [shape: bf16[3,2,4], index: 1, kind: input, shape index: {}]   ;;  %s1942_s2 = inlined_call_operand.hbm [shape: bf16[3,128,128], index: 2, kind: input, shape index: {}]   ;;  %s1943_s3 = inlined_call_operand.hbm [shape: f32[1,128], index: 3, kind: input, shape index: {}]   ;;  %s1944_s4 = inlined_call_operand.hbm [shape: f32[1,128], index: 4, kind: input, shape index: {}]   ;;  %s1945_s5 = inlined_call_operand.vmem [shape: bf16[3,2,2], index: 5, kind: input, shape index: {}]   ;;  %s1946_s6 = inlined_call_operand.hbm [shape: bf16[3,128,128], index: 6, kind: input, shape index: {}]   ;;  %s1947_s7 = inlined_call_operand.hbm [shape: f32[1,128], index: 7, kind: input, shape index: {}]   ;;  %s1948_s8 = inlined_call_operand.hbm [shape: f32[1,128], index: 8, kind: input, shape index: {}]   ;;  %s1949_s9 = inlined_call_operand.vmem [shape: f32[2,2,128], index: 9, kind: output, shape index: {}]  }
   0x1   :  { %15 = vsyncpa [#allocation5], 0 }
   0x2   :  { %16 = vsyncpa [#allocation8], 0 }
   0x3   :  { %17 = vsyncpa [#allocation11], 0  ;;  %s1828_s30 = smov 0  }
   0x4 LB: > { %s273_s12 = sshll.u32 %s1942_s2, 4  ;;  %s1837_s13 = sadd.s32 4294967295, %s1765_s30   ;;  %s1765_s30 = sphi %s1828_s30, %s23_s30   ;;  %s274_s12 = int_to_ptr.hbm [resolvable:$true] %s273_s12 }
   0x5   : > { %p1177_p0 = scmp.ge.s32.totalorder %s1765_s30, 1  ;;  %p248_p1 = scmp.lt.s32.totalorder %s1765_s30, 3 }
   0x6   : > { %p1496_p2 = scmp.eq.s32.totalorder %s1837_s13, 0  ;;  %s1767_s15 = smov [#allocation4]  }
   0x7   : > { %p1842_p3 = pnand %p1177_p0, %p248_p1  ;;  %s275_s16 = sshll.u32 %s1767_s15, 4  ;;  %s276_s16 = int_to_ptr.vmem [resolvable:$true] %s275_s16 }
   0x8   : > { %s300_s19 = sshll.u32 %s1944_s4, 4  ;;  %s1768_s21 = smov [#allocation7]   ;;  %s301_s19 = int_to_ptr.hbm [resolvable:$true] %s300_s19 }
   0x9   : > { %p1474_p4 = pneg %p1842_p3  ;;  %s302_s22 = sshll.u32 %s1768_s21, 4  ;;  %s303_s22 = int_to_ptr.vmem [resolvable:$true] %s302_s22 }
   0xa   : > { %s329_s25 = sshll.u32 %s1947_s7, 4  ;;  %s1769_s26 = smov 64   ;;  %s330_s25 = int_to_ptr.hbm [resolvable:$true] %s329_s25 }
   0xb   : > { %p1853_p5 = pnand %p1496_p2, %p1474_p4  ;;  %s1770_s27 = smov 4  }
   0xc   : > { %s1771_s28 = smov [#allocation10]   ;;  %s259_s15 = sshll.u32 %s1941_s1, 4  ;;  %s260_s15 = int_to_ptr.hbm [resolvable:$true] %s259_s15 }
   0xd   : > { %1480 = dma.hbm_to_vmem [thread:$0]  (!%p1853_p5), %s274_s12, 3072, %s276_s16, [#allocation5], %s1769_s26, %s1769_s26, %s1770_s27  }
   0xe   : > { %1486 = dma.hbm_to_vmem [thread:$0]  (!%p1853_p5), %s301_s19, 16, %s303_s22, [#allocation8]  }
   0xf   : > { %s331_s29 = sshll.u32 %s1771_s28, 4  ;;  %s1772_s17 = smov [#allocation2]   ;;  %s332_s29 = int_to_ptr.vmem [resolvable:$true] %s331_s29 }
  0x10   : > { %1492 = dma.hbm_to_vmem [thread:$0]  (!%p1853_p5), %s330_s25, 16, %s332_s29, [#allocation11]  }
  0x11   : > { %s261_s18 = sshll.u32 %s1772_s17, 4  ;;  %s288_s12 = sshll.u32 %s1943_s3, 4  ;;  %s262_s18 = int_to_ptr.vmem [resolvable:$true] %s261_s18  ;;  %s289_s12 = int_to_ptr.hbm [resolvable:$true] %s288_s12 }
  0x12   : > { %s1773_s16 = smov 16   ;;  %s1774_s19 = smov 1  }
  0x13   : > { %1477 = dma.hbm_to_vmem [thread:$0]  (!%p1853_p5), %s260_s15, 48, %s262_s18, [#allocation3], %s1773_s16, %s1773_s16, %s1774_s19  }
  0x14   : > { %s1775_s22 = smov [#allocation6]   ;;  %s314_s25 = sshll.u32 %s1946_s6, 4  ;;  %s315_s25 = int_to_ptr.hbm [resolvable:$true] %s314_s25 }
  0x15   : > { %s290_s24 = sshll.u32 %s1775_s22, 4  ;;  %s341_s17 = sshll.u32 %s1948_s8, 4  ;;  %s291_s24 = int_to_ptr.vmem [resolvable:$true] %s290_s24  ;;  %s342_s17 = int_to_ptr.hbm [resolvable:$true] %s341_s17 }
  0x16   : > { %1483 = dma.hbm_to_vmem [thread:$0]  (!%p1853_p5), %s289_s12, 16, %s291_s24, [#allocation5]  }
  0x17   : > { %s1776_s21 = smov [#allocation9]   ;;  %s1777_s15 = smov [#allocation12]  }
  0x18   : > { %s316_s23 = sshll.u32 %s1776_s21, 4  ;;  %s343_s18 = sshll.u32 %s1777_s15, 4  ;;  %s317_s23 = int_to_ptr.vmem [resolvable:$true] %s316_s23  ;;  %s344_s18 = int_to_ptr.vmem [resolvable:$true] %s343_s18 }
  0x19   : > { %1489 = dma.hbm_to_vmem [thread:$0]  (!%p1853_p5), %s315_s25, 3072, %s317_s23, [#allocation8], %s1769_s26, %s1769_s26, %s1770_s27  }
  0x1a   : > { %1495 = dma.hbm_to_vmem [thread:$0]  (!%p1853_p5), %s342_s17, 16, %s344_s18, [#allocation11]  }
  0x1b   : > { %363 = sbr.rel (%p1842_p3) target bundleno = 620 (0x26c), region = 56 }
  0x20   : > { %1748 = dma.done.wait (%p1496_p2), [#allocation3], 48  }
  0x21   : > { %1750 = vsyncadd (%p1496_p2), [#allocation3], 4294967248 }
  0x22   : > { %1752 = dma.done.wait (%p1496_p2), [#allocation5], 3088  }
  0x23   : > { %1754 = vsyncadd (%p1496_p2), [#allocation5], 4294964208 }
  0x24   : > { %1756 = dma.done.wait (%p1496_p2), [#allocation8], 3088  }
  0x25   : > { %1758 = vsyncadd (%p1496_p2), [#allocation8], 4294964208 }
  0x26   : > { %1760 = dma.done.wait (%p1496_p2), [#allocation11], 32  }
  0x27   : > { %1762 = vsyncadd (%p1496_p2), [#allocation11], 4294967264  ;;  %p428_p6 = scmp.lt.s32.totalorder %s1837_s13, 1  ;;  %vm444_vm0 = vcmask 1041408   ;;  %v1413_v2 = vld [vmem:[#allocation4 + $0x78] sm:$0xff]  ;;  %vm440_vm1 = vcmask 31744  }
  0x28   : > { %v1405_v3 = vld [vmem:[#allocation4 + $0x38] sm:$0xff]  ;;  %562 = vmatpush.bf16.msra.mxu2 %v1413_v2  ;;  %v1412_v7 = vld [vmem:[#allocation4 + $0x70] sm:$0xff]  ;;  %v1411_v11 = vld [vmem:[#allocation4 + $0x68] sm:$0xff]  ;;  %vm751_vm2 = vcmask 1040384   ;;  %vm747_vm3 = vcmask 15360  }
  0x29   : > { %s1953_s13 = smov (!%p428_p6, %s1837_s13), 1  ;;  %v439_v5 = vld [vmem:[#allocation2] sm:$0x1]  ;;  %v479_v6 = vld [vmem:[#allocation2 + $0x1] sm:$0x1]  ;;  %623 = vmatpush.bf16.msra.mxu3 %v1405_v3  ;;  %v1404_v8 = vld [vmem:[#allocation4 + $0x30] sm:$0xff] }
  0x2a   : > { %s1194_s14 = sshll.u32 %s1953_s13, 2  ;;  %v1421_v9 = vld [vmem:[#allocation4 + $0xb8] sm:$0xff]  ;;  %v1420_v10 = vld [vmem:[#allocation4 + $0xb0] sm:$0xff]  ;;  %v1403_v12 = vld [vmem:[#allocation4 + $0x28] sm:$0xff]  ;;  %s1195_s10 = sshll.u32 %s1953_s13, 1 }
  0x2b   : > { %s431_s27 = scalar_lea.vmem %s1940_s0, %s1194_s14  ;;  %v1419_v13 = vld [vmem:[#allocation4 + $0xa8] sm:$0xff]  ;;  %v1410_v14 = vld [vmem:[#allocation4 + $0x60] sm:$0xff]  ;;  %v1409_v16 = vld [vmem:[#allocation4 + $0x58] sm:$0xff]  ;;  %s435_s11 = scalar_lea.vmem %s1949_s9, %s1195_s10 }
  0x2c   : > { %v437_v0 = vld [vmem:[%s431_s27] sm:$0xf]  ;;  %563 = vmatpush.bf16.msra.mxu2 %v1412_v7  ;;  %v1402_v15 = vld [vmem:[#allocation4 + $0x20] sm:$0xff]  ;;  %v1408_v19 = vld [vmem:[#allocation4 + $0x50] sm:$0xff] }
  0x2d   : > { %v438_v1 = vpack.c.bf16 %v437_v0, %v437_v0  ;;  %624 = vmatpush.bf16.msra.mxu3 %v1404_v8  ;;  %v1401_v17 = vld [vmem:[#allocation4 + $0x18] sm:$0xff]  ;;  %v1400_v20 = vld [vmem:[#allocation4 + $0x10] sm:$0xff]  ;;  %v1407_v21 = vld [vmem:[#allocation4 + $0x48] sm:$0xff] }
  0x2e   : > { %v637_v18 = vld [vmem:[#allocation2 + $0x2] sm:$0x1]  ;;  %v1399_v22 = vld [vmem:[#allocation4 + $0x8] sm:$0xff]  ;;  %v1406_v23 = vld [vmem:[#allocation4 + $0x40] sm:$0xff] }
  0x2f   : > { %v446_v4 = vsel %vm444_vm0, %v438_v1, 0  ;;  %v1398_v24 = vld [vmem:[#allocation4] sm:$0xff]  ;;  %v1417_v26 = vld [vmem:[#allocation4 + $0x98] sm:$0xff]  ;;  %v1416_v27 = vld [vmem:[#allocation4 + $0x90] sm:$0xff] }
  0x30   : > { %455 = vmatpush.bf16.msra.mxu0 %v446_v4  ;;  %490 = vmatpush.bf16.msra.mxu1 %v446_v4  ;;  %v1418_v25 = vld [vmem:[#allocation4 + $0xa0] sm:$0xff]  ;;  %v1415_v28 = vld [vmem:[#allocation4 + $0x88] sm:$0xff]  ;;  %v1436_v50 = vld [vmem:[#allocation9 + $0x70] sm:$0xff] }
  0x31   : > { %564 = vmatpush.bf16.msra.mxu2 %v1411_v11  ;;  %625 = vmatpush.bf16.msra.mxu3 %v1403_v12  ;;  %v1414_v29 = vld [vmem:[#allocation4 + $0x80] sm:$0xff]  ;;  %v1444_v51 = vld [vmem:[#allocation9 + $0xb0] sm:$0xff]  ;;  %v1435_v54 = vld [vmem:[#allocation9 + $0x68] sm:$0xff] }
  0x32   : > { %v1529_v44 = vld [vmem:[#allocation6] ss:$0 sm:$0xff]  ;;  %v1530_v49 = vld [vmem:[#allocation7] ss:$0 sm:$0xff]  ;;  %v1443_v55 = vld [vmem:[#allocation9 + $0xa8] sm:$0xff] }
  0x33   : > { %1196 = vmatmul.msk.bf16.vlgmr.msra.gmra.mxu0 %vm440_vm1, %v439_v5  ;;  %1197 = vmatmul.msk.bf16.vlgmr.msra.gmra.mxu1 %vm440_vm1, %v479_v6  ;;  %v1437_v45 = vld [vmem:[#allocation9 + $0x78] sm:$0xff]  ;;  %v1434_v59 = vld [vmem:[#allocation9 + $0x60] sm:$0xff]  ;;  %v1428_v1 = vld [vmem:[#allocation9 + $0x30] sm:$0xff] }
  0x34   : > { %648 = vmatpush.bf16.msrb.mxu0 %v446_v4  ;;  %720 = vmatpush.bf16.msrb.mxu1 %v1421_v9  ;;  %v1445_v47 = vld [vmem:[#allocation9 + $0xb8] sm:$0xff]  ;;  %v1432_v2 = vld [vmem:[#allocation9 + $0x50] sm:$0xff]  ;;  %v1427_v3 = vld [vmem:[#allocation9 + $0x28] sm:$0xff] }
  0x35   : > { %565 = vmatpush.bf16.msra.mxu2 %v1410_v14  ;;  %626 = vmatpush.bf16.msra.mxu3 %v1402_v15  ;;  %v1429_v60 = vld [vmem:[#allocation9 + $0x38] sm:$0xff]  ;;  %v1426_v5 = vld [vmem:[#allocation9 + $0x20] sm:$0xff]  ;;  %v1431_v7 = vld [vmem:[#allocation9 + $0x48] sm:$0xff] }
  0x36   : > { %v1296_v62 = vld [vmem:[%s1945_s5 + $0x1] sm:$0x1]  ;;  %v746_v63 = vld [vmem:[%s1945_s5] sm:$0x1]  ;;  %v1362_v4 = vld [vmem:[%s1945_s5 + $0x2] sm:$0x1] }
  0x37   : > { %v1433_v0 = vld [vmem:[#allocation9 + $0x58] sm:$0xff]  ;;  %v1424_v8 = vld [vmem:[#allocation9 + $0x10] sm:$0xff]  ;;  %v1442_v9 = vld [vmem:[#allocation9 + $0xa0] sm:$0xff] }
  0x38   : > { %721 = vmatpush.bf16.msrb.mxu1 %v1420_v10  ;;  %v1425_v6 = vld [vmem:[#allocation9 + $0x18] sm:$0xff]  ;;  %v1430_v10 = vld [vmem:[#allocation9 + $0x40] sm:$0xff]  ;;  %v1423_v11 = vld [vmem:[#allocation9 + $0x8] sm:$0xff] }
  0x39   : > { %566 = vmatpush.bf16.msra.mxu2 %v1409_v16  ;;  %627 = vmatpush.bf16.msra.mxu3 %v1401_v17  ;;  %v1441_v12 = vld [vmem:[#allocation9 + $0x98] sm:$0xff]  ;;  %v1440_v14 = vld [vmem:[#allocation9 + $0x90] sm:$0xff]  ;;  %v1439_v15 = vld [vmem:[#allocation9 + $0x88] sm:$0xff] }
  0x3a   : > { %v1438_v16 = vld [vmem:[#allocation9 + $0x80] sm:$0xff] }
  0x3c   : > { %722 = vmatpush.bf16.msrb.mxu1 %v1419_v13  ;;  %v1422_v13 = vld [vmem:[#allocation9] sm:$0xff] }
  0x3d   : > { %567 = vmatpush.bf16.msra.mxu2 %v1408_v19  ;;  %628 = vmatpush.bf16.msra.mxu3 %v1400_v20 }
  0x40   : > { %723 = vmatpush.bf16.msrb.mxu1 %v1418_v25 }
  0x41   : > { %568 = vmatpush.bf16.msra.mxu2 %v1407_v21  ;;  %629 = vmatpush.bf16.msra.mxu3 %v1399_v22 }
  0x43   : > { %1262 = vmatmul.msk.bf16.vlgmr.msrb.gmra.mxu0 %vm440_vm1, %v637_v18 }
  0x44   : > { %724 = vmatpush.bf16.msrb.mxu1 %v1417_v26 }
  0x45   : > { %569 = vmatpush.bf16.msra.mxu2 %v1406_v23  ;;  %630 = vmatpush.bf16.msra.mxu3 %v1398_v24 }
  0x48   : > { %725 = vmatpush.bf16.msrb.mxu1 %v1416_v27 }
  0x49   : > { %869 = vmatpush.bf16.msrb.mxu3 %v1437_v45  ;;  %1027 = vmatpush.bf16.msrb.mxu2 %v1445_v47 }
  0x4c   : > { %726 = vmatpush.bf16.msrb.mxu1 %v1415_v28 }
  0x4d   : > { %870 = vmatpush.bf16.msrb.mxu3 %v1436_v50  ;;  %1028 = vmatpush.bf16.msrb.mxu2 %v1444_v51 }
  0x50   : > { %727 = vmatpush.bf16.msrb.mxu1 %v1414_v29 }
  0x51   : > { %871 = vmatpush.bf16.msrb.mxu3 %v1435_v54  ;;  %1029 = vmatpush.bf16.msrb.mxu2 %v1443_v55 }
  0x55   : > { %872 = vmatpush.bf16.msrb.mxu3 %v1434_v59  ;;  %1030 = vmatpush.bf16.msrb.mxu2 %v1442_v9 }
  0x59   : > { %873 = vmatpush.bf16.msrb.mxu3 %v1433_v0  ;;  %1031 = vmatpush.bf16.msrb.mxu2 %v1441_v12 }
  0x5d   : > { %874 = vmatpush.bf16.msrb.mxu3 %v1432_v2  ;;  %1032 = vmatpush.bf16.msrb.mxu2 %v1440_v14 }
  0x61   : > { %875 = vmatpush.bf16.msrb.mxu3 %v1431_v7  ;;  %1033 = vmatpush.bf16.msrb.mxu2 %v1439_v15 }
  0x65   : > { %876 = vmatpush.bf16.msrb.mxu3 %v1430_v10  ;;  %1034 = vmatpush.bf16.msrb.mxu2 %v1438_v16 }
  0xb0   : > { %v457_v30 = vpop.f32.mrf.mxu0  ;;  %v492_v31 = vpop.f32.mrf.mxu1 }
  0xb1   : > { %v461_v32 = vpack.c.bf16 %v457_v30, %v457_v30  ;;  %v496_v33 = vpack.c.bf16 %v492_v31, %v492_v31  ;;  %v1531_v31 = vld [vmem:[#allocation10] ss:$0 sm:$0xff] }
  0xb3   : > { %570 = vmatmul.bf16.vlgmr.msra.gmra.mxu2 %v496_v33  ;;  %631 = vmatmul.bf16.vlgmr.msra.gmra.mxu3 %v461_v32 }
  0xb8   : > { %v459_v34 = vpop.f32.mrf.mxu0  ;;  %v494_v35 = vpop.f32.mrf.mxu1 }
  0xb9   : > { %v1532_v34 = vld [vmem:[#allocation12] ss:$0 sm:$0xff] }
  0xc0   : > { %v650_v36 = vpop.f32.mrf.mxu0 }
  0xc1   : > { %v654_v37 = vpack.c.bf16 %v650_v36, %v650_v36 }
  0xc3   : > { %728 = vmatmul.bf16.vlgmr.msrb.gmra.mxu1 %v654_v37 }
  0xc8   : > { %v652_v38 = vpop.f32.mrf.mxu0 }
 0x136   : > { %v571_v39 = vpop.f32.mrf.mxu2  ;;  %v632_v40 = vpop.f32.mrf.mxu3 }
 0x137   : > { %v633_v43 = vadd.f32 %v632_v40, %v571_v39 }
 0x13e   : > { %v573_v41 = vpop.f32.mrf.mxu2  ;;  %v634_v42 = vpop.f32.mrf.mxu3 }
 0x140   : > { %v729_v46 = vpop.f32.mrf.mxu1 }
 0x141   : > { %v733_v48 = vadd.f32 %v729_v46, %v633_v43 }
 0x143   : > { %v738_v52 = vmul.f32 %v1529_v44, %v733_v48 }
 0x145   : > { %v743_v53 = vadd.f32 %v1530_v49, %v738_v52 }
 0x147   : > { %v744_v56 = vmax.f32 %v743_v53, 0.0 }
 0x148   : > { %v731_v57 = vpop.f32.mrf.mxu1 }
 0x149   : > { %v745_v58 = vpack.c.bf16 %v744_v56, %v744_v56 }
 0x14b   : > { %v753_v61 = vsel %vm751_vm2, %v745_v58, 0 }
 0x14c   : > { %762 = vmatpush.bf16.msra.mxu0 %v753_v61  ;;  %797 = vmatpush.bf16.msra.mxu1 %v753_v61 }
 0x14f   : > { %1297 = vmatmul.msk.bf16.vlgmr.msra.gmra.mxu1 %vm747_vm3, %v1296_v62  ;;  %1295 = vmatmul.msk.bf16.vlgmr.msra.gmra.mxu0 %vm747_vm3, %v746_v63 }
 0x150   : > { %955 = vmatpush.bf16.msrb.mxu1 %v753_v61  ;;  %930 = vmatpush.bf16.msrb.mxu0 %v1429_v60 }
 0x154   : > { %931 = vmatpush.bf16.msrb.mxu0 %v1428_v1 }
 0x158   : > { %932 = vmatpush.bf16.msrb.mxu0 %v1427_v3 }
 0x15c   : > { %933 = vmatpush.bf16.msrb.mxu0 %v1426_v5 }
 0x15f   : > { %1363 = vmatmul.msk.bf16.vlgmr.msrb.gmra.mxu1 %vm747_vm3, %v1362_v4 }
 0x160   : > { %934 = vmatpush.bf16.msrb.mxu0 %v1425_v6 }
 0x164   : > { %935 = vmatpush.bf16.msrb.mxu0 %v1424_v8 }
 0x168   : > { %936 = vmatpush.bf16.msrb.mxu0 %v1423_v11 }
 0x16c   : > { %937 = vmatpush.bf16.msrb.mxu0 %v1422_v13 }
 0x1cc   : > { %v799_v17 = vpop.f32.mrf.mxu1  ;;  %v764_v18 = vpop.f32.mrf.mxu0 }
 0x1cd   : > { %v803_v19 = vpack.c.bf16 %v799_v17, %v799_v17  ;;  %v768_v20 = vpack.c.bf16 %v764_v18, %v764_v18 }
 0x1cf   : > { %877 = vmatmul.bf16.vlgmr.msrb.gmra.mxu3 %v803_v19  ;;  %938 = vmatmul.bf16.vlgmr.msrb.gmra.mxu0 %v768_v20 }
 0x1d4   : > { %v801_v21 = vpop.f32.mrf.mxu1  ;;  %v766_v22 = vpop.f32.mrf.mxu0 }
 0x1dc   : > { %v957_v23 = vpop.f32.mrf.mxu1 }
 0x1dd   : > { %v961_v24 = vpack.c.bf16 %v957_v23, %v957_v23 }
 0x1df   : > { %1035 = vmatmul.bf16.vlgmr.msrb.gmra.mxu2 %v961_v24 }
 0x1e4   : > { %v959_v25 = vpop.f32.mrf.mxu1 }
 0x24c   : > { %v939_v26 = vpop.f32.mrf.mxu0 }
 0x252   : > { %v878_v27 = vpop.f32.mrf.mxu3 }
 0x253   : > { %v940_v30 = vadd.f32 %v939_v26, %v878_v27 }
 0x254   : > { %v941_v28 = vpop.f32.mrf.mxu0 }
 0x25a   : > { %v880_v29 = vpop.f32.mrf.mxu3 }
 0x262   : > { %v1036_v32 = vpop.f32.mrf.mxu2 }
 0x263   : > { %v1040_v33 = vadd.f32 %v1036_v32, %v940_v30 }
 0x265   : > { %v1045_v35 = vmul.f32 %v1531_v31, %v1040_v33 }
 0x267   : > { %v1050_v36 = vadd.f32 %v1532_v34, %v1045_v35 }
 0x269   : > { %v1051_v37 = vmax.f32 %v1050_v36, 0.0 }
 0x26a   : > { %v1038_v38 = vpop.f32.mrf.mxu2 }
 0x26b   : > { %1052 = vst [vmem:[%s435_s11] sm:$0x3] %v1051_v37 }
 0x26c PF: > { %s23_s30 = sadd.s32 1, %s1765_s30  }
 0x26d   : > { %p20_p7 = scmp.ge.s32.totalorder %s23_s30, 4  }
 0x26f   :  { %22 = sbr.rel (!%p20_p7) target bundleno = 4 (0x4), region = 123 }
 0x274   :  { %1072 = vsyncpa [#allocation3], 1 }
 0x275   :  { %1074 = vsyncpa [#allocation3 + $0x1], 1 }
 0x276   :  { %1075 = vsyncpa [#allocation5], 1 }
 0x277   :  { %1076 = vsyncpa [#allocation8], 1 }
 0x278   :  { %1077 = vsyncpa [#allocation11], 1 }

// kernel: _lambda_.7
= control target key start
LH: loop header
LB: loop body
LE: loop exit
PB: predicated region body
PF: predicated region fallthrough
CT: control target
= control target key end

     0   :  { %14 = vsyncpa [#allocation3], 0  ;;  %s2006_s0 = inlined_call_operand.vmem [shape: f32[2,8,128], index: 0, kind: input, shape index: {}]   ;;  %s2007_s1 = inlined_call_operand.hbm [shape: bf16[3,4,8], index: 1, kind: input, shape index: {}]   ;;  %s2008_s2 = inlined_call_operand.hbm [shape: bf16[3,128,128], index: 2, kind: input, shape index: {}]   ;;  %s2009_s3 = inlined_call_operand.hbm [shape: f32[1,128], index: 3, kind: input, shape index: {}]   ;;  %s2010_s4 = inlined_call_operand.hbm [shape: f32[1,128], index: 4, kind: input, shape index: {}]   ;;  %s2011_s5 = inlined_call_operand.hbm [shape: bf16[3,4,4], index: 5, kind: input, shape index: {}]   ;;  %s2012_s6 = inlined_call_operand.hbm [shape: bf16[3,128,128], index: 6, kind: input, shape index: {}]   ;;  %s2013_s7 = inlined_call_operand.hbm [shape: f32[1,128], index: 7, kind: input, shape index: {}]   ;;  %s2014_s8 = inlined_call_operand.hbm [shape: f32[1,128], index: 8, kind: input, shape index: {}]   ;;  %s2015_s9 = inlined_call_operand.vmem [shape: f32[2,4,128], index: 9, kind: output, shape index: {}]  }
   0x1   :  { %15 = vsyncpa [#allocation5], 0 }
   0x2   :  { %16 = vsyncpa [#allocation8], 0 }
   0x3   :  { %17 = vsyncpa [#allocation11], 0 }
   0x4   :  { %18 = vsyncpa [#allocation14], 0  ;;  %s1900_s30 = smov 0  }
   0x5 LB: > { %s274_s12 = sshll.u32 %s2008_s2, 4  ;;  %s1909_s13 = sadd.s32 4294967295, %s1836_s30   ;;  %s1836_s30 = sphi %s1900_s30, %s24_s30   ;;  %s275_s12 = int_to_ptr.hbm [resolvable:$true] %s274_s12 }
   0x6   : > { %p1204_p0 = scmp.ge.s32.totalorder %s1836_s30, 1  ;;  %p249_p1 = scmp.lt.s32.totalorder %s1836_s30, 3 }
   0x7   : > { %p1530_p2 = scmp.eq.s32.totalorder %s1909_s13, 0  ;;  %s1838_s15 = smov [#allocation4]  }
   0x8   : > { %p1914_p3 = pnand %p1204_p0, %p249_p1  ;;  %s276_s16 = sshll.u32 %s1838_s15, 4  ;;  %s277_s16 = int_to_ptr.vmem [resolvable:$true] %s276_s16 }
   0x9   : > { %s301_s19 = sshll.u32 %s2010_s4, 4  ;;  %s1839_s21 = smov [#allocation7]   ;;  %s302_s19 = int_to_ptr.hbm [resolvable:$true] %s301_s19 }
   0xa   : > { %p1505_p4 = pneg %p1914_p3  ;;  %s303_s22 = sshll.u32 %s1839_s21, 4  ;;  %s304_s22 = int_to_ptr.vmem [resolvable:$true] %s303_s22 }
   0xb   : > { %s326_s25 = sshll.u32 %s2012_s6, 4  ;;  %s1840_s26 = smov 64   ;;  %s327_s25 = int_to_ptr.hbm [resolvable:$true] %s326_s25 }
   0xc   : > { %p1925_p5 = pnand %p1530_p2, %p1505_p4  ;;  %s1841_s27 = smov 4  }
   0xd   : > { %s1842_s28 = smov [#allocation10]   ;;  %s260_s15 = sshll.u32 %s2007_s1, 4  ;;  %s261_s15 = int_to_ptr.hbm [resolvable:$true] %s260_s15 }
   0xe   : > { %1511 = dma.hbm_to_vmem [thread:$0]  (!%p1925_p5), %s275_s12, 3072, %s277_s16, [#allocation5], %s1840_s26, %s1840_s26, %s1841_s27  }
   0xf   : > { %1517 = dma.hbm_to_vmem [thread:$0]  (!%p1925_p5), %s302_s19, 16, %s304_s22, [#allocation8]  }
  0x10   : > { %s328_s29 = sshll.u32 %s1842_s28, 4  ;;  %s1843_s17 = smov [#allocation2]   ;;  %s329_s29 = int_to_ptr.vmem [resolvable:$true] %s328_s29 }
  0x11   : > { %1523 = dma.hbm_to_vmem [thread:$0]  (!%p1925_p5), %s327_s25, 3072, %s329_s29, [#allocation11], %s1840_s26, %s1840_s26, %s1841_s27  }
  0x12   : > { %s262_s18 = sshll.u32 %s1843_s17, 4  ;;  %s289_s12 = sshll.u32 %s2009_s3, 4  ;;  %s263_s18 = int_to_ptr.vmem [resolvable:$true] %s262_s18  ;;  %s290_s12 = int_to_ptr.hbm [resolvable:$true] %s289_s12 }
  0x13   : > { %s1844_s16 = smov 32   ;;  %s1845_s19 = smov 2  }
  0x14   : > { %1508 = dma.hbm_to_vmem [thread:$0]  (!%p1925_p5), %s261_s15, 96, %s263_s18, [#allocation3], %s1844_s16, %s1844_s16, %s1845_s19  }
  0x15   : > { %s1846_s22 = smov [#allocation6]   ;;  %s312_s25 = sshll.u32 %s2011_s5, 4  ;;  %s313_s25 = int_to_ptr.hbm [resolvable:$true] %s312_s25 }
  0x16   : > { %s291_s24 = sshll.u32 %s1846_s22, 4  ;;  %s341_s29 = sshll.u32 %s2013_s7, 4  ;;  %s292_s24 = int_to_ptr.vmem [resolvable:$true] %s291_s24  ;;  %s342_s29 = int_to_ptr.hbm [resolvable:$true] %s341_s29 }
  0x17   : > { %1514 = dma.hbm_to_vmem [thread:$0]  (!%p1925_p5), %s290_s12, 16, %s292_s24, [#allocation5]  }
  0x18   : > { %s1847_s11 = smov [#allocation9]   ;;  %s1848_s15 = smov [#allocation12]  }
  0x19   : > { %s314_s17 = sshll.u32 %s1847_s11, 4  ;;  %s343_s18 = sshll.u32 %s1848_s15, 4  ;;  %s315_s17 = int_to_ptr.vmem [resolvable:$true] %s314_s17  ;;  %s344_s18 = int_to_ptr.vmem [resolvable:$true] %s343_s18 }
  0x1a   : > { %1520 = dma.hbm_to_vmem [thread:$0]  (!%p1925_p5), %s313_s25, 96, %s315_s17, [#allocation8], %s1844_s16, %s1844_s16, %s1845_s19  }
  0x1b   : > { %s353_s22 = sshll.u32 %s2014_s8, 4  ;;  %s1849_s12 = smov [#allocation13]   ;;  %s354_s22 = int_to_ptr.hbm [resolvable:$true] %s353_s22 }
  0x1c   : > { %1526 = dma.hbm_to_vmem [thread:$0]  (!%p1925_p5), %s342_s29, 16, %s344_s18, [#allocation11]  }
  0x1d   : > { %s355_s24 = sshll.u32 %s1849_s12, 4  ;;  %375 = sbr.rel (%p1914_p3) target bundleno = 624 (0x270), region = 56  ;;  %s356_s24 = int_to_ptr.vmem [resolvable:$true] %s355_s24 }
  0x1e   : > { %1529 = dma.hbm_to_vmem [thread:$0]  (!%p1925_p5), %s354_s22, 16, %s356_s24, [#allocation14]  }
  0x22   : > { %1815 = dma.done.wait (%p1530_p2), [#allocation3], 96  }
  0x23   : > { %1817 = vsyncadd (%p1530_p2), [#allocation3], 4294967200 }
  0x24   : > { %1819 = dma.done.wait (%p1530_p2), [#allocation5], 3088  }
  0x25   : > { %1821 = vsyncadd (%p1530_p2), [#allocation5], 4294964208 }
  0x26   : > { %1823 = dma.done.wait (%p1530_p2), [#allocation8], 112  }
  0x27   : > { %1825 = vsyncadd (%p1530_p2), [#allocation8], 4294967184 }
  0x28   : > { %1827 = dma.done.wait (%p1530_p2), [#allocation11], 3088  }
  0x29   : > { %1829 = vsyncadd (%p1530_p2), [#allocation11], 4294964208 }
  0x2a   : > { %1831 = dma.done.wait (%p1530_p2), [#allocation14], 16  }
  0x2b   : > { %1833 = vsyncadd (%p1530_p2), [#allocation14], 4294967280  ;;  %p445_p6 = scmp.lt.s32.totalorder %s1909_s13, 1  ;;  %vm461_vm0 = vcmask 1043456   ;;  %v1440_v2 = vld [vmem:[#allocation4 + $0x78] sm:$0xff]  ;;  %vm457_vm1 = vcmask 64512  }
  0x2c   : > { %v1432_v3 = vld [vmem:[#allocation4 + $0x38] sm:$0xff]  ;;  %579 = vmatpush.bf16.msra.mxu2 %v1440_v2  ;;  %v1439_v7 = vld [vmem:[#allocation4 + $0x70] sm:$0xff]  ;;  %v1438_v11 = vld [vmem:[#allocation4 + $0x68] sm:$0xff]  ;;  %vm768_vm2 = vcmask 1041408   ;;  %vm764_vm3 = vcmask 31744  }
  0x2d   : > { %s2019_s13 = smov (!%p445_p6, %s1909_s13), 1  ;;  %v456_v5 = vld [vmem:[#allocation2] sm:$0x3]  ;;  %v496_v6 = vld [vmem:[#allocation2 + $0x2] sm:$0x3]  ;;  %640 = vmatpush.bf16.msra.mxu3 %v1432_v3  ;;  %v1431_v8 = vld [vmem:[#allocation4 + $0x30] sm:$0xff] }
  0x2e   : > { %s1223_s14 = sshll.u32 %s2019_s13, 3  ;;  %v1448_v9 = vld [vmem:[#allocation4 + $0xb8] sm:$0xff]  ;;  %v1447_v10 = vld [vmem:[#allocation4 + $0xb0] sm:$0xff]  ;;  %v1430_v12 = vld [vmem:[#allocation4 + $0x28] sm:$0xff]  ;;  %s1224_s28 = sshll.u32 %s2019_s13, 2 }
  0x2f   : > { %s448_s19 = scalar_lea.vmem %s2006_s0, %s1223_s14  ;;  %v1446_v13 = vld [vmem:[#allocation4 + $0xa8] sm:$0xff]  ;;  %v1437_v14 = vld [vmem:[#allocation4 + $0x60] sm:$0xff]  ;;  %v1436_v16 = vld [vmem:[#allocation4 + $0x58] sm:$0xff]  ;;  %s452_s26 = scalar_lea.vmem %s2015_s9, %s1224_s28 }
  0x30   : > { %v454_v0 = vld [vmem:[%s448_s19] sm:$0xff]  ;;  %580 = vmatpush.bf16.msra.mxu2 %v1439_v7  ;;  %v1435_v19 = vld [vmem:[#allocation4 + $0x50] sm:$0xff]  ;;  %v1434_v21 = vld [vmem:[#allocation4 + $0x48] sm:$0xff] }
  0x31   : > { %v455_v1 = vpack.c.bf16 %v454_v0, %v454_v0  ;;  %641 = vmatpush.bf16.msra.mxu3 %v1431_v8  ;;  %v1429_v15 = vld [vmem:[#allocation4 + $0x20] sm:$0xff]  ;;  %v1428_v17 = vld [vmem:[#allocation4 + $0x18] sm:$0xff]  ;;  %v1427_v20 = vld [vmem:[#allocation4 + $0x10] sm:$0xff] }
  0x32   : > { %v654_v18 = vld [vmem:[#allocation2 + $0x4] sm:$0x3]  ;;  %v1426_v22 = vld [vmem:[#allocation4 + $0x8] sm:$0xff]  ;;  %v1433_v23 = vld [vmem:[#allocation4 + $0x40] sm:$0xff] }
  0x33   : > { %v463_v4 = vsel %vm461_vm0, %v455_v1, 0  ;;  %v1425_v24 = vld [vmem:[#allocation4] sm:$0xff]  ;;  %v1444_v26 = vld [vmem:[#allocation4 + $0x98] sm:$0xff]  ;;  %v1443_v27 = vld [vmem:[#allocation4 + $0x90] sm:$0xff] }
  0x34   : > { %472 = vmatpush.bf16.msra.mxu0 %v463_v4  ;;  %507 = vmatpush.bf16.msra.mxu1 %v463_v4  ;;  %v1445_v25 = vld [vmem:[#allocation4 + $0xa0] sm:$0xff]  ;;  %v1442_v28 = vld [vmem:[#allocation4 + $0x88] sm:$0xff]  ;;  %v1462_v54 = vld [vmem:[#allocation10 + $0x68] sm:$0xff] }
  0x35   : > { %581 = vmatpush.bf16.msra.mxu2 %v1438_v11  ;;  %642 = vmatpush.bf16.msra.mxu3 %v1430_v12  ;;  %v1441_v29 = vld [vmem:[#allocation4 + $0x80] sm:$0xff]  ;;  %v1470_v55 = vld [vmem:[#allocation10 + $0xa8] sm:$0xff]  ;;  %v1461_v59 = vld [vmem:[#allocation10 + $0x60] sm:$0xff] }
  0x36   : > { %v1566_v44 = vld [vmem:[#allocation6] ss:$0 sm:$0xff]  ;;  %v1464_v45 = vld [vmem:[#allocation10 + $0x78] sm:$0xff]  ;;  %v1454_v3 = vld [vmem:[#allocation10 + $0x28] sm:$0xff] }
  0x37   : > { %1225 = vmatmul.msk.bf16.vlgmr.msra.gmra.mxu0 %vm457_vm1, %v456_v5  ;;  %1226 = vmatmul.msk.bf16.vlgmr.msra.gmra.mxu1 %vm457_vm1, %v496_v6  ;;  %v1472_v47 = vld [vmem:[#allocation10 + $0xb8] sm:$0xff]  ;;  %v1463_v50 = vld [vmem:[#allocation10 + $0x70] sm:$0xff]  ;;  %v1453_v5 = vld [vmem:[#allocation10 + $0x20] sm:$0xff] }
  0x38   : > { %665 = vmatpush.bf16.msrb.mxu0 %v463_v4  ;;  %737 = vmatpush.bf16.msrb.mxu1 %v1448_v9  ;;  %v1567_v49 = vld [vmem:[#allocation7] ss:$0 sm:$0xff]  ;;  %v1471_v51 = vld [vmem:[#allocation10 + $0xb0] sm:$0xff]  ;;  %v803_v62 = vld [vmem:[#allocation9 + $0x2] sm:$0x3] }
  0x39   : > { %582 = vmatpush.bf16.msra.mxu2 %v1437_v14  ;;  %643 = vmatpush.bf16.msra.mxu3 %v1429_v15  ;;  %v1456_v60 = vld [vmem:[#allocation10 + $0x38] sm:$0xff]  ;;  %v1455_v1 = vld [vmem:[#allocation10 + $0x30] sm:$0xff]  ;;  %v1458_v7 = vld [vmem:[#allocation10 + $0x48] sm:$0xff] }
  0x3a   : > { %v763_v63 = vld [vmem:[#allocation9] sm:$0x3]  ;;  %v1459_v2 = vld [vmem:[#allocation10 + $0x50] sm:$0xff]  ;;  %v961_v4 = vld [vmem:[#allocation9 + $0x4] sm:$0x3] }
  0x3b   : > { %v1460_v0 = vld [vmem:[#allocation10 + $0x58] sm:$0xff]  ;;  %v1451_v8 = vld [vmem:[#allocation10 + $0x10] sm:$0xff]  ;;  %v1469_v9 = vld [vmem:[#allocation10 + $0xa0] sm:$0xff] }
  0x3c   : > { %738 = vmatpush.bf16.msrb.mxu1 %v1447_v10  ;;  %v1452_v6 = vld [vmem:[#allocation10 + $0x18] sm:$0xff]  ;;  %v1457_v10 = vld [vmem:[#allocation10 + $0x40] sm:$0xff]  ;;  %v1450_v11 = vld [vmem:[#allocation10 + $0x8] sm:$0xff] }
  0x3d   : > { %583 = vmatpush.bf16.msra.mxu2 %v1436_v16  ;;  %644 = vmatpush.bf16.msra.mxu3 %v1428_v17  ;;  %v1468_v12 = vld [vmem:[#allocation10 + $0x98] sm:$0xff]  ;;  %v1467_v14 = vld [vmem:[#allocation10 + $0x90] sm:$0xff]  ;;  %v1466_v15 = vld [vmem:[#allocation10 + $0x88] sm:$0xff] }
  0x3e   : > { %v1465_v16 = vld [vmem:[#allocation10 + $0x80] sm:$0xff] }
  0x40   : > { %739 = vmatpush.bf16.msrb.mxu1 %v1446_v13  ;;  %v1449_v13 = vld [vmem:[#allocation10] sm:$0xff] }
  0x41   : > { %584 = vmatpush.bf16.msra.mxu2 %v1435_v19  ;;  %645 = vmatpush.bf16.msra.mxu3 %v1427_v20 }
  0x44   : > { %740 = vmatpush.bf16.msrb.mxu1 %v1445_v25 }
  0x45   : > { %585 = vmatpush.bf16.msra.mxu2 %v1434_v21  ;;  %646 = vmatpush.bf16.msra.mxu3 %v1426_v22 }
  0x47   : > { %1291 = vmatmul.msk.bf16.vlgmr.msrb.gmra.mxu0 %vm457_vm1, %v654_v18 }
  0x48   : > { %741 = vmatpush.bf16.msrb.mxu1 %v1444_v26 }
  0x49   : > { %586 = vmatpush.bf16.msra.mxu2 %v1433_v23  ;;  %647 = vmatpush.bf16.msra.mxu3 %v1425_v24 }
  0x4c   : > { %742 = vmatpush.bf16.msrb.mxu1 %v1443_v27 }
  0x4d   : > { %886 = vmatpush.bf16.msrb.mxu3 %v1464_v45  ;;  %1044 = vmatpush.bf16.msrb.mxu2 %v1472_v47 }
  0x50   : > { %743 = vmatpush.bf16.msrb.mxu1 %v1442_v28 }
  0x51   : > { %887 = vmatpush.bf16.msrb.mxu3 %v1463_v50  ;;  %1045 = vmatpush.bf16.msrb.mxu2 %v1471_v51 }
  0x54   : > { %744 = vmatpush.bf16.msrb.mxu1 %v1441_v29 }
  0x55   : > { %888 = vmatpush.bf16.msrb.mxu3 %v1462_v54  ;;  %1046 = vmatpush.bf16.msrb.mxu2 %v1470_v55 }
  0x59   : > { %889 = vmatpush.bf16.msrb.mxu3 %v1461_v59  ;;  %1047 = vmatpush.bf16.msrb.mxu2 %v1469_v9 }
  0x5d   : > { %890 = vmatpush.bf16.msrb.mxu3 %v1460_v0  ;;  %1048 = vmatpush.bf16.msrb.mxu2 %v1468_v12 }
  0x61   : > { %891 = vmatpush.bf16.msrb.mxu3 %v1459_v2  ;;  %1049 = vmatpush.bf16.msrb.mxu2 %v1467_v14 }
  0x65   : > { %892 = vmatpush.bf16.msrb.mxu3 %v1458_v7  ;;  %1050 = vmatpush.bf16.msrb.mxu2 %v1466_v15 }
  0x69   : > { %893 = vmatpush.bf16.msrb.mxu3 %v1457_v10  ;;  %1051 = vmatpush.bf16.msrb.mxu2 %v1465_v16 }
  0xb4   : > { %v474_v30 = vpop.f32.mrf.mxu0  ;;  %v509_v31 = vpop.f32.mrf.mxu1 }
  0xb5   : > { %v478_v32 = vpack.c.bf16 %v474_v30, %v474_v30  ;;  %v513_v33 = vpack.c.bf16 %v509_v31, %v509_v31  ;;  %v1568_v31 = vld [vmem:[#allocation12] ss:$0 sm:$0xff] }
  0xb7   : > { %587 = vmatmul.bf16.vlgmr.msra.gmra.mxu2 %v513_v33  ;;  %648 = vmatmul.bf16.vlgmr.msra.gmra.mxu3 %v478_v32 }
  0xbc   : > { %v476_v34 = vpop.f32.mrf.mxu0  ;;  %v511_v35 = vpop.f32.mrf.mxu1 }
  0xbd   : > { %v1569_v34 = vld [vmem:[#allocation13] ss:$0 sm:$0xff] }
  0xc4   : > { %v667_v36 = vpop.f32.mrf.mxu0 }
  0xc5   : > { %v671_v37 = vpack.c.bf16 %v667_v36, %v667_v36 }
  0xc7   : > { %745 = vmatmul.bf16.vlgmr.msrb.gmra.mxu1 %v671_v37 }
  0xcc   : > { %v669_v38 = vpop.f32.mrf.mxu0 }
 0x13a   : > { %v588_v39 = vpop.f32.mrf.mxu2  ;;  %v649_v40 = vpop.f32.mrf.mxu3 }
 0x13b   : > { %v650_v43 = vadd.f32 %v649_v40, %v588_v39 }
 0x142   : > { %v590_v41 = vpop.f32.mrf.mxu2  ;;  %v651_v42 = vpop.f32.mrf.mxu3 }
 0x144   : > { %v746_v46 = vpop.f32.mrf.mxu1 }
 0x145   : > { %v750_v48 = vadd.f32 %v746_v46, %v650_v43 }
 0x147   : > { %v755_v52 = vmul.f32 %v1566_v44, %v750_v48 }
 0x149   : > { %v760_v53 = vadd.f32 %v1567_v49, %v755_v52 }
 0x14b   : > { %v761_v56 = vmax.f32 %v760_v53, 0.0 }
 0x14c   : > { %v748_v57 = vpop.f32.mrf.mxu1 }
 0x14d   : > { %v762_v58 = vpack.c.bf16 %v761_v56, %v761_v56 }
 0x14f   : > { %v770_v61 = vsel %vm768_vm2, %v762_v58, 0 }
 0x150   : > { %779 = vmatpush.bf16.msra.mxu0 %v770_v61  ;;  %814 = vmatpush.bf16.msra.mxu1 %v770_v61 }
 0x153   : > { %1325 = vmatmul.msk.bf16.vlgmr.msra.gmra.mxu1 %vm764_vm3, %v803_v62  ;;  %1324 = vmatmul.msk.bf16.vlgmr.msra.gmra.mxu0 %vm764_vm3, %v763_v63 }
 0x154   : > { %972 = vmatpush.bf16.msrb.mxu1 %v770_v61  ;;  %947 = vmatpush.bf16.msrb.mxu0 %v1456_v60 }
 0x158   : > { %948 = vmatpush.bf16.msrb.mxu0 %v1455_v1 }
 0x15c   : > { %949 = vmatpush.bf16.msrb.mxu0 %v1454_v3 }
 0x160   : > { %950 = vmatpush.bf16.msrb.mxu0 %v1453_v5 }
 0x163   : > { %1390 = vmatmul.msk.bf16.vlgmr.msrb.gmra.mxu1 %vm764_vm3, %v961_v4 }
 0x164   : > { %951 = vmatpush.bf16.msrb.mxu0 %v1452_v6 }
 0x168   : > { %952 = vmatpush.bf16.msrb.mxu0 %v1451_v8 }
 0x16c   : > { %953 = vmatpush.bf16.msrb.mxu0 %v1450_v11 }
 0x170   : > { %954 = vmatpush.bf16.msrb.mxu0 %v1449_v13 }
 0x1d0   : > { %v816_v17 = vpop.f32.mrf.mxu1  ;;  %v781_v18 = vpop.f32.mrf.mxu0 }
 0x1d1   : > { %v820_v19 = vpack.c.bf16 %v816_v17, %v816_v17  ;;  %v785_v20 = vpack.c.bf16 %v781_v18, %v781_v18 }
 0x1d3   : > { %894 = vmatmul.bf16.vlgmr.msrb.gmra.mxu3 %v820_v19  ;;  %955 = vmatmul.bf16.vlgmr.msrb.gmra.mxu0 %v785_v20 }
 0x1d8   : > { %v818_v21 = vpop.f32.mrf.mxu1  ;;  %v783_v22 = vpop.f32.mrf.mxu0 }
 0x1e0   : > { %v974_v23 = vpop.f32.mrf.mxu1 }
 0x1e1   : > { %v978_v24 = vpack.c.bf16 %v974_v23, %v974_v23 }
 0x1e3   : > { %1052 = vmatmul.bf16.vlgmr.msrb.gmra.mxu2 %v978_v24 }
 0x1e8   : > { %v976_v25 = vpop.f32.mrf.mxu1 }
 0x250   : > { %v956_v26 = vpop.f32.mrf.mxu0 }
 0x256   : > { %v895_v27 = vpop.f32.mrf.mxu3 }
 0x257   : > { %v957_v30 = vadd.f32 %v956_v26, %v895_v27 }
 0x258   : > { %v958_v28 = vpop.f32.mrf.mxu0 }
 0x25e   : > { %v897_v29 = vpop.f32.mrf.mxu3 }
 0x266   : > { %v1053_v32 = vpop.f32.mrf.mxu2 }
 0x267   : > { %v1057_v33 = vadd.f32 %v1053_v32, %v957_v30 }
 0x269   : > { %v1062_v35 = vmul.f32 %v1568_v31, %v1057_v33 }
 0x26b   : > { %v1067_v36 = vadd.f32 %v1569_v34, %v1062_v35 }
 0x26d   : > { %v1068_v37 = vmax.f32 %v1067_v36, 0.0 }
 0x26e   : > { %v1055_v38 = vpop.f32.mrf.mxu2 }
 0x26f   : > { %1069 = vst [vmem:[%s452_s26] sm:$0xf] %v1068_v37 }
 0x270 PF: > { %s24_s30 = sadd.s32 1, %s1836_s30  }
 0x271   : > { %p21_p7 = scmp.ge.s32.totalorder %s24_s30, 4  }
 0x273   :  { %23 = sbr.rel (!%p21_p7) target bundleno = 5 (0x5), region = 127 }
 0x278   :  { %1089 = vsyncpa [#allocation3], 1 }
 0x279   :  { %1091 = vsyncpa [#allocation3 + $0x1], 1 }
 0x27a   :  { %1092 = vsyncpa [#allocation5], 1 }
 0x27b   :  { %1093 = vsyncpa [#allocation8], 1 }
 0x27c   :  { %1094 = vsyncpa [#allocation11], 1 }
 0x27d   :  { %1095 = vsyncpa [#allocation14], 1 }

// kernel: _lambda_.9
= control target key start
LH: loop header
LB: loop body
LE: loop exit
PB: predicated region body
PF: predicated region fallthrough
CT: control target
= control target key end

     0   :  { %s2878_s0 = inlined_call_operand.vmem [shape: f32[2,2,128], index: 0, kind: input, shape index: {}]   ;;  %s2879_s1 = inlined_call_operand.vmem [shape: f32[2,4,128], index: 1, kind: input, shape index: {}]   ;;  %s2880_s2 = inlined_call_operand.hbm [shape: bf16[3,4,2], index: 2, kind: input, shape index: {}]   ;;  %s2881_s3 = inlined_call_operand.hbm [shape: bf16[3,128,128], index: 3, kind: input, shape index: {}]   ;;  %s2882_s4 = inlined_call_operand.hbm [shape: f32[1,128], index: 4, kind: input, shape index: {}]   ;;  %s2883_s5 = inlined_call_operand.hbm [shape: f32[1,128], index: 5, kind: input, shape index: {}]   ;;  %s2884_s6 = inlined_call_operand.hbm [shape: bf16[3,4,4], index: 6, kind: input, shape index: {}, may-alias: {6,10}]   ;;  %s2885_s7 = inlined_call_operand.hbm [shape: bf16[3,128,128], index: 7, kind: input, shape index: {}]   ;;  %s2886_s8 = inlined_call_operand.hbm [shape: f32[1,128], index: 8, kind: input, shape index: {}]   ;;  %s2887_s9 = inlined_call_operand.hbm [shape: f32[1,128], index: 9, kind: input, shape index: {}]   ;;  %s2888_s10 = inlined_call_operand.hbm [shape: bf16[3,4,4], index: 10, kind: input, shape index: {}, may-alias: {6,10}]   ;;  %s2889_s11 = inlined_call_operand.hbm [shape: bf16[3,128,128], index: 11, kind: input, shape index: {}]   ;;  %s2890_s12 = inlined_call_operand.vmem [shape: f32[1,128], index: 12, kind: input, shape index: {}]   ;;  %s2891_s13 = inlined_call_operand.hbm [shape: f32[1,128], index: 13, kind: input, shape index: {}]   ;;  %s2892_s14 = inlined_call_operand.vmem [shape: f32[2,4,128], index: 14, kind: output, shape index: {}]  }
   0x1   :  { %2894 = sst [smem:[#allocation26_spill]] %s2881_s3 }
   0x2   :  { %2895 = sst [smem:[#allocation27_spill]] %s2883_s5 }
   0x3   :  { %2896 = sst [smem:[#allocation28_spill]] %s2885_s7 }
   0x4   :  { %19 = vsyncpa [#allocation3], 0 }
   0x5   :  { %20 = vsyncpa [#allocation5], 0 }
   0x6   :  { %21 = vsyncpa [#allocation8], 0 }
   0x7   :  { %22 = vsyncpa [#allocation11], 0 }
   0x8   :  { %23 = vsyncpa [#allocation14], 0 }
   0x9   :  { %24 = vsyncpa [#allocation17], 0  ;;  %s2729_s29 = smov 0  }
   0xa LB: > { %2897 = sst [smem:[#allocation25_spill]] %s2637_s29  ;;  %s2738_s17 = sadd.s32 4294967295, %s2637_s29   ;;  %s2637_s29 = sphi %s2729_s29, %s30_s29  }
   0xb   : > { %s2898_s3 = sld [smem:[#allocation26_spill]]  ;;  %p1749_p0 = scmp.ge.s32.totalorder %s2637_s29, 1 }
   0xc   : > { %p365_p1 = scmp.lt.s32.totalorder %s2637_s29, 3  ;;  %p2226_p2 = scmp.eq.s32.totalorder %s2738_s17, 0 }
   0xd   : > { %s2639_s19 = smov [#allocation4]   ;;  %s2900_s5 = sld [smem:[#allocation27_spill]] }
   0xe   : > { %p2743_p3 = pnand %p1749_p0, %p365_p1  ;;  %s392_s20 = sshll.u32 %s2639_s19, 4  ;;  %s393_s20 = int_to_ptr.vmem [resolvable:$true] %s392_s20 }
   0xf   : > { %s2640_s25 = smov [#allocation7]   ;;  %s2902_s7 = sld [smem:[#allocation28_spill]] }
  0x10   : > { %p2192_p4 = pneg %p2743_p3  ;;  %s419_s26 = sshll.u32 %s2640_s25, 4  ;;  %s420_s26 = int_to_ptr.vmem [resolvable:$true] %s419_s26 }
  0x11   : > { %s390_s16 = sshll.u32 %s2898_s3, 4  ;;  %s2641_s15 = smov 64   ;;  %s391_s16 = int_to_ptr.hbm [resolvable:$true] %s390_s16 }
  0x12   : > { %p2754_p5 = pnand %p2226_p2, %p2192_p4  ;;  %s2642_s19 = smov 4  }
  0x13   : > { %s417_s23 = sshll.u32 %s2900_s5, 4  ;;  %s2643_s21 = smov [#allocation10]   ;;  %s418_s23 = int_to_ptr.hbm [resolvable:$true] %s417_s23 }
  0x14   : > { %2198 = dma.hbm_to_vmem [thread:$0]  (!%p2754_p5), %s391_s16, 3072, %s393_s20, [#allocation5], %s2641_s15, %s2641_s15, %s2642_s19  }
  0x15   : > { %s442_s30 = sshll.u32 %s2902_s7, 4  ;;  %s444_s22 = sshll.u32 %s2643_s21, 4  ;;  %s443_s30 = int_to_ptr.hbm [resolvable:$true] %s442_s30  ;;  %s445_s22 = int_to_ptr.vmem [resolvable:$true] %s444_s22 }
  0x16   : > { %2204 = dma.hbm_to_vmem [thread:$0]  (!%p2754_p5), %s418_s23, 16, %s420_s26, [#allocation8]  }
  0x17   : > { %s469_s25 = sshll.u32 %s2887_s9, 4  ;;  %s494_s7 = sshll.u32 %s2889_s11, 4  ;;  %s470_s25 = int_to_ptr.hbm [resolvable:$true] %s469_s25  ;;  %s495_s7 = int_to_ptr.hbm [resolvable:$true] %s494_s7 }
  0x18   : > { %2210 = dma.hbm_to_vmem [thread:$0]  (!%p2754_p5), %s443_s30, 3072, %s445_s22, [#allocation11], %s2641_s15, %s2641_s15, %s2642_s19  }
  0x19   : > { %s2644_s29 = smov [#allocation13]   ;;  %s2645_s20 = smov [#allocation16]  }
  0x1a   : > { %s471_s16 = sshll.u32 %s2644_s29, 4  ;;  %s496_s23 = sshll.u32 %s2645_s20, 4  ;;  %s472_s16 = int_to_ptr.vmem [resolvable:$true] %s471_s16  ;;  %s497_s23 = int_to_ptr.vmem [resolvable:$true] %s496_s23 }
  0x1b   : > { %2216 = dma.hbm_to_vmem [thread:$0]  (!%p2754_p5), %s470_s25, 16, %s472_s16, [#allocation14]  }
  0x1c   : > { %s376_s26 = sshll.u32 %s2880_s2, 4  ;;  %s2646_s30 = smov [#allocation2]   ;;  %s377_s26 = int_to_ptr.hbm [resolvable:$true] %s376_s26 }
  0x1d   : > { %2222 = dma.hbm_to_vmem [thread:$0]  (!%p2754_p5), %s495_s7, 3072, %s497_s23, [#allocation17], %s2641_s15, %s2641_s15, %s2642_s19  }
  0x1e   : > { %s378_s21 = sshll.u32 %s2646_s30, 4  ;;  %s405_s27 = sshll.u32 %s2882_s4, 4  ;;  %s379_s21 = int_to_ptr.vmem [resolvable:$true] %s378_s21  ;;  %s406_s27 = int_to_ptr.hbm [resolvable:$true] %s405_s27 }
  0x1f   : > { %s2647_s25 = smov 32   ;;  %s2648_s28 = smov 2  }
  0x20   : > { %2195 = dma.hbm_to_vmem [thread:$0]  (!%p2754_p5), %s377_s26, 96, %s379_s21, [#allocation3], %s2647_s25, %s2647_s25, %s2648_s28  }
  0x21   : > { %s2649_s16 = smov [#allocation6]   ;;  %s428_s15 = sshll.u32 %s2884_s6, 4  ;;  %s429_s15 = int_to_ptr.hbm [resolvable:$true] %s428_s15 }
  0x22   : > { %s407_s20 = sshll.u32 %s2649_s16, 4  ;;  %s457_s5 = sshll.u32 %s2886_s8, 4  ;;  %s408_s20 = int_to_ptr.vmem [resolvable:$true] %s407_s20  ;;  %s458_s5 = int_to_ptr.hbm [resolvable:$true] %s457_s5 }
  0x23   : > { %2201 = dma.hbm_to_vmem [thread:$0]  (!%p2754_p5), %s406_s27, 16, %s408_s20, [#allocation5]  }
  0x24   : > { %s2650_s30 = smov [#allocation9]   ;;  %s2651_s26 = smov [#allocation12]  }
  0x25   : > { %s430_s29 = sshll.u32 %s2650_s30, 4  ;;  %s459_s21 = sshll.u32 %s2651_s26, 4  ;;  %s431_s29 = int_to_ptr.vmem [resolvable:$true] %s430_s29  ;;  %s460_s21 = int_to_ptr.vmem [resolvable:$true] %s459_s21 }
  0x26   : > { %2207 = dma.hbm_to_vmem [thread:$0]  (!%p2754_p5), %s429_s15, 96, %s431_s29, [#allocation8], %s2647_s25, %s2647_s25, %s2648_s28  }
  0x27   : > { %s480_s27 = sshll.u32 %s2888_s10, 4  ;;  %s512_s7 = sshll.u32 %s2891_s13, 4  ;;  %s481_s27 = int_to_ptr.hbm [resolvable:$true] %s480_s27  ;;  %s513_s7 = int_to_ptr.hbm [resolvable:$true] %s512_s7 }
  0x28   : > { %2213 = dma.hbm_to_vmem [thread:$0]  (!%p2754_p5), %s458_s5, 16, %s460_s21, [#allocation11]  }
  0x29   : > { %s2652_s19 = smov [#allocation15]   ;;  %s2653_s15 = smov [#allocation18]  }
  0x2a   : > { %s482_s23 = sshll.u32 %s2652_s19, 4  ;;  %s514_s30 = sshll.u32 %s2653_s15, 4  ;;  %s483_s23 = int_to_ptr.vmem [resolvable:$true] %s482_s23  ;;  %s515_s30 = int_to_ptr.vmem [resolvable:$true] %s514_s30 }
  0x2b   : > { %2219 = dma.hbm_to_vmem [thread:$0]  (!%p2754_p5), %s481_s27, 96, %s483_s23, [#allocation14], %s2647_s25, %s2647_s25, %s2648_s28  }
  0x2c   : > { %2225 = dma.hbm_to_vmem [thread:$0]  (!%p2754_p5), %s513_s7, 16, %s515_s30, [#allocation17]  }
  0x2d   : > { %541 = sbr.rel (%p2743_p3) target bundleno = 917 (0x395), region = 76 }
  0x32   : > { %2612 = dma.done.wait (%p2226_p2), [#allocation3], 96  }
  0x33   : > { %2614 = vsyncadd (%p2226_p2), [#allocation3], 4294967200 }
  0x34   : > { %2616 = dma.done.wait (%p2226_p2), [#allocation5], 3088  }
  0x35   : > { %2618 = vsyncadd (%p2226_p2), [#allocation5], 4294964208 }
  0x36   : > { %2620 = dma.done.wait (%p2226_p2), [#allocation8], 112  }
  0x37   : > { %2622 = vsyncadd (%p2226_p2), [#allocation8], 4294967184 }
  0x38   : > { %2624 = dma.done.wait (%p2226_p2), [#allocation11], 3088  }
  0x39   : > { %2626 = vsyncadd (%p2226_p2), [#allocation11], 4294964208 }
  0x3a   : > { %2628 = dma.done.wait (%p2226_p2), [#allocation14], 112  }
  0x3b   : > { %2630 = vsyncadd (%p2226_p2), [#allocation14], 4294967184 }
  0x3c   : > { %2632 = dma.done.wait (%p2226_p2), [#allocation17], 3088  }
  0x3d   : > { %2634 = vsyncadd (%p2226_p2), [#allocation17], 4294964208  ;;  %p640_p6 = scmp.lt.s32.totalorder %s2738_s17, 1  ;;  %vm660_vm0 = vcmask 1040384   ;;  %v2091_v2 = vld [vmem:[#allocation4 + $0x78] sm:$0xff]  ;;  %vm656_vm1 = vcmask 15360  }
  0x3e   : > { %v2083_v3 = vld [vmem:[#allocation4 + $0x38] sm:$0xff]  ;;  %778 = vmatpush.bf16.msra.mxu2 %v2091_v2  ;;  %v2090_v7 = vld [vmem:[#allocation4 + $0x70] sm:$0xff]  ;;  %v2089_v10 = vld [vmem:[#allocation4 + $0x68] sm:$0xff]  ;;  %vm967_vm2 = vcmask 1041408   ;;  %vm963_vm3 = vcmask 31744  }
  0x3f   : > { %s2905_s17 = smov (!%p640_p6, %s2738_s17), 1  ;;  %v655_v5 = vld [vmem:[#allocation2] sm:$0x3]  ;;  %v695_v6 = vld [vmem:[#allocation2 + $0x2] sm:$0x3]  ;;  %839 = vmatpush.bf16.msra.mxu3 %v2083_v3  ;;  %v2082_v8 = vld [vmem:[#allocation4 + $0x30] sm:$0xff] }
  0x40   : > { %s1774_s18 = sshll.u32 %s2905_s17, 1  ;;  %v2099_v9 = vld [vmem:[#allocation4 + $0xb8] sm:$0xff]  ;;  %v2081_v11 = vld [vmem:[#allocation4 + $0x28] sm:$0xff]  ;;  %v2098_v12 = vld [vmem:[#allocation4 + $0xb0] sm:$0xff]  ;;  %s1775_s5 = sshll.u32 %s2905_s17, 2 }
  0x41   : > { %s643_s28 = scalar_lea.vmem %s2878_s0, %s1774_s18  ;;  %v2097_v13 = vld [vmem:[#allocation4 + $0xa8] sm:$0xff]  ;;  %v2088_v14 = vld [vmem:[#allocation4 + $0x60] sm:$0xff]  ;;  %v2087_v16 = vld [vmem:[#allocation4 + $0x58] sm:$0xff]  ;;  %s647_s21 = scalar_lea.vmem %s2879_s1, %s1775_s5 }
  0x42   : > { %v653_v0 = vld [vmem:[%s643_s28] sm:$0x3]  ;;  %779 = vmatpush.bf16.msra.mxu2 %v2090_v7  ;;  %v2080_v15 = vld [vmem:[#allocation4 + $0x20] sm:$0xff]  ;;  %v853_v18 = vld [vmem:[#allocation2 + $0x4] sm:$0x3]  ;;  %s651_s3 = scalar_lea.vmem %s2892_s14, %s1775_s5 }
  0x43   : > { %v654_v1 = vpack.c.bf16 %v653_v0, %v653_v0  ;;  %840 = vmatpush.bf16.msra.mxu3 %v2082_v8  ;;  %v2079_v17 = vld [vmem:[#allocation4 + $0x18] sm:$0xff]  ;;  %v2086_v19 = vld [vmem:[#allocation4 + $0x50] sm:$0xff]  ;;  %v2085_v21 = vld [vmem:[#allocation4 + $0x48] sm:$0xff] }
  0x44   : > { %v2078_v20 = vld [vmem:[#allocation4 + $0x10] sm:$0xff]  ;;  %v2077_v22 = vld [vmem:[#allocation4 + $0x8] sm:$0xff]  ;;  %v2084_v23 = vld [vmem:[#allocation4 + $0x40] sm:$0xff] }
  0x45   : > { %v662_v4 = vsel %vm660_vm0, %v654_v1, 0  ;;  %v2076_v24 = vld [vmem:[#allocation4] sm:$0xff]  ;;  %v2095_v26 = vld [vmem:[#allocation4 + $0x98] sm:$0xff]  ;;  %v2094_v27 = vld [vmem:[#allocation4 + $0x90] sm:$0xff] }
  0x46   : > { %671 = vmatpush.bf16.msra.mxu0 %v662_v4  ;;  %706 = vmatpush.bf16.msra.mxu1 %v662_v4  ;;  %v2096_v25 = vld [vmem:[#allocation4 + $0xa0] sm:$0xff]  ;;  %v2093_v28 = vld [vmem:[#allocation4 + $0x88] sm:$0xff]  ;;  %v2113_v43 = vld [vmem:[#allocation10 + $0x68] sm:$0xff] }
  0x47   : > { %780 = vmatpush.bf16.msra.mxu2 %v2089_v10  ;;  %841 = vmatpush.bf16.msra.mxu3 %v2081_v11  ;;  %v2092_v29 = vld [vmem:[#allocation4 + $0x80] sm:$0xff]  ;;  %v2112_v44 = vld [vmem:[#allocation10 + $0x60] sm:$0xff]  ;;  %v1160_v0 = vld [vmem:[#allocation9 + $0x4] sm:$0x3] }
  0x48   : > { %v2115_v39 = vld [vmem:[#allocation10 + $0x78] sm:$0xff]  ;;  %v2114_v40 = vld [vmem:[#allocation10 + $0x70] sm:$0xff]  ;;  %v2121_v3 = vld [vmem:[#allocation10 + $0xa8] sm:$0xff] }
  0x49   : > { %1777 = vmatmul.msk.bf16.vlgmr.msra.gmra.mxu0 %vm656_vm1, %v655_v5  ;;  %1778 = vmatmul.msk.bf16.vlgmr.msra.gmra.mxu1 %vm656_vm1, %v695_v6  ;;  %v2271_v48 = vld [vmem:[#allocation6] ss:$0 sm:$0xff]  ;;  %v2272_v51 = vld [vmem:[#allocation7] ss:$0 sm:$0xff]  ;;  %v1002_v62 = vld [vmem:[#allocation9 + $0x2] sm:$0x3] }
  0x4a   : > { %864 = vmatpush.bf16.msrb.mxu0 %v662_v4  ;;  %936 = vmatpush.bf16.msrb.mxu1 %v2099_v9  ;;  %v2111_v52 = vld [vmem:[#allocation10 + $0x58] sm:$0xff]  ;;  %v2110_v55 = vld [vmem:[#allocation10 + $0x50] sm:$0xff]  ;;  %v2105_v4 = vld [vmem:[#allocation10 + $0x28] sm:$0xff] }
  0x4b   : > { %781 = vmatpush.bf16.msra.mxu2 %v2088_v14  ;;  %842 = vmatpush.bf16.msra.mxu3 %v2080_v15  ;;  %v2123_v59 = vld [vmem:[#allocation10 + $0xb8] sm:$0xff]  ;;  %v2122_v1 = vld [vmem:[#allocation10 + $0xb0] sm:$0xff]  ;;  %v2120_v5 = vld [vmem:[#allocation10 + $0xa0] sm:$0xff] }
  0x4c   : > { %v2107_v60 = vld [vmem:[#allocation10 + $0x38] sm:$0xff]  ;;  %v2106_v2 = vld [vmem:[#allocation10 + $0x30] sm:$0xff]  ;;  %v2104_v6 = vld [vmem:[#allocation10 + $0x20] sm:$0xff] }
  0x4d   : > { %v962_v63 = vld [vmem:[#allocation9] sm:$0x3]  ;;  %v2118_v9 = vld [vmem:[#allocation10 + $0x90] sm:$0xff]  ;;  %v2117_v11 = vld [vmem:[#allocation10 + $0x88] sm:$0xff] }
  0x4e   : > { %937 = vmatpush.bf16.msrb.mxu1 %v2098_v12  ;;  %v2119_v7 = vld [vmem:[#allocation10 + $0x98] sm:$0xff]  ;;  %v2102_v10 = vld [vmem:[#allocation10 + $0x10] sm:$0xff]  ;;  %v2101_v12 = vld [vmem:[#allocation10 + $0x8] sm:$0xff] }
  0x4f   : > { %782 = vmatpush.bf16.msra.mxu2 %v2087_v16  ;;  %843 = vmatpush.bf16.msra.mxu3 %v2079_v17  ;;  %v2103_v8 = vld [vmem:[#allocation10 + $0x18] sm:$0xff]  ;;  %v2109_v14 = vld [vmem:[#allocation10 + $0x48] sm:$0xff]  ;;  %v2100_v15 = vld [vmem:[#allocation10] sm:$0xff] }
  0x50   : > { %v2108_v16 = vld [vmem:[#allocation10 + $0x40] sm:$0xff] }
  0x52   : > { %938 = vmatpush.bf16.msrb.mxu1 %v2097_v13  ;;  %v2116_v13 = vld [vmem:[#allocation10 + $0x80] sm:$0xff] }
  0x53   : > { %783 = vmatpush.bf16.msra.mxu2 %v2086_v19  ;;  %844 = vmatpush.bf16.msra.mxu3 %v2078_v20 }
  0x56   : > { %939 = vmatpush.bf16.msrb.mxu1 %v2096_v25 }
  0x57   : > { %784 = vmatpush.bf16.msra.mxu2 %v2085_v21  ;;  %845 = vmatpush.bf16.msra.mxu3 %v2077_v22 }
  0x59   : > { %1843 = vmatmul.msk.bf16.vlgmr.msrb.gmra.mxu0 %vm656_vm1, %v853_v18 }
  0x5a   : > { %940 = vmatpush.bf16.msrb.mxu1 %v2095_v26 }
  0x5b   : > { %785 = vmatpush.bf16.msra.mxu2 %v2084_v23  ;;  %846 = vmatpush.bf16.msra.mxu3 %v2076_v24 }
  0x5e   : > { %941 = vmatpush.bf16.msrb.mxu1 %v2094_v27  ;;  %v2139_v27 = vld [vmem:[#allocation16 + $0x78] sm:$0xff] }
  0x5f   : > { %1085 = vmatpush.bf16.msrb.mxu3 %v2115_v39 }
  0x62   : > { %942 = vmatpush.bf16.msrb.mxu1 %v2093_v28  ;;  %v2138_v28 = vld [vmem:[#allocation16 + $0x70] sm:$0xff] }
  0x63   : > { %1086 = vmatpush.bf16.msrb.mxu3 %v2114_v40  ;;  %v2135_v40 = vld [vmem:[#allocation16 + $0x58] sm:$0xff] }
  0x66   : > { %943 = vmatpush.bf16.msrb.mxu1 %v2092_v29 }
  0x67   : > { %1087 = vmatpush.bf16.msrb.mxu3 %v2113_v43  ;;  %v1268_v43 = vld [vmem:[%s647_s21] sm:$0xf] }
  0x6b   : > { %1088 = vmatpush.bf16.msrb.mxu3 %v2112_v44 }
  0x6f   : > { %1089 = vmatpush.bf16.msrb.mxu3 %v2111_v52  ;;  %v1271_v52 = vld [vmem:[#allocation15] sm:$0x3] }
  0x73   : > { %1090 = vmatpush.bf16.msrb.mxu3 %v2110_v55  ;;  %v2130_v55 = vld [vmem:[#allocation16 + $0x30] sm:$0xff] }
  0x77   : > { %1091 = vmatpush.bf16.msrb.mxu3 %v2109_v14 }
  0x7b   : > { %1092 = vmatpush.bf16.msrb.mxu3 %v2108_v16 }
  0xc6   : > { %v673_v30 = vpop.f32.mrf.mxu0  ;;  %v708_v31 = vpop.f32.mrf.mxu1 }
  0xc7   : > { %v677_v32 = vpack.c.bf16 %v673_v30, %v673_v30  ;;  %v712_v33 = vpack.c.bf16 %v708_v31, %v708_v31  ;;  %v2137_v31 = vld [vmem:[#allocation16 + $0x68] sm:$0xff] }
  0xc9   : > { %786 = vmatmul.bf16.vlgmr.msra.gmra.mxu2 %v712_v33  ;;  %847 = vmatmul.bf16.vlgmr.msra.gmra.mxu3 %v677_v32 }
  0xce   : > { %v675_v34 = vpop.f32.mrf.mxu0  ;;  %v710_v35 = vpop.f32.mrf.mxu1 }
  0xcf   : > { %v2273_v34 = vld [vmem:[#allocation12] ss:$0 sm:$0xff]  ;;  %v2136_v35 = vld [vmem:[#allocation16 + $0x60] sm:$0xff] }
  0xd6   : > { %v866_v36 = vpop.f32.mrf.mxu0 }
  0xd7   : > { %v870_v37 = vpack.c.bf16 %v866_v36, %v866_v36 }
  0xd9   : > { %944 = vmatmul.bf16.vlgmr.msrb.gmra.mxu1 %v870_v37  ;;  %v2274_v37 = vld [vmem:[#allocation13] ss:$0 sm:$0xff] }
  0xde   : > { %v868_v38 = vpop.f32.mrf.mxu0 }
 0x14c   : > { %v787_v41 = vpop.f32.mrf.mxu2  ;;  %v848_v42 = vpop.f32.mrf.mxu3 }
 0x14d   : > { %v849_v47 = vadd.f32 %v848_v42, %v787_v41 }
 0x154   : > { %v789_v45 = vpop.f32.mrf.mxu2  ;;  %v850_v46 = vpop.f32.mrf.mxu3 }
 0x155   : > { %v2134_v45 = vld [vmem:[#allocation16 + $0x50] sm:$0xff] }
 0x156   : > { %v945_v49 = vpop.f32.mrf.mxu1 }
 0x157   : > { %v949_v50 = vadd.f32 %v945_v49, %v849_v47  ;;  %v2131_v49 = vld [vmem:[#allocation16 + $0x38] sm:$0xff] }
 0x159   : > { %v954_v53 = vmul.f32 %v2271_v48, %v949_v50  ;;  %v2147_v48 = vld [vmem:[#allocation16 + $0xb8] sm:$0xff] }
 0x15b   : > { %v959_v54 = vadd.f32 %v2272_v51, %v954_v53  ;;  %v1309_v51 = vld [vmem:[#allocation15 + $0x2] sm:$0x3]  ;;  %v1467_v53 = vld [vmem:[#allocation15 + $0x4] sm:$0x3] }
 0x15d   : > { %v960_v56 = vmax.f32 %v959_v54, 0.0  ;;  %v2146_v54 = vld [vmem:[#allocation16 + $0xb0] sm:$0xff] }
 0x15e   : > { %v947_v57 = vpop.f32.mrf.mxu1 }
 0x15f   : > { %v961_v58 = vpack.c.bf16 %v960_v56, %v960_v56  ;;  %v2145_v56 = vld [vmem:[#allocation16 + $0xa8] sm:$0xff] }
 0x160   : > { %v2129_v57 = vld [vmem:[#allocation16 + $0x28] sm:$0xff] }
 0x161   : > { %v969_v61 = vsel %vm967_vm2, %v961_v58, 0  ;;  %v2144_v58 = vld [vmem:[#allocation16 + $0xa0] sm:$0xff] }
 0x162   : > { %978 = vmatpush.bf16.msra.mxu0 %v969_v61  ;;  %1013 = vmatpush.bf16.msrb.mxu2 %v969_v61 }
 0x163   : > { %1171 = vmatpush.bf16.msra.mxu1 %v969_v61  ;;  %v2127_v61 = vld [vmem:[#allocation16 + $0x18] sm:$0xff] }
 0x165   : > { %1877 = vmatmul.msk.bf16.vlgmr.msrb.gmra.mxu2 %vm963_vm3, %v1002_v62  ;;  %1876 = vmatmul.msk.bf16.vlgmr.msra.gmra.mxu0 %vm963_vm3, %v962_v63  ;;  %v2142_v62 = vld [vmem:[#allocation16 + $0x90] sm:$0xff] }
 0x166   : > { %1243 = vmatpush.bf16.msra.mxu2 %v2123_v59  ;;  %1146 = vmatpush.bf16.msrb.mxu0 %v2107_v60  ;;  %v2128_v59 = vld [vmem:[#allocation16 + $0x20] sm:$0xff]  ;;  %v2143_v60 = vld [vmem:[#allocation16 + $0x98] sm:$0xff]  ;;  %v2126_v63 = vld [vmem:[#allocation16 + $0x10] sm:$0xff] }
 0x167   : > { %1942 = vmatmul.msk.bf16.vlgmr.msra.gmra.mxu1 %vm963_vm3, %v1160_v0  ;;  %v2141_v0 = vld [vmem:[#allocation16 + $0x88] sm:$0xff] }
 0x16a   : > { %1244 = vmatpush.bf16.msra.mxu2 %v2122_v1  ;;  %1147 = vmatpush.bf16.msrb.mxu0 %v2106_v2  ;;  %v2125_v1 = vld [vmem:[#allocation16 + $0x8] sm:$0xff] }
 0x16b   : > { %v2133_v2 = vld [vmem:[#allocation16 + $0x48] sm:$0xff] }
 0x16e   : > { %1245 = vmatpush.bf16.msra.mxu2 %v2121_v3  ;;  %1148 = vmatpush.bf16.msrb.mxu0 %v2105_v4  ;;  %v2124_v3 = vld [vmem:[#allocation16] sm:$0xff] }
 0x16f   : > { %v2140_v4 = vld [vmem:[#allocation16 + $0x80] sm:$0xff] }
 0x172   : > { %1246 = vmatpush.bf16.msra.mxu2 %v2120_v5  ;;  %1149 = vmatpush.bf16.msrb.mxu0 %v2104_v6  ;;  %v2132_v5 = vld [vmem:[#allocation16 + $0x40] sm:$0xff] }
 0x176   : > { %1247 = vmatpush.bf16.msra.mxu2 %v2119_v7  ;;  %1150 = vmatpush.bf16.msrb.mxu0 %v2103_v8 }
 0x17a   : > { %1248 = vmatpush.bf16.msra.mxu2 %v2118_v9  ;;  %1151 = vmatpush.bf16.msrb.mxu0 %v2102_v10 }
 0x17e   : > { %1249 = vmatpush.bf16.msra.mxu2 %v2117_v11  ;;  %1152 = vmatpush.bf16.msrb.mxu0 %v2101_v12 }
 0x182   : > { %1250 = vmatpush.bf16.msra.mxu2 %v2116_v13  ;;  %1153 = vmatpush.bf16.msrb.mxu0 %v2100_v15 }
 0x186   : > { %1392 = vmatpush.bf16.msra.mxu0 %v2139_v27 }
 0x18a   : > { %1393 = vmatpush.bf16.msra.mxu0 %v2138_v28 }
 0x18e   : > { %1394 = vmatpush.bf16.msra.mxu0 %v2137_v31 }
 0x192   : > { %1395 = vmatpush.bf16.msra.mxu0 %v2136_v35 }
 0x196   : > { %1396 = vmatpush.bf16.msra.mxu0 %v2135_v40 }
 0x19a   : > { %1397 = vmatpush.bf16.msra.mxu0 %v2134_v45 }
 0x19e   : > { %1398 = vmatpush.bf16.msra.mxu0 %v2133_v2 }
 0x1a2   : > { %1399 = vmatpush.bf16.msra.mxu0 %v2132_v5 }
 0x1e2   : > { %v980_v17 = vpop.f32.mrf.mxu0 }
 0x1e3   : > { %v984_v19 = vpack.c.bf16 %v980_v17, %v980_v17 }
 0x1e4   : > { %v1173_v18 = vpop.f32.mrf.mxu1 }
 0x1e5   : > { %v1177_v20 = vpack.c.bf16 %v1173_v18, %v1173_v18  ;;  %1154 = vmatmul.bf16.vlgmr.msrb.gmra.mxu0 %v984_v19  ;;  %v2275_v19 = vld [vmem:[%s2890_s12] ss:$0 sm:$0xff] }
 0x1e7   : > { %1251 = vmatmul.bf16.vlgmr.msra.gmra.mxu2 %v1177_v20 }
 0x1e8   : > { %v1015_v21 = vpop.f32.mrf.mxu2 }
 0x1e9   : > { %v1019_v22 = vpack.c.bf16 %v1015_v21, %v1015_v21 }
 0x1ea   : > { %v982_v23 = vpop.f32.mrf.mxu0 }
 0x1eb   : > { %1093 = vmatmul.bf16.vlgmr.msrb.gmra.mxu3 %v1019_v22  ;;  %v2276_v22 = vld [vmem:[#allocation18] ss:$0 sm:$0xff] }
 0x1ec   : > { %v1175_v24 = vpop.f32.mrf.mxu1 }
 0x1f0   : > { %v1017_v25 = vpop.f32.mrf.mxu2 }
 0x262   : > { %v1155_v26 = vpop.f32.mrf.mxu0 }
 0x26a   : > { %v1252_v29 = vpop.f32.mrf.mxu2  ;;  %v1157_v30 = vpop.f32.mrf.mxu0 }
 0x26e   : > { %v1094_v32 = vpop.f32.mrf.mxu3 }
 0x26f   : > { %v1156_v33 = vadd.f32 %v1155_v26, %v1094_v32 }
 0x271   : > { %v1256_v36 = vadd.f32 %v1252_v29, %v1156_v33 }
 0x272   : > { %v1254_v38 = vpop.f32.mrf.mxu2 }
 0x273   : > { %v1261_v39 = vmul.f32 %v2273_v34, %v1256_v36 }
 0x275   : > { %v1266_v41 = vadd.f32 %v2274_v37, %v1261_v39 }
 0x276   : > { %v1096_v42 = vpop.f32.mrf.mxu3 }
 0x277   : > { %v1267_v44 = vmax.f32 %v1266_v41, 0.0 }
 0x279   : > { %v1269_v46 = vadd.f32 %v1268_v43, %v1267_v44 }
 0x27b   : > { %v1270_v47 = vpack.c.bf16 %v1269_v46, %v1269_v46 }
 0x27d   : > { %v1276_v50 = vsel %vm967_vm2, %v1270_v47, 0 }
 0x27e   : > { %1285 = vmatpush.bf16.msrb.mxu1 %v1276_v50  ;;  %1320 = vmatpush.bf16.msra.mxu3 %v1276_v50 }
 0x27f   : > { %1478 = vmatpush.bf16.msrb.mxu2 %v1276_v50 }
 0x281   : > { %1976 = vmatmul.msk.bf16.vlgmr.msra.gmra.mxu3 %vm963_vm3, %v1309_v51  ;;  %1975 = vmatmul.msk.bf16.vlgmr.msrb.gmra.mxu1 %vm963_vm3, %v1271_v52 }
 0x282   : > { %1550 = vmatpush.bf16.msrb.mxu3 %v2147_v48  ;;  %1453 = vmatpush.bf16.msra.mxu1 %v2131_v49 }
 0x283   : > { %2041 = vmatmul.msk.bf16.vlgmr.msrb.gmra.mxu2 %vm963_vm3, %v1467_v53 }
 0x286   : > { %1551 = vmatpush.bf16.msrb.mxu3 %v2146_v54  ;;  %1454 = vmatpush.bf16.msra.mxu1 %v2130_v55 }
 0x28a   : > { %1552 = vmatpush.bf16.msrb.mxu3 %v2145_v56  ;;  %1455 = vmatpush.bf16.msra.mxu1 %v2129_v57 }
 0x28e   : > { %1553 = vmatpush.bf16.msrb.mxu3 %v2144_v58  ;;  %1456 = vmatpush.bf16.msra.mxu1 %v2128_v59 }
 0x292   : > { %1554 = vmatpush.bf16.msrb.mxu3 %v2143_v60  ;;  %1457 = vmatpush.bf16.msra.mxu1 %v2127_v61 }
 0x296   : > { %1555 = vmatpush.bf16.msrb.mxu3 %v2142_v62  ;;  %1458 = vmatpush.bf16.msra.mxu1 %v2126_v63 }
 0x29a   : > { %1556 = vmatpush.bf16.msrb.mxu3 %v2141_v0  ;;  %1459 = vmatpush.bf16.msra.mxu1 %v2125_v1 }
 0x29e   : > { %1460 = vmatpush.bf16.msra.mxu1 %v2124_v3  ;;  %1557 = vmatpush.bf16.msrb.mxu3 %v2140_v4 }
 0x2fe   : > { %v1287_v6 = vpop.f32.mrf.mxu1 }
 0x2ff   : > { %v1291_v7 = vpack.c.bf16 %v1287_v6, %v1287_v6 }
 0x301   : > { %1461 = vmatmul.bf16.vlgmr.msra.gmra.mxu1 %v1291_v7 }
 0x304   : > { %v1322_v8 = vpop.f32.mrf.mxu3 }
 0x305   : > { %v1326_v10 = vpack.c.bf16 %v1322_v8, %v1322_v8 }
 0x306   : > { %v1480_v9 = vpop.f32.mrf.mxu2  ;;  %v1289_v12 = vpop.f32.mrf.mxu1 }
 0x307   : > { %v1484_v11 = vpack.c.bf16 %v1480_v9, %v1480_v9  ;;  %1400 = vmatmul.bf16.vlgmr.msra.gmra.mxu0 %v1326_v10 }
 0x309   : > { %1558 = vmatmul.bf16.vlgmr.msrb.gmra.mxu3 %v1484_v11 }
 0x30c   : > { %v1324_v13 = vpop.f32.mrf.mxu3 }
 0x30e   : > { %v1482_v14 = vpop.f32.mrf.mxu2 }
 0x37e   : > { %v1462_v15 = vpop.f32.mrf.mxu1 }
 0x384   : > { %v1401_v16 = vpop.f32.mrf.mxu0 }
 0x385   : > { %v1463_v18 = vadd.f32 %v1462_v15, %v1401_v16 }
 0x386   : > { %v1464_v17 = vpop.f32.mrf.mxu1 }
 0x38c   : > { %v1559_v20 = vpop.f32.mrf.mxu3  ;;  %v1403_v23 = vpop.f32.mrf.mxu0 }
 0x38d   : > { %v1563_v21 = vadd.f32 %v1559_v20, %v1463_v18 }
 0x38f   : > { %v1568_v24 = vmul.f32 %v2275_v19, %v1563_v21 }
 0x391   : > { %v1573_v25 = vadd.f32 %v2276_v22, %v1568_v24 }
 0x393   : > { %1574 = vst [vmem:[%s651_s3] sm:$0xf] %v1573_v25 }
 0x394   : > { %v1561_v26 = vpop.f32.mrf.mxu3 }
 0x395 PF: > { %s2903_s7 = sld [smem:[#allocation25_spill]] }
 0x39b   : > { %s30_s29 = sadd.s32 1, %s2903_s7  }
 0x39c   : > { %p27_p7 = scmp.ge.s32.totalorder %s30_s29, 4  }
 0x39e   :  { %29 = sbr.rel (!%p27_p7) target bundleno = 10 (0xa), region = 166 }
 0x3a3   :  { %1594 = vsyncpa [#allocation3], 1 }
 0x3a4   :  { %1596 = vsyncpa [#allocation3 + $0x1], 1 }
 0x3a5   :  { %1597 = vsyncpa [#allocation5], 1 }
 0x3a6   :  { %1598 = vsyncpa [#allocation8], 1 }
 0x3a7   :  { %1599 = vsyncpa [#allocation11], 1 }
 0x3a8   :  { %1600 = vsyncpa [#allocation14], 1 }
 0x3a9   :  { %1601 = vsyncpa [#allocation17], 1 }

// kernel: _lambda_.11
= control target key start
LH: loop header
LB: loop body
LE: loop exit
PB: predicated region body
PF: predicated region fallthrough
CT: control target
= control target key end

     0   :  { %s2383_s0 = inlined_call_operand.vmem [shape: f32[2,8,128], index: 0, kind: input, shape index: {}]   ;;  %s2384_s1 = inlined_call_operand.hbm [shape: bf16[3,16,8], index: 1, kind: input, shape index: {}]   ;;  %s2385_s2 = inlined_call_operand.hbm [shape: bf16[3,128,128], index: 2, kind: input, shape index: {}]   ;;  %s2386_s3 = inlined_call_operand.hbm [shape: f32[1,128], index: 3, kind: input, shape index: {}]   ;;  %s2387_s4 = inlined_call_operand.vmem [shape: f32[1,128], index: 4, kind: input, shape index: {}]   ;;  %s2388_s5 = inlined_call_operand.hbm [shape: bf16[3,16,16], index: 5, kind: input, shape index: {}]   ;;  %s2389_s6 = inlined_call_operand.hbm [shape: bf16[3,128,128], index: 6, kind: input, shape index: {}]   ;;  %s2390_s7 = inlined_call_operand.vmem [shape: f32[1,128], index: 7, kind: input, shape index: {}]   ;;  %s2391_s8 = inlined_call_operand.vmem [shape: f32[1,128], index: 8, kind: input, shape index: {}]   ;;  %s2392_s9 = inlined_call_operand.hbm [shape: bf16[128,16], index: 9, kind: input, shape index: {}]   ;;  %s2393_s10 = inlined_call_operand.vmem [shape: f32[1,16], index: 10, kind: input, shape index: {}]   ;;  %s2394_s11 = inlined_call_operand.hbm [shape: f32[2,16,16], index: 11, kind: output, shape index: {}]  }
   0x1   :  { %2399 = sst [smem:[#allocation23_spill]] %s2384_s1 }
   0x2   :  { %2400 = sst [smem:[#allocation24_spill]] %s2385_s2 }
   0x3   :  { %2401 = sst [smem:[#allocation25_spill]] %s2388_s5 }
   0x4   :  { %16 = vsyncpa [#allocation3], 0 }
   0x5   :  { %17 = vsyncpa [#allocation6], 0 }
   0x6   :  { %18 = vsyncpa [#allocation9], 0 }
   0x7   :  { %19 = vsyncpa [#allocation12], 0 }
   0x8   :  { %20 = vsyncpa [#allocation4], 0 }
   0x9   :  { %22 = vsyncpa [#allocation4 + $0x1], 0  ;;  %s2198_s17 = smov 0   ;;  %s2200_s18 = smov 0  }
   0xa   :  { %s2202_s19 = smov 0   ;;  %s2204_s20 = smov 0  }
   0xb LB: > { %2402 = sst [smem:[#allocation19_spill]] %s2122_s19  ;;  %s2219_s21 = sadd.s32 4294967295, %s2126_s20   ;;  %s2126_s20 = sphi %s2204_s20, %s2414_s20   ;;  %s2122_s19 = sphi %s2202_s19, %s2416_s19   ;;  %s2118_s18 = sphi %s2200_s18, %s2418_s18   ;;  %s2114_s17 = sphi %s2198_s17, %s2417_s17  }
   0xc   : > { %s1409_s22 = sadd.s32 4294967294, %s2126_s20   ;;  %s2223_s23 = sadd.s32 1, %s2126_s20  }
   0xd   : > { %2403 = sst [smem:[#allocation20_spill]] %s2223_s23  ;;  %s271_s24 = sadd.s32 1, %s2122_s19 }
   0xe   : > { %s268_s25 = ssub.s32 %s2126_s20, %s2223_s23  ;;  %p281_p0 = scmp.ne.s32.totalorder %s2122_s19, %s2118_s18 }
   0xf   : > { %p269_p1 = scmp.eq.s32.totalorder %s268_s25, 0  ;;  %p282_p2 = scmp.eq.s32.totalorder %s2219_s21, 1 }
  0x10   : > { %p287_p3 = scmp.ne.s32.totalorder %s2118_s18, %s2114_s17  ;;  %p288_p4 = scmp.eq.s32.totalorder %s1409_s22, 1 }
  0x11   : > { %s2234_s26 = scalar_select %p269_p1, %s2122_s19, %s271_s24  }
  0x12   : > { %p2236_p5 = por %p282_p2, %p281_p0  ;;  %p2240_p6 = por %p288_p4, %p287_p3 }
  0x13   : > { %2404 = sst [smem:[#allocation21_spill]] %s2234_s26  ;;  %p1410_p7 = scmp.ge.s32.totalorder %s2126_s20, 1 }
  0x14   : > { %s2406_s28 = scalar_select %p2240_p6, 1, 0 }
  0x15   : > { %p295_p8 = scmp.lt.s32.totalorder %s2126_s20, 3  ;;  %p1800_p9 = scmp.eq.s32.totalorder %s2219_s21, 0 }
  0x16   : > { %2407 = sst [smem:[#allocation22_spill]] %s2406_s28  ;;  %s2128_s24 = smov [#allocation5]  }
  0x17   : > { %p2247_p10 = pnand %p1410_p7, %p295_p8  ;;  %s2409_s2 = sld [smem:[#allocation24_spill]] }
  0x18   : > { %s2410_s5 = sld [smem:[#allocation25_spill]]  ;;  %s322_s25 = sshll.u32 %s2128_s24, 4  ;;  %s323_s25 = int_to_ptr.vmem [resolvable:$true] %s322_s25 }
  0x19   : > { %p1777_p11 = pneg %p2247_p10  ;;  %s2129_s30 = smov 64  }
  0x1a   : > { %s2130_s12 = smov 4   ;;  %s2131_s14 = smov [#allocation8]  }
  0x1b   : > { %p2261_p12 = pnand %p1800_p9, %p1777_p11  ;;  %s351_s15 = sshll.u32 %s2131_s14, 4  ;;  %s352_s15 = int_to_ptr.vmem [resolvable:$true] %s351_s15 }
  0x1c   : > { %s2412_s1 = sld [smem:[#allocation23_spill]]  ;;  %s335_s23 = sshll.u32 %s2386_s3, 4  ;;  %s336_s23 = int_to_ptr.hbm [resolvable:$true] %s335_s23 }
  0x1d   : > { %s320_s13 = sshll.u32 %s2409_s2, 4  ;;  %s2132_s28 = smov [#allocation2]   ;;  %s321_s13 = int_to_ptr.hbm [resolvable:$true] %s320_s13 }
  0x1e   : > { %s349_s16 = sshll.u32 %s2410_s5, 4  ;;  %s2133_s2 = smov [#allocation7]   ;;  %s350_s16 = int_to_ptr.hbm [resolvable:$true] %s349_s16 }
  0x1f   : > { %1783 = dma.hbm_to_vmem [thread:$0]  (!%p2261_p12), %s321_s13, 3072, %s323_s25, [#allocation6], %s2129_s30, %s2129_s30, %s2130_s12  }
  0x20   : > { %1789 = dma.hbm_to_vmem [thread:$0]  (!%p2261_p12), %s350_s16, 384, %s352_s15, [#allocation9], %s2129_s30, %s2129_s30, %s2130_s12  }
  0x21   : > { %s308_s13 = sshll.u32 %s2132_s28, 4  ;;  %s337_s5 = sshll.u32 %s2133_s2, 4  ;;  %s309_s13 = int_to_ptr.vmem [resolvable:$true] %s308_s13  ;;  %s338_s5 = int_to_ptr.vmem [resolvable:$true] %s337_s5 }
  0x22   : > { %s306_s26 = sshll.u32 %s2412_s1, 4  ;;  %s363_s16 = sshll.u32 %s2389_s6, 4  ;;  %s307_s26 = int_to_ptr.hbm [resolvable:$true] %s306_s26  ;;  %s364_s16 = int_to_ptr.hbm [resolvable:$true] %s363_s16 }
  0x23   : > { %1780 = dma.hbm_to_vmem [thread:$0]  (!%p2261_p12), %s307_s26, 384, %s309_s13, [#allocation3], %s2129_s30, %s2129_s30, %s2130_s12  }
  0x24   : > { %1786 = dma.hbm_to_vmem [thread:$0]  (!%p2261_p12), %s336_s23, 16, %s338_s5, [#allocation6]  }
  0x25   : > { %s383_s15 = sshll.u32 %s2392_s9, 4  ;;  %s2134_s24 = smov [#allocation10]   ;;  %s384_s15 = int_to_ptr.hbm [resolvable:$true] %s383_s15 }
  0x26   : > { %s365_s1 = sshll.u32 %s2134_s24, 4  ;;  %s2135_s26 = smov [#allocation11]   ;;  %s366_s1 = int_to_ptr.vmem [resolvable:$true] %s365_s1 }
  0x27   : > { %1792 = dma.hbm_to_vmem [thread:$0]  (!%p2261_p12), %s364_s16, 3072, %s366_s1, [#allocation9], %s2129_s30, %s2129_s30, %s2130_s12  }
  0x28   : > { %s385_s13 = sshll.u32 %s2135_s26, 4  ;;  %411 = sbr.rel (%p2247_p10) target bundleno = 826 (0x33a), region = 64  ;;  %s386_s13 = int_to_ptr.vmem [resolvable:$true] %s385_s13 }
  0x29   : > { %1795 = dma.hbm_to_vmem [thread:$0]  (!%p2261_p12), %s384_s15, 1024, %s386_s13, [#allocation12], %s2129_s30, %s2129_s30, %s2130_s12  }
  0x2d   : > { %2093 = dma.done.wait (%p1800_p9), [#allocation3], 384  }
  0x2e   : > { %2095 = vsyncadd (%p1800_p9), [#allocation3], 4294966912 }
  0x2f   : > { %2097 = dma.done.wait (%p1800_p9), [#allocation6], 3088  }
  0x30   : > { %2099 = vsyncadd (%p1800_p9), [#allocation6], 4294964208 }
  0x31   : > { %2101 = dma.done.wait (%p1800_p9), [#allocation9], 3456  }
  0x32   : > { %2103 = vsyncadd (%p1800_p9), [#allocation9], 4294963840 }
  0x33   : > { %2105 = dma.done.wait (%p1800_p9), [#allocation12], 1024  }
  0x34   : > { %2107 = vsyncadd (%p1800_p9), [#allocation12], 4294966272  ;;  %p476_p13 = scmp.lt.s32.totalorder %s2219_s21, 1  ;;  %vm494_vm0 = vcmask 1043456   ;;  %v1696_v2 = vld [vmem:[#allocation5 + $0x38] sm:$0xff]  ;;  %v1688_v5 = vld [vmem:[#allocation2] sm:$0xff] }
  0x35   : > { %v1705_v3 = vld [vmem:[#allocation5 + $0x78] sm:$0xff]  ;;  %v1697_v6 = vld [vmem:[#allocation2 + $0x8] sm:$0xff]  ;;  %vm490_vm1 = vcmask 64512   ;;  %v1694_v10 = vld [vmem:[#allocation5 + $0x28] sm:$0xff]  ;;  %vm825_vm2 = vcmask 130048   ;;  %s473_s15 = sand.u32 1, %s2118_s18  }
  0x36   : > { %s477_s1 = scalar_select %p476_p13, %s2219_s21, 1  ;;  %v1695_v7 = vld [vmem:[#allocation5 + $0x30] sm:$0xff]  ;;  %v1714_v8 = vld [vmem:[#allocation5 + $0xb8] sm:$0xff]  ;;  %620 = vmatpush.bf16.msra.mxu2 %v1705_v3  ;;  %v1703_v11 = vld [vmem:[#allocation5 + $0x68] sm:$0xff] }
  0x37   : > { %v1704_v9 = vld [vmem:[#allocation5 + $0x70] sm:$0xff]  ;;  %787 = vmatpush.bf16.msra.mxu1 %v1714_v8  ;;  %v1693_v12 = vld [vmem:[#allocation5 + $0x20] sm:$0xff]  ;;  %v1692_v14 = vld [vmem:[#allocation5 + $0x18] sm:$0xff]  ;;  %s1425_s24 = sshll.u32 %s473_s15, 4  ;;  %s1750_s26 = sshll.u32 %s2219_s21, 4 }
  0x38   : > { %s1426_s23 = sshll.u32 %s477_s1, 3  ;;  %v1702_v13 = vld [vmem:[#allocation5 + $0x60] sm:$0xff]  ;;  %v1706_v15 = vld [vmem:[#allocation2 + $0x10] sm:$0xff]  ;;  %v1691_v16 = vld [vmem:[#allocation5 + $0x10] sm:$0xff]  ;;  %s475_s29 = scalar_lea.vmem [#allocation13], %s1425_s24 }
  0x39   : > { %s479_s30 = scalar_lea.vmem %s2383_s0, %s1426_s23  ;;  %v1713_v17 = vld [vmem:[#allocation5 + $0xb0] sm:$0xff]  ;;  %v1701_v18 = vld [vmem:[#allocation5 + $0x58] sm:$0xff]  ;;  %v1690_v19 = vld [vmem:[#allocation5 + $0x8] sm:$0xff]  ;;  %s1283_s23 = scalar_lea.hbm %s2394_s11, %s1750_s26 }
  0x3a   : > { %v481_v0 = vld [vmem:[%s479_s30] sm:$0xff]  ;;  %621 = vmatpush.bf16.msra.mxu2 %v1704_v9  ;;  %v1700_v21 = vld [vmem:[#allocation5 + $0x50] sm:$0xff]  ;;  %v1689_v22 = vld [vmem:[#allocation5] sm:$0xff]  ;;  %s1284_s21 = sshll.u32 %s475_s29, 4  ;;  %s1286_s22 = sshll.u32 %s1283_s23, 4  ;;  %s1285_s21 = int_to_ptr.vmem [resolvable:$true] %s1284_s21  ;;  %s1287_s22 = int_to_ptr.hbm [resolvable:$true] %s1286_s22 }
  0x3b   : > { %v482_v1 = vpack.c.bf16 %v481_v0, %v481_v0  ;;  %788 = vmatpush.bf16.msra.mxu1 %v1713_v17  ;;  %v1712_v20 = vld [vmem:[#allocation5 + $0xa8] sm:$0xff]  ;;  %v1711_v23 = vld [vmem:[#allocation5 + $0xa0] sm:$0xff]  ;;  %v1710_v25 = vld [vmem:[#allocation5 + $0x98] sm:$0xff]  ;;  %s1272_s30 = scalar_lea.sflag [#allocation4], %s473_s15  ;;  %s2062_s12 = sshra.s32 %s1287_s22, 4  ;;  %s2063_s12 = int_to_ptr.hbm [resolvable:$true] %s2062_s12 }
  0x3c   : > { %v1699_v24 = vld [vmem:[#allocation5 + $0x48] sm:$0xff]  ;;  %v1698_v26 = vld [vmem:[#allocation5 + $0x40] sm:$0xff]  ;;  %v1709_v27 = vld [vmem:[#allocation5 + $0x90] sm:$0xff]  ;;  %s2064_s2 = scalar_lea.hbm %s2063_s12, 16  ;;  %s2068_s14 = scalar_lea.hbm %s2394_s11, 32 }
  0x3d   : > { %v496_v4 = vsel %vm494_vm0, %v482_v1, 0  ;;  %v1708_v28 = vld [vmem:[#allocation5 + $0x88] sm:$0xff]  ;;  %v1707_v29 = vld [vmem:[#allocation5 + $0x80] sm:$0xff]  ;;  %v1732_v39 = vld [vmem:[#allocation10 + $0x78] sm:$0xff]  ;;  %p2065_p0 = scmp.ne.s32.totalorder %s2063_s12, %s2064_s2  ;;  %p2069_p3 = scmp.lt.s32.totalorder %s2063_s12, %s2394_s11 }
  0x3e   : > { %505 = vmatpush.bf16.msra.mxu0 %v496_v4  ;;  %547 = vmatpush.bf16.msra.mxu3 %v496_v4  ;;  %v1731_v40 = vld [vmem:[#allocation10 + $0x70] sm:$0xff]  ;;  %v1730_v43 = vld [vmem:[#allocation10 + $0x68] sm:$0xff]  ;;  %v1729_v46 = vld [vmem:[#allocation10 + $0x60] sm:$0xff]  ;;  %p2070_p4 = scmp.lt.s32.totalorder %s2068_s14, %s2064_s2 }
  0x3f   : > { %622 = vmatpush.bf16.msra.mxu2 %v1703_v11  ;;  %789 = vmatpush.bf16.msra.mxu1 %v1712_v20  ;;  %v1855_v48 = vld [vmem:[#allocation7] ss:$0 sm:$0xff]  ;;  %v1728_v50 = vld [vmem:[#allocation10 + $0x58] sm:$0xff]  ;;  %v1856_v53 = vld [vmem:[%s2387_s4] ss:$0 sm:$0xff]  ;;  %p2066_p1 = pnand %p2065_p0, %p2236_p5 }
  0x40   : > { %v1741_v62 = vld [vmem:[#allocation10 + $0xb8] sm:$0xff]  ;;  %v1724_v1 = vld [vmem:[#allocation8 + $0x8] sm:$0xff]  ;;  %v1738_v8 = vld [vmem:[#allocation10 + $0xa0] sm:$0xff]  ;;  %p2071_p7 = por %p2070_p4, %p2069_p3 }
  0x41   : > { %1431 = vmatmul.msk.bf16.vlgmr.msra.gmra.mxu0 %vm490_vm1, %v1688_v5  ;;  %1436 = vmatmul.msk.bf16.vlgmr.msra.gmra.mxu3 %vm490_vm1, %v1697_v6  ;;  %v1723_v0 = vld [vmem:[#allocation10 + $0x38] sm:$0xff]  ;;  %v1722_v5 = vld [vmem:[#allocation10 + $0x30] sm:$0xff]  ;;  %v1739_v6 = vld [vmem:[#allocation10 + $0xa8] sm:$0xff]  ;;  %p2067_p2 = pneg %p2066_p1 }
  0x42   : > { %714 = vmatpush.bf16.msrb.mxu0 %v496_v4  ;;  %682 = vmatpush.bf16.msrb.mxu3 %v1696_v2  ;;  %v1715_v2 = vld [vmem:[#allocation8] sm:$0xff]  ;;  %v1733_v3 = vld [vmem:[#allocation8 + $0x10] sm:$0xff]  ;;  %v1740_v4 = vld [vmem:[#allocation10 + $0xb0] sm:$0xff] }
  0x43   : > { %623 = vmatpush.bf16.msra.mxu2 %v1702_v13  ;;  %790 = vmatpush.bf16.msra.mxu1 %v1711_v23  ;;  %v1720_v9 = vld [vmem:[#allocation10 + $0x20] sm:$0xff]  ;;  %v1719_v11 = vld [vmem:[#allocation10 + $0x18] sm:$0xff]  ;;  %v1718_v13 = vld [vmem:[#allocation10 + $0x10] sm:$0xff]  ;;  %p2072_p8 = pnand %p2071_p7, %p2067_p2 }
  0x44   : > { %v1726_v17 = vld [vmem:[#allocation10 + $0x48] sm:$0xff]  ;;  %v1725_v20 = vld [vmem:[#allocation10 + $0x40] sm:$0xff] }
  0x46   : > { %683 = vmatpush.bf16.msrb.mxu3 %v1695_v7  ;;  %v1721_v7 = vld [vmem:[#allocation10 + $0x28] sm:$0xff] }
  0x47   : > { %624 = vmatpush.bf16.msra.mxu2 %v1701_v18  ;;  %791 = vmatpush.bf16.msra.mxu1 %v1710_v25  ;;  %v1734_v18 = vld [vmem:[#allocation10 + $0x80] sm:$0xff] }
  0x4a   : > { %684 = vmatpush.bf16.msrb.mxu3 %v1694_v10  ;;  %v1737_v10 = vld [vmem:[#allocation10 + $0x98] sm:$0xff] }
  0x4b   : > { %625 = vmatpush.bf16.msra.mxu2 %v1700_v21  ;;  %792 = vmatpush.bf16.msra.mxu1 %v1709_v27  ;;  %v1749_v21 = vld [vmem:[#allocation11 + $0x38] sm:$0xff] }
  0x4e   : > { %685 = vmatpush.bf16.msrb.mxu3 %v1693_v12  ;;  %v1736_v12 = vld [vmem:[#allocation10 + $0x90] sm:$0xff] }
  0x4f   : > { %626 = vmatpush.bf16.msra.mxu2 %v1699_v24  ;;  %793 = vmatpush.bf16.msra.mxu1 %v1708_v28 }
  0x51   : > { %1505 = vmatmul.msk.bf16.vlgmr.msrb.gmra.mxu0 %vm490_vm1, %v1706_v15  ;;  %v1717_v15 = vld [vmem:[#allocation10 + $0x8] sm:$0xff] }
  0x52   : > { %686 = vmatpush.bf16.msrb.mxu3 %v1692_v14  ;;  %v1735_v14 = vld [vmem:[#allocation10 + $0x88] sm:$0xff] }
  0x53   : > { %627 = vmatpush.bf16.msra.mxu2 %v1698_v26  ;;  %794 = vmatpush.bf16.msra.mxu1 %v1707_v29 }
  0x56   : > { %687 = vmatpush.bf16.msrb.mxu3 %v1691_v16  ;;  %v1727_v16 = vld [vmem:[#allocation10 + $0x50] sm:$0xff] }
  0x5a   : > { %688 = vmatpush.bf16.msrb.mxu3 %v1690_v19  ;;  %v1716_v19 = vld [vmem:[#allocation10] sm:$0xff] }
  0x5e   : > { %689 = vmatpush.bf16.msrb.mxu3 %v1689_v22  ;;  %v1748_v22 = vld [vmem:[#allocation11 + $0x30] sm:$0xff] }
  0x62   : > { %951 = vmatpush.bf16.msra.mxu3 %v1732_v39 }
  0x66   : > { %952 = vmatpush.bf16.msra.mxu3 %v1731_v40 }
  0x6a   : > { %953 = vmatpush.bf16.msra.mxu3 %v1730_v43  ;;  %v1857_v43 = vld [vmem:[%s2390_s7] ss:$0 sm:$0xff] }
  0x6e   : > { %954 = vmatpush.bf16.msra.mxu3 %v1729_v46 }
  0x72   : > { %955 = vmatpush.bf16.msra.mxu3 %v1728_v50 }
  0x76   : > { %956 = vmatpush.bf16.msra.mxu3 %v1727_v16 }
  0x7a   : > { %957 = vmatpush.bf16.msra.mxu3 %v1726_v17 }
  0x7e   : > { %958 = vmatpush.bf16.msra.mxu3 %v1725_v20 }
  0xbe   : > { %v507_v30 = vpop.f32.mrf.mxu0 }
  0xc4   : > { %v549_v31 = vpop.f32.mrf.mxu3 }
  0xc6   : > { %v509_v32 = vpop.f32.mrf.mxu0 }
  0xc7   : > { %v512_v33 = vpack.c.bf16 %v509_v32, %v507_v30  ;;  %v1747_v32 = vld [vmem:[#allocation11 + $0x28] sm:$0xff] }
  0xc9   : > { %690 = vmatmul.bf16.vlgmr.msrb.gmra.mxu3 %v512_v33  ;;  %v1746_v33 = vld [vmem:[#allocation11 + $0x20] sm:$0xff] }
  0xcc   : > { %v551_v34 = vpop.f32.mrf.mxu3 }
  0xcd   : > { %v554_v35 = vpack.c.bf16 %v551_v34, %v549_v31  ;;  %v1745_v34 = vld [vmem:[#allocation11 + $0x18] sm:$0xff] }
  0xce   : > { %v716_v36 = vpop.f32.mrf.mxu0 }
  0xcf   : > { %628 = vmatmul.bf16.vlgmr.msra.gmra.mxu2 %v554_v35  ;;  %v1744_v35 = vld [vmem:[#allocation11 + $0x10] sm:$0xff] }
  0xd6   : > { %v718_v37 = vpop.f32.mrf.mxu0 }
  0xd7   : > { %v721_v38 = vpack.c.bf16 %v718_v37, %v716_v36  ;;  %v1743_v36 = vld [vmem:[#allocation11 + $0x8] sm:$0xff]  ;;  %v1742_v37 = vld [vmem:[#allocation11] sm:$0xff] }
  0xd9   : > { %795 = vmatmul.bf16.vlgmr.msra.gmra.mxu1 %v721_v38 }
 0x14c   : > { %v691_v41 = vpop.f32.mrf.mxu3 }
 0x152   : > { %v629_v42 = vpop.f32.mrf.mxu2 }
 0x153   : > { %v692_v45 = vadd.f32 %v691_v41, %v629_v42 }
 0x154   : > { %v693_v51 = vpop.f32.mrf.mxu3 }
 0x156   : > { %v796_v44 = vpop.f32.mrf.mxu1 }
 0x157   : > { %v801_v47 = vadd.f32 %v796_v44, %v692_v45 }
 0x159   : > { %v807_v52 = vmul.f32 %v1855_v48, %v801_v47  ;;  %v1858_v47 = vld [vmem:[%s2391_s8] ss:$0 sm:$0xff] }
 0x15a   : > { %v631_v49 = vpop.f32.mrf.mxu2 }
 0x15b   : > { %v694_v54 = vadd.f32 %v693_v51, %v631_v49  ;;  %v813_v57 = vadd.f32 %v1856_v53, %v807_v52 }
 0x15d   : > { %v815_v60 = vmax.f32 %v813_v57, 0.0  ;;  %v1859_v57 = vld [vmem:[%s2393_s10] ss:$0 sm:$0xff] }
 0x15e   : > { %v798_v55 = vpop.f32.mrf.mxu1 }
 0x15f   : > { %v802_v56 = vadd.f32 %v798_v55, %v694_v54 }
 0x161   : > { %v808_v58 = vmul.f32 %v1855_v48, %v802_v56 }
 0x163   : > { %v814_v59 = vadd.f32 %v1856_v53, %v808_v58 }
 0x165   : > { %v816_v61 = vmax.f32 %v814_v59, 0.0 }
 0x167   : > { %v817_v63 = vpack.c.bf16 %v816_v61, %v815_v60 }
 0x169   : > { %836 = vmatpush.bf16.msra.mxu0 %v817_v63  ;;  %878 = vmatpush.bf16.msrb.mxu2 %v817_v63 }
 0x16a   : > { %1045 = vmatpush.bf16.msrb.mxu1 %v817_v63 }
 0x16c   : > { %1547 = vmatmul.msk.bf16.vlgmr.msrb.gmra.mxu2 %vm825_vm2, %v1724_v1  ;;  %1542 = vmatmul.msk.bf16.vlgmr.msra.gmra.mxu0 %vm825_vm2, %v1715_v2 }
 0x16d   : > { %1118 = vmatpush.bf16.msra.mxu2 %v1741_v62  ;;  %1013 = vmatpush.bf16.msrb.mxu0 %v1723_v0 }
 0x16e   : > { %1616 = vmatmul.msk.bf16.vlgmr.msrb.gmra.mxu1 %vm825_vm2, %v1733_v3 }
 0x16f   : > { %1217 = vmatpush.bf16.msra.mxu1 %v1749_v21 }
 0x171   : > { %1119 = vmatpush.bf16.msra.mxu2 %v1740_v4  ;;  %1014 = vmatpush.bf16.msrb.mxu0 %v1722_v5 }
 0x173   : > { %1218 = vmatpush.bf16.msra.mxu1 %v1748_v22 }
 0x175   : > { %1120 = vmatpush.bf16.msra.mxu2 %v1739_v6  ;;  %1015 = vmatpush.bf16.msrb.mxu0 %v1721_v7 }
 0x177   : > { %1219 = vmatpush.bf16.msra.mxu1 %v1747_v32 }
 0x179   : > { %1121 = vmatpush.bf16.msra.mxu2 %v1738_v8  ;;  %1016 = vmatpush.bf16.msrb.mxu0 %v1720_v9 }
 0x17b   : > { %1220 = vmatpush.bf16.msra.mxu1 %v1746_v33 }
 0x17d   : > { %1122 = vmatpush.bf16.msra.mxu2 %v1737_v10  ;;  %1017 = vmatpush.bf16.msrb.mxu0 %v1719_v11 }
 0x17f   : > { %1221 = vmatpush.bf16.msra.mxu1 %v1745_v34 }
 0x181   : > { %1123 = vmatpush.bf16.msra.mxu2 %v1736_v12  ;;  %1018 = vmatpush.bf16.msrb.mxu0 %v1718_v13 }
 0x183   : > { %1222 = vmatpush.bf16.msra.mxu1 %v1744_v35 }
 0x185   : > { %1124 = vmatpush.bf16.msra.mxu2 %v1735_v14  ;;  %1019 = vmatpush.bf16.msrb.mxu0 %v1717_v15 }
 0x187   : > { %1223 = vmatpush.bf16.msra.mxu1 %v1743_v36 }
 0x189   : > { %1125 = vmatpush.bf16.msra.mxu2 %v1734_v18  ;;  %1020 = vmatpush.bf16.msrb.mxu0 %v1716_v19 }
 0x18b   : > { %1224 = vmatpush.bf16.msra.mxu1 %v1742_v37 }
 0x1e9   : > { %v838_v23 = vpop.f32.mrf.mxu0 }
 0x1eb   : > { %v1047_v24 = vpop.f32.mrf.mxu1 }
 0x1ef   : > { %v880_v25 = vpop.f32.mrf.mxu2 }
 0x1f1   : > { %v840_v26 = vpop.f32.mrf.mxu0 }
 0x1f2   : > { %v843_v28 = vpack.c.bf16 %v840_v26, %v838_v23 }
 0x1f3   : > { %v1049_v27 = vpop.f32.mrf.mxu1 }
 0x1f4   : > { %v1052_v29 = vpack.c.bf16 %v1049_v27, %v1047_v24  ;;  %1021 = vmatmul.bf16.vlgmr.msrb.gmra.mxu0 %v843_v28 }
 0x1f6   : > { %1126 = vmatmul.bf16.vlgmr.msra.gmra.mxu2 %v1052_v29 }
 0x1f7   : > { %v882_v30 = vpop.f32.mrf.mxu2 }
 0x1f8   : > { %v885_v31 = vpack.c.bf16 %v882_v30, %v880_v25 }
 0x1fa   : > { %959 = vmatmul.bf16.vlgmr.msra.gmra.mxu3 %v885_v31 }
 0x271   : > { %v1022_v38 = vpop.f32.mrf.mxu0 }
 0x279   : > { %v1127_v39 = vpop.f32.mrf.mxu2  ;;  %v1024_v44 = vpop.f32.mrf.mxu0 }
 0x27d   : > { %v960_v40 = vpop.f32.mrf.mxu3 }
 0x27e   : > { %v1023_v41 = vadd.f32 %v1022_v38, %v960_v40 }
 0x280   : > { %v1132_v42 = vadd.f32 %v1127_v39, %v1023_v41 }
 0x281   : > { %v1129_v49 = vpop.f32.mrf.mxu2 }
 0x282   : > { %v1138_v46 = vmul.f32 %v1857_v43, %v1132_v42 }
 0x284   : > { %v1144_v51 = vadd.f32 %v1858_v47, %v1138_v46 }
 0x285   : > { %v962_v45 = vpop.f32.mrf.mxu3 }
 0x286   : > { %v1025_v48 = vadd.f32 %v1024_v44, %v962_v45  ;;  %v1146_v54 = vmax.f32 %v1144_v51, 0.0 }
 0x288   : > { %v1133_v50 = vadd.f32 %v1129_v49, %v1025_v48 }
 0x28a   : > { %v1139_v52 = vmul.f32 %v1857_v43, %v1133_v50 }
 0x28c   : > { %v1145_v53 = vadd.f32 %v1858_v47, %v1139_v52 }
 0x28e   : > { %v1147_v55 = vmax.f32 %v1145_v53, 0.0 }
 0x290   : > { %v1148_v56 = vpack.c.bf16 %v1147_v55, %v1146_v54 }
 0x292   : > { %1225 = vmatmul.bf16.vlgmr.msra.gmra.mxu1 %v1148_v56 }
 0x30f   : > { %v1226_v58 = vpop.f32.mrf.mxu1 }
 0x310   : > { %v1227_v59 = vadd.f32 %v1859_v57, %v1226_v58 }
 0x312   : > { %v1681_v60 = vmul.f32 -1.442695, %v1227_v59 }
 0x314   : > { %1860 = vpow2.f32 %v1681_v60 }
 0x317   : > { %v1228_v61 = vpop.f32.mrf.mxu1 }
 0x318   : > { %v1229_v62 = vadd.f32 %v1859_v57, %v1228_v61 }
 0x31a   : > { %v1861_v63 = vpop.eup %1860  ;;  %v1682_v0 = vmul.f32 -1.442695, %v1229_v62 }
 0x31b   : > { %v1237_v1 = vadd.f32 1.0, %v1861_v63 }
 0x31c   : > { %1862 = vpow2.f32 %v1682_v0 }
 0x31d   : > { %1864 = vrcp.f32 %v1237_v1  ;;  %v1250_v7 = vand.u32 2147483648, %v1237_v1  ;;  %v1248_v9 = vand.u32 2147483647, %v1237_v1  ;;  %vm1244_vm4 = vweird.f32 %v1237_v1 }
 0x31f   : > { %v1251_v12 = vor.u32 1.1754944e-38, %v1250_v7  ;;  %vm1249_vm6 = vcmp.eq.f32.partialorder %v1248_v9, 8.507059e+37 }
 0x322   : > { %v1863_v2 = vpop.eup %1862 }
 0x323   : > { %v1865_v3 = vpop.eup %1864  ;;  %v1238_v4 = vadd.f32 1.0, %v1863_v2 }
 0x324   : > { %v1240_v5 = vmul.f32 %v1865_v3, %v1237_v1  ;;  %vm1245_vm3 = vweird.f32 %v1865_v3 }
 0x325   : > { %1866 = vrcp.f32 %v1238_v4  ;;  %vm1246_vm5 = vmor %vm1244_vm4, %vm1245_vm3  ;;  %v1265_v17 = vand.u32 2147483648, %v1238_v4  ;;  %v1263_v19 = vand.u32 2147483647, %v1238_v4  ;;  %vm1259_vm8 = vweird.f32 %v1238_v4 }
 0x326   : > { %v1241_v6 = vsub.f32 1.0, %v1240_v5 }
 0x327   : > { %v1266_v21 = vor.u32 1.1754944e-38, %v1265_v17  ;;  %vm1264_vm10 = vcmp.eq.f32.partialorder %v1263_v19, 8.507059e+37 }
 0x328   : > { %v1242_v8 = vmul.f32 %v1865_v3, %v1241_v6 }
 0x32a   : > { %v1243_v10 = vadd.f32 %v1865_v3, %v1242_v8 }
 0x32b   : > { %v1867_v11 = vpop.eup %1866 }
 0x32c   : > { %v1247_v13 = vsel %vm1246_vm5, %v1865_v3, %v1243_v10  ;;  %v1255_v14 = vmul.f32 %v1867_v11, %v1238_v4  ;;  %vm1260_vm7 = vweird.f32 %v1867_v11 }
 0x32d   : > { %v1252_v15 = vsel %vm1249_vm6, %v1251_v12, %v1247_v13  ;;  %vm1261_vm9 = vmor %vm1259_vm8, %vm1260_vm7 }
 0x32e   : > { %v1256_v16 = vsub.f32 1.0, %v1255_v14  ;;  %1269 = vst.msk [vmem:[%s475_s29] sm:$0xff] %vm825_vm2, %v1252_v15 }
 0x330   : > { %v1257_v18 = vmul.f32 %v1867_v11, %v1256_v16 }
 0x332   : > { %v1258_v20 = vadd.f32 %v1867_v11, %v1257_v18 }
 0x334   : > { %v1262_v22 = vsel %vm1261_vm9, %v1867_v11, %v1258_v20 }
 0x335   : > { %v1267_v23 = vsel %vm1264_vm10, %v1266_v21, %v1262_v22 }
 0x336   : > { %1270 = vst.msk [vmem:[%s475_s29 + $0x8] sm:$0xff] %vm825_vm2, %v1267_v23 }
 0x337   : > { %2075 = shalt.err (!%p2072_p8)
}
 0x338   : > { %s2136_s28 = smov 128   ;;  %s2137_s15 = smov 8  }
 0x339   : > { %1775 = dma.vmem_to_hbm [thread:$0]  (%p2236_p5), %s1285_s21, 256, %s1287_s22, %s1272_s30, %s2136_s28, %s2136_s28, %s2137_s15  }
 0x33a PF: > { %p1812_p9 = scmp.ge.s32.totalorder %s2126_s20, 2  ;;  %s1301_s26 = sand.u32 1, %s2114_s17  }
 0x33b   : > { %s1302_s13 = scalar_lea.sflag [#allocation4], %s1301_s26 }
 0x33c   : > { %p1797_p10 = pnand %p1812_p9, %p2240_p6 }
 0x33e   : > { %p1798_p11 = pneg %p1797_p10 }
 0x340   : > { %2109 = dma.done.wait (%p1798_p11), %s1302_s13, 256  }
 0x341   : > { %2111 = vsyncadd (%p1798_p11), %s1302_s13, 4294967040  ;;  %s2414_s20 = sld [smem:[#allocation20_spill]]  ;;  %s2417_s17 = smov %s2118_s18 }
 0x342   : > { %s2415_s1 = sld [smem:[#allocation19_spill]] }
 0x343   : > { %s2416_s19 = sld [smem:[#allocation21_spill]] }
 0x347   : > { %p25_p12 = scmp.ge.s32.totalorder %s2414_s20, 4  }
 0x348   : > { %s2418_s18 = smov %s2415_s1 }
 0x349   :  { %27 = sbr.rel (!%p25_p12) target bundleno = 11 (0xb), region = 132 }
 0x34e   :  { %1308 = vsyncpa [#allocation3], 1 }
 0x34f   :  { %1310 = vsyncpa [#allocation3 + $0x1], 1 }
 0x350   :  { %1311 = vsyncpa [#allocation6], 1 }
 0x351   :  { %1312 = vsyncpa [#allocation9], 1 }
 0x352   :  { %1313 = vsyncpa [#allocation12], 1 }
 0x353   :  { %1314 = vsyncpa [#allocation4], 1 }
 0x354   :  { %1316 = vsyncpa [#allocation4 + $0x1], 1 }

// kernel: _lambda_.10
= control target key start
LH: loop header
LB: loop body
LE: loop exit
PB: predicated region body
PF: predicated region fallthrough
CT: control target
= control target key end

     0   :  { %s2678_s0 = inlined_call_operand.vmem [shape: f32[2,4,128], index: 0, kind: input, shape index: {}]   ;;  %s2679_s1 = inlined_call_operand.vmem [shape: f32[2,8,128], index: 1, kind: input, shape index: {}]   ;;  %s2680_s2 = inlined_call_operand.vmem [shape: bf16[3,8,4], index: 2, kind: input, shape index: {}]   ;;  %s2681_s3 = inlined_call_operand.hbm [shape: bf16[3,128,128], index: 3, kind: input, shape index: {}]   ;;  %s2682_s4 = inlined_call_operand.hbm [shape: f32[1,128], index: 4, kind: input, shape index: {}]   ;;  %s2683_s5 = inlined_call_operand.hbm [shape: f32[1,128], index: 5, kind: input, shape index: {}]   ;;  %s2684_s6 = inlined_call_operand.vmem [shape: bf16[3,8,8], index: 6, kind: input, shape index: {}, may-alias: {6,10}]   ;;  %s2685_s7 = inlined_call_operand.hbm [shape: bf16[3,128,128], index: 7, kind: input, shape index: {}]   ;;  %s2686_s8 = inlined_call_operand.hbm [shape: f32[1,128], index: 8, kind: input, shape index: {}]   ;;  %s2687_s9 = inlined_call_operand.hbm [shape: f32[1,128], index: 9, kind: input, shape index: {}]   ;;  %s2688_s10 = inlined_call_operand.vmem [shape: bf16[3,8,8], index: 10, kind: input, shape index: {}, may-alias: {6,10}]   ;;  %s2689_s11 = inlined_call_operand.hbm [shape: bf16[3,128,128], index: 11, kind: input, shape index: {}]   ;;  %s2690_s12 = inlined_call_operand.vmem [shape: f32[1,128], index: 12, kind: input, shape index: {}]   ;;  %s2691_s13 = inlined_call_operand.hbm [shape: f32[1,128], index: 13, kind: input, shape index: {}]   ;;  %s2692_s14 = inlined_call_operand.vmem [shape: f32[2,8,128], index: 14, kind: output, shape index: {}]  }
   0x1   :  { %2693 = sst [smem:[#allocation20_spill]] %s2682_s4 }
   0x2   :  { %2694 = sst [smem:[#allocation21_spill]] %s2685_s7 }
   0x3   :  { %2695 = sst [smem:[#allocation22_spill]] %s2687_s9 }
   0x4   :  { %19 = vsyncpa [#allocation3], 0 }
   0x5   :  { %20 = vsyncpa [#allocation5], 0 }
   0x6   :  { %21 = vsyncpa [#allocation8], 0 }
   0x7   :  { %22 = vsyncpa [#allocation11], 0 }
   0x8   :  { %23 = vsyncpa [#allocation14], 0  ;;  %s2521_s29 = smov 0  }
   0x9 LB: > { %s2696_s4 = sld [smem:[#allocation20_spill]]  ;;  %s2530_s17 = sadd.s32 4294967295, %s2434_s29   ;;  %s2434_s29 = sphi %s2521_s29, %s29_s29  }
   0xa   : > { %p1672_p0 = scmp.ge.s32.totalorder %s2434_s29, 1  ;;  %p364_p1 = scmp.lt.s32.totalorder %s2434_s29, 3 }
   0xb   : > { %p2128_p2 = scmp.eq.s32.totalorder %s2530_s17, 0  ;;  %s2436_s19 = smov [#allocation4]  }
   0xc   : > { %p2535_p3 = pnand %p1672_p0, %p364_p1  ;;  %s395_s20 = sshll.u32 %s2436_s19, 4  ;;  %s396_s20 = int_to_ptr.vmem [resolvable:$true] %s395_s20 }
   0xd   : > { %s2698_s7 = sld [smem:[#allocation21_spill]]  ;;  %s2437_s25 = smov [#allocation7]  }
   0xe   : > { %p2103_p4 = pneg %p2535_p3  ;;  %s421_s26 = sshll.u32 %s2437_s25, 4  ;;  %s422_s26 = int_to_ptr.vmem [resolvable:$true] %s421_s26 }
   0xf   : > { %s393_s16 = sshll.u32 %s2696_s4, 4  ;;  %s2700_s9 = sld [smem:[#allocation22_spill]]  ;;  %s394_s16 = int_to_ptr.hbm [resolvable:$true] %s393_s16 }
  0x10   : > { %p2546_p5 = pnand %p2128_p2, %p2103_p4  ;;  %s2438_s15 = smov 64  }
  0x11   : > { %s2439_s19 = smov 4   ;;  %s2440_s21 = smov [#allocation10]  }
  0x12   : > { %2109 = dma.hbm_to_vmem [thread:$0]  (!%p2546_p5), %s394_s16, 16, %s396_s20, [#allocation5]  }
  0x13   : > { %s419_s23 = sshll.u32 %s2698_s7, 4  ;;  %s448_s22 = sshll.u32 %s2440_s21, 4  ;;  %s420_s23 = int_to_ptr.hbm [resolvable:$true] %s419_s23  ;;  %s449_s22 = int_to_ptr.vmem [resolvable:$true] %s448_s22 }
  0x14   : > { %2115 = dma.hbm_to_vmem [thread:$0]  (!%p2546_p5), %s420_s23, 3072, %s422_s26, [#allocation8], %s2438_s15, %s2438_s15, %s2439_s19  }
  0x15   : > { %s446_s30 = sshll.u32 %s2700_s9, 4  ;;  %s378_s27 = sshll.u32 %s2681_s3, 4  ;;  %s447_s30 = int_to_ptr.hbm [resolvable:$true] %s446_s30  ;;  %s379_s27 = int_to_ptr.hbm [resolvable:$true] %s378_s27 }
  0x16   : > { %2121 = dma.hbm_to_vmem [thread:$0]  (!%p2546_p5), %s447_s30, 16, %s449_s22, [#allocation11]  }
  0x17   : > { %s405_s28 = sshll.u32 %s2683_s5, 4  ;;  %s2441_s7 = smov [#allocation2]   ;;  %s406_s28 = int_to_ptr.hbm [resolvable:$true] %s405_s28 }
  0x18   : > { %s380_s9 = sshll.u32 %s2441_s7, 4  ;;  %s2442_s4 = smov [#allocation6]   ;;  %s381_s9 = int_to_ptr.vmem [resolvable:$true] %s380_s9 }
  0x19   : > { %2106 = dma.hbm_to_vmem [thread:$0]  (!%p2546_p5), %s379_s27, 3072, %s381_s9, [#allocation3], %s2438_s15, %s2438_s15, %s2439_s19  }
  0x1a   : > { %s407_s23 = sshll.u32 %s2442_s4, 4  ;;  %s434_s30 = sshll.u32 %s2686_s8, 4  ;;  %s408_s23 = int_to_ptr.vmem [resolvable:$true] %s407_s23  ;;  %s435_s30 = int_to_ptr.hbm [resolvable:$true] %s434_s30 }
  0x1b   : > { %2112 = dma.hbm_to_vmem [thread:$0]  (!%p2546_p5), %s406_s28, 16, %s408_s23, [#allocation5]  }
  0x1c   : > { %s460_s25 = sshll.u32 %s2689_s11, 4  ;;  %s2443_s16 = smov [#allocation9]   ;;  %s461_s25 = int_to_ptr.hbm [resolvable:$true] %s460_s25 }
  0x1d   : > { %s436_s20 = sshll.u32 %s2443_s16, 4  ;;  %s2444_s9 = smov [#allocation12]   ;;  %s437_s20 = int_to_ptr.vmem [resolvable:$true] %s436_s20 }
  0x1e   : > { %2118 = dma.hbm_to_vmem [thread:$0]  (!%p2546_p5), %s435_s30, 16, %s437_s20, [#allocation8]  }
  0x1f   : > { %s462_s27 = sshll.u32 %s2444_s9, 4  ;;  %s478_s21 = sshll.u32 %s2691_s13, 4  ;;  %s463_s27 = int_to_ptr.vmem [resolvable:$true] %s462_s27  ;;  %s479_s21 = int_to_ptr.hbm [resolvable:$true] %s478_s21 }
  0x20   : > { %2124 = dma.hbm_to_vmem [thread:$0]  (!%p2546_p5), %s461_s25, 3072, %s463_s27, [#allocation11], %s2438_s15, %s2438_s15, %s2439_s19  }
  0x21   : > { %s2445_s28 = smov [#allocation13]   ;;  %507 = sbr.rel (%p2535_p3) target bundleno = 903 (0x387), region = 76 }
  0x22   : > { %s480_s23 = sshll.u32 %s2445_s28, 4  ;;  %s481_s23 = int_to_ptr.vmem [resolvable:$true] %s480_s23 }
  0x23   : > { %2127 = dma.hbm_to_vmem [thread:$0]  (!%p2546_p5), %s479_s21, 16, %s481_s23, [#allocation14]  }
  0x26   : > { %2413 = dma.done.wait (%p2128_p2), [#allocation3], 3072  }
  0x27   : > { %2415 = vsyncadd (%p2128_p2), [#allocation3], 4294964224 }
  0x28   : > { %2417 = dma.done.wait (%p2128_p2), [#allocation5], 32  }
  0x29   : > { %2419 = vsyncadd (%p2128_p2), [#allocation5], 4294967264 }
  0x2a   : > { %2421 = dma.done.wait (%p2128_p2), [#allocation8], 3088  }
  0x2b   : > { %2423 = vsyncadd (%p2128_p2), [#allocation8], 4294964208 }
  0x2c   : > { %2425 = dma.done.wait (%p2128_p2), [#allocation11], 3088  }
  0x2d   : > { %2427 = vsyncadd (%p2128_p2), [#allocation11], 4294964208 }
  0x2e   : > { %2429 = dma.done.wait (%p2128_p2), [#allocation14], 16  }
  0x2f   : > { %2431 = vsyncadd (%p2128_p2), [#allocation14], 4294967280  ;;  %p591_p6 = scmp.lt.s32.totalorder %s2530_s17, 1  ;;  %vm611_vm0 = vcmask 1041408   ;;  %v2014_v2 = vld [vmem:[#allocation2 + $0x78] sm:$0xff]  ;;  %vm607_vm1 = vcmask 31744  }
  0x30   : > { %v2006_v3 = vld [vmem:[#allocation2 + $0x38] sm:$0xff]  ;;  %v606_v5 = vld [vmem:[%s2680_s2] sm:$0xf]  ;;  %v1695_v6 = vld [vmem:[%s2680_s2 + $0x4] sm:$0xf]  ;;  %729 = vmatpush.bf16.msra.mxu2 %v2014_v2  ;;  %vm918_vm2 = vcmask 1043456  }
  0x31   : > { %s2702_s17 = smov (!%p591_p6, %s2530_s17), 1  ;;  %790 = vmatpush.bf16.msra.mxu3 %v2006_v3  ;;  %v2013_v7 = vld [vmem:[#allocation2 + $0x70] sm:$0xff]  ;;  %v2022_v9 = vld [vmem:[#allocation2 + $0xb8] sm:$0xff]  ;;  %v2012_v10 = vld [vmem:[#allocation2 + $0x68] sm:$0xff]  ;;  %vm914_vm3 = vcmask 64512  }
  0x32   : > { %s1691_s18 = sshll.u32 %s2702_s17, 2  ;;  %v2005_v8 = vld [vmem:[#allocation2 + $0x30] sm:$0xff]  ;;  %v2004_v11 = vld [vmem:[#allocation2 + $0x28] sm:$0xff]  ;;  %v2011_v14 = vld [vmem:[#allocation2 + $0x60] sm:$0xff]  ;;  %s1692_s23 = sshll.u32 %s2702_s17, 3 }
  0x33   : > { %s594_s19 = scalar_lea.vmem %s2678_s0, %s1691_s18  ;;  %v2021_v12 = vld [vmem:[#allocation2 + $0xb0] sm:$0xff]  ;;  %v2020_v13 = vld [vmem:[#allocation2 + $0xa8] sm:$0xff]  ;;  %v2003_v15 = vld [vmem:[#allocation2 + $0x20] sm:$0xff]  ;;  %s598_s15 = scalar_lea.vmem %s2679_s1, %s1692_s23 }
  0x34   : > { %v604_v0 = vld [vmem:[%s594_s19] sm:$0xf]  ;;  %730 = vmatpush.bf16.msra.mxu2 %v2013_v7  ;;  %v2010_v16 = vld [vmem:[#allocation2 + $0x58] sm:$0xff]  ;;  %v1761_v18 = vld [vmem:[%s2680_s2 + $0x8] sm:$0xf]  ;;  %s602_s26 = scalar_lea.vmem %s2692_s14, %s1692_s23 }
  0x35   : > { %v605_v1 = vpack.c.bf16 %v604_v0, %v604_v0  ;;  %791 = vmatpush.bf16.msra.mxu3 %v2005_v8  ;;  %v2002_v17 = vld [vmem:[#allocation2 + $0x18] sm:$0xff]  ;;  %v2009_v19 = vld [vmem:[#allocation2 + $0x50] sm:$0xff]  ;;  %v2008_v21 = vld [vmem:[#allocation2 + $0x48] sm:$0xff] }
  0x36   : > { %v2001_v20 = vld [vmem:[#allocation2 + $0x10] sm:$0xff]  ;;  %v2000_v22 = vld [vmem:[#allocation2 + $0x8] sm:$0xff]  ;;  %v2007_v23 = vld [vmem:[#allocation2 + $0x40] sm:$0xff] }
  0x37   : > { %v613_v4 = vsel %vm611_vm0, %v605_v1, 0  ;;  %v1999_v24 = vld [vmem:[#allocation2] sm:$0xff]  ;;  %v2018_v26 = vld [vmem:[#allocation2 + $0x98] sm:$0xff]  ;;  %v2017_v27 = vld [vmem:[#allocation2 + $0x90] sm:$0xff] }
  0x38   : > { %622 = vmatpush.bf16.msra.mxu0 %v613_v4  ;;  %657 = vmatpush.bf16.msra.mxu1 %v613_v4  ;;  %v2019_v25 = vld [vmem:[#allocation2 + $0xa0] sm:$0xff]  ;;  %v2016_v28 = vld [vmem:[#allocation2 + $0x88] sm:$0xff]  ;;  %v2037_v40 = vld [vmem:[#allocation7 + $0x70] sm:$0xff] }
  0x39   : > { %731 = vmatpush.bf16.msra.mxu2 %v2012_v10  ;;  %792 = vmatpush.bf16.msra.mxu3 %v2004_v11  ;;  %v2015_v29 = vld [vmem:[#allocation2 + $0x80] sm:$0xff]  ;;  %v2036_v43 = vld [vmem:[#allocation7 + $0x68] sm:$0xff]  ;;  %v2033_v55 = vld [vmem:[#allocation7 + $0x50] sm:$0xff] }
  0x3a   : > { %v2038_v39 = vld [vmem:[#allocation7 + $0x78] sm:$0xff]  ;;  %v2035_v44 = vld [vmem:[#allocation7 + $0x60] sm:$0xff]  ;;  %v2045_v1 = vld [vmem:[#allocation7 + $0xb0] sm:$0xff] }
  0x3b   : > { %1694 = vmatmul.msk.bf16.vlgmr.msra.gmra.mxu0 %vm607_vm1, %v606_v5  ;;  %1696 = vmatmul.msk.bf16.vlgmr.msra.gmra.mxu1 %vm607_vm1, %v1695_v6  ;;  %v2162_v48 = vld [vmem:[#allocation4] ss:$0 sm:$0xff]  ;;  %v2163_v51 = vld [vmem:[#allocation6] ss:$0 sm:$0xff]  ;;  %v1796_v62 = vld [vmem:[%s2684_s6 + $0x4] sm:$0xf] }
  0x3c   : > { %815 = vmatpush.bf16.msrb.mxu0 %v613_v4  ;;  %887 = vmatpush.bf16.msrb.mxu1 %v2022_v9  ;;  %v2034_v52 = vld [vmem:[#allocation7 + $0x58] sm:$0xff]  ;;  %v1862_v0 = vld [vmem:[%s2684_s6 + $0x8] sm:$0xf]  ;;  %v2029_v2 = vld [vmem:[#allocation7 + $0x30] sm:$0xff] }
  0x3d   : > { %732 = vmatpush.bf16.msra.mxu2 %v2011_v14  ;;  %793 = vmatpush.bf16.msra.mxu3 %v2003_v15  ;;  %v2046_v59 = vld [vmem:[#allocation7 + $0xb8] sm:$0xff]  ;;  %v2044_v3 = vld [vmem:[#allocation7 + $0xa8] sm:$0xff]  ;;  %v2043_v5 = vld [vmem:[#allocation7 + $0xa0] sm:$0xff] }
  0x3e   : > { %v2030_v60 = vld [vmem:[#allocation7 + $0x38] sm:$0xff]  ;;  %v2028_v4 = vld [vmem:[#allocation7 + $0x28] sm:$0xff]  ;;  %v2027_v6 = vld [vmem:[#allocation7 + $0x20] sm:$0xff] }
  0x3f   : > { %v913_v63 = vld [vmem:[%s2684_s6] sm:$0xf]  ;;  %v2041_v9 = vld [vmem:[#allocation7 + $0x90] sm:$0xff]  ;;  %v2040_v11 = vld [vmem:[#allocation7 + $0x88] sm:$0xff] }
  0x40   : > { %888 = vmatpush.bf16.msrb.mxu1 %v2021_v12  ;;  %v2042_v7 = vld [vmem:[#allocation7 + $0x98] sm:$0xff]  ;;  %v2025_v10 = vld [vmem:[#allocation7 + $0x10] sm:$0xff]  ;;  %v2024_v12 = vld [vmem:[#allocation7 + $0x8] sm:$0xff] }
  0x41   : > { %733 = vmatpush.bf16.msra.mxu2 %v2010_v16  ;;  %794 = vmatpush.bf16.msra.mxu3 %v2002_v17  ;;  %v2026_v8 = vld [vmem:[#allocation7 + $0x18] sm:$0xff]  ;;  %v2032_v14 = vld [vmem:[#allocation7 + $0x48] sm:$0xff]  ;;  %v2023_v15 = vld [vmem:[#allocation7] sm:$0xff] }
  0x42   : > { %v2031_v16 = vld [vmem:[#allocation7 + $0x40] sm:$0xff] }
  0x44   : > { %889 = vmatpush.bf16.msrb.mxu1 %v2020_v13  ;;  %v2039_v13 = vld [vmem:[#allocation7 + $0x80] sm:$0xff] }
  0x45   : > { %734 = vmatpush.bf16.msra.mxu2 %v2009_v19  ;;  %795 = vmatpush.bf16.msra.mxu3 %v2001_v20 }
  0x48   : > { %890 = vmatpush.bf16.msrb.mxu1 %v2019_v25 }
  0x49   : > { %735 = vmatpush.bf16.msra.mxu2 %v2008_v21  ;;  %796 = vmatpush.bf16.msra.mxu3 %v2000_v22 }
  0x4b   : > { %1762 = vmatmul.msk.bf16.vlgmr.msrb.gmra.mxu0 %vm607_vm1, %v1761_v18 }
  0x4c   : > { %891 = vmatpush.bf16.msrb.mxu1 %v2018_v26 }
  0x4d   : > { %736 = vmatpush.bf16.msra.mxu2 %v2007_v23  ;;  %797 = vmatpush.bf16.msra.mxu3 %v1999_v24 }
  0x50   : > { %892 = vmatpush.bf16.msrb.mxu1 %v2017_v27  ;;  %v2062_v27 = vld [vmem:[#allocation12 + $0x78] sm:$0xff] }
  0x51   : > { %1036 = vmatpush.bf16.msrb.mxu3 %v2038_v39 }
  0x54   : > { %893 = vmatpush.bf16.msrb.mxu1 %v2016_v28  ;;  %v2061_v28 = vld [vmem:[#allocation12 + $0x70] sm:$0xff] }
  0x55   : > { %1037 = vmatpush.bf16.msrb.mxu3 %v2037_v40  ;;  %v2058_v40 = vld [vmem:[#allocation12 + $0x58] sm:$0xff] }
  0x58   : > { %894 = vmatpush.bf16.msrb.mxu1 %v2015_v29 }
  0x59   : > { %1038 = vmatpush.bf16.msrb.mxu3 %v2036_v43  ;;  %v1219_v43 = vld [vmem:[%s598_s15] sm:$0xff] }
  0x5d   : > { %1039 = vmatpush.bf16.msrb.mxu3 %v2035_v44 }
  0x61   : > { %1040 = vmatpush.bf16.msrb.mxu3 %v2034_v52  ;;  %v1222_v52 = vld [vmem:[%s2688_s10] sm:$0xf] }
  0x65   : > { %1041 = vmatpush.bf16.msrb.mxu3 %v2033_v55  ;;  %v2053_v55 = vld [vmem:[#allocation12 + $0x30] sm:$0xff] }
  0x69   : > { %1042 = vmatpush.bf16.msrb.mxu3 %v2032_v14 }
  0x6d   : > { %1043 = vmatpush.bf16.msrb.mxu3 %v2031_v16 }
  0xb8   : > { %v624_v30 = vpop.f32.mrf.mxu0  ;;  %v659_v31 = vpop.f32.mrf.mxu1 }
  0xb9   : > { %v628_v32 = vpack.c.bf16 %v624_v30, %v624_v30  ;;  %v663_v33 = vpack.c.bf16 %v659_v31, %v659_v31  ;;  %v2060_v31 = vld [vmem:[#allocation12 + $0x68] sm:$0xff] }
  0xbb   : > { %737 = vmatmul.bf16.vlgmr.msra.gmra.mxu2 %v663_v33  ;;  %798 = vmatmul.bf16.vlgmr.msra.gmra.mxu3 %v628_v32 }
  0xc0   : > { %v626_v34 = vpop.f32.mrf.mxu0  ;;  %v661_v35 = vpop.f32.mrf.mxu1 }
  0xc1   : > { %v2164_v34 = vld [vmem:[#allocation9] ss:$0 sm:$0xff]  ;;  %v2059_v35 = vld [vmem:[#allocation12 + $0x60] sm:$0xff] }
  0xc8   : > { %v817_v36 = vpop.f32.mrf.mxu0 }
  0xc9   : > { %v821_v37 = vpack.c.bf16 %v817_v36, %v817_v36 }
  0xcb   : > { %895 = vmatmul.bf16.vlgmr.msrb.gmra.mxu1 %v821_v37  ;;  %v2165_v37 = vld [vmem:[#allocation10] ss:$0 sm:$0xff] }
  0xd0   : > { %v819_v38 = vpop.f32.mrf.mxu0 }
 0x13e   : > { %v738_v41 = vpop.f32.mrf.mxu2  ;;  %v799_v42 = vpop.f32.mrf.mxu3 }
 0x13f   : > { %v800_v47 = vadd.f32 %v799_v42, %v738_v41 }
 0x146   : > { %v740_v45 = vpop.f32.mrf.mxu2  ;;  %v801_v46 = vpop.f32.mrf.mxu3 }
 0x147   : > { %v2057_v45 = vld [vmem:[#allocation12 + $0x50] sm:$0xff] }
 0x148   : > { %v896_v49 = vpop.f32.mrf.mxu1 }
 0x149   : > { %v900_v50 = vadd.f32 %v896_v49, %v800_v47  ;;  %v2054_v49 = vld [vmem:[#allocation12 + $0x38] sm:$0xff] }
 0x14b   : > { %v905_v53 = vmul.f32 %v2162_v48, %v900_v50  ;;  %v2070_v48 = vld [vmem:[#allocation12 + $0xb8] sm:$0xff] }
 0x14d   : > { %v910_v54 = vadd.f32 %v2163_v51, %v905_v53  ;;  %v1897_v51 = vld [vmem:[%s2688_s10 + $0x4] sm:$0xf]  ;;  %v1963_v53 = vld [vmem:[%s2688_s10 + $0x8] sm:$0xf] }
 0x14f   : > { %v911_v56 = vmax.f32 %v910_v54, 0.0  ;;  %v2069_v54 = vld [vmem:[#allocation12 + $0xb0] sm:$0xff] }
 0x150   : > { %v898_v57 = vpop.f32.mrf.mxu1 }
 0x151   : > { %v912_v58 = vpack.c.bf16 %v911_v56, %v911_v56  ;;  %v2068_v56 = vld [vmem:[#allocation12 + $0xa8] sm:$0xff] }
 0x152   : > { %v2052_v57 = vld [vmem:[#allocation12 + $0x28] sm:$0xff] }
 0x153   : > { %v920_v61 = vsel %vm918_vm2, %v912_v58, 0  ;;  %v2067_v58 = vld [vmem:[#allocation12 + $0xa0] sm:$0xff] }
 0x154   : > { %929 = vmatpush.bf16.msra.mxu0 %v920_v61  ;;  %964 = vmatpush.bf16.msrb.mxu2 %v920_v61 }
 0x155   : > { %1122 = vmatpush.bf16.msra.mxu1 %v920_v61  ;;  %v2050_v61 = vld [vmem:[#allocation12 + $0x18] sm:$0xff] }
 0x157   : > { %1797 = vmatmul.msk.bf16.vlgmr.msrb.gmra.mxu2 %vm914_vm3, %v1796_v62  ;;  %1795 = vmatmul.msk.bf16.vlgmr.msra.gmra.mxu0 %vm914_vm3, %v913_v63  ;;  %v2065_v62 = vld [vmem:[#allocation12 + $0x90] sm:$0xff] }
 0x158   : > { %1194 = vmatpush.bf16.msra.mxu2 %v2046_v59  ;;  %1097 = vmatpush.bf16.msrb.mxu0 %v2030_v60  ;;  %v2051_v59 = vld [vmem:[#allocation12 + $0x20] sm:$0xff]  ;;  %v2066_v60 = vld [vmem:[#allocation12 + $0x98] sm:$0xff]  ;;  %v2049_v63 = vld [vmem:[#allocation12 + $0x10] sm:$0xff] }
 0x159   : > { %1863 = vmatmul.msk.bf16.vlgmr.msra.gmra.mxu1 %vm914_vm3, %v1862_v0  ;;  %v2064_v0 = vld [vmem:[#allocation12 + $0x88] sm:$0xff] }
 0x15c   : > { %1195 = vmatpush.bf16.msra.mxu2 %v2045_v1  ;;  %1098 = vmatpush.bf16.msrb.mxu0 %v2029_v2  ;;  %v2048_v1 = vld [vmem:[#allocation12 + $0x8] sm:$0xff] }
 0x15d   : > { %v2056_v2 = vld [vmem:[#allocation12 + $0x48] sm:$0xff] }
 0x160   : > { %1196 = vmatpush.bf16.msra.mxu2 %v2044_v3  ;;  %1099 = vmatpush.bf16.msrb.mxu0 %v2028_v4  ;;  %v2047_v3 = vld [vmem:[#allocation12] sm:$0xff] }
 0x161   : > { %v2063_v4 = vld [vmem:[#allocation12 + $0x80] sm:$0xff] }
 0x164   : > { %1197 = vmatpush.bf16.msra.mxu2 %v2043_v5  ;;  %1100 = vmatpush.bf16.msrb.mxu0 %v2027_v6  ;;  %v2055_v5 = vld [vmem:[#allocation12 + $0x40] sm:$0xff] }
 0x168   : > { %1198 = vmatpush.bf16.msra.mxu2 %v2042_v7  ;;  %1101 = vmatpush.bf16.msrb.mxu0 %v2026_v8 }
 0x16c   : > { %1199 = vmatpush.bf16.msra.mxu2 %v2041_v9  ;;  %1102 = vmatpush.bf16.msrb.mxu0 %v2025_v10 }
 0x170   : > { %1200 = vmatpush.bf16.msra.mxu2 %v2040_v11  ;;  %1103 = vmatpush.bf16.msrb.mxu0 %v2024_v12 }
 0x174   : > { %1201 = vmatpush.bf16.msra.mxu2 %v2039_v13  ;;  %1104 = vmatpush.bf16.msrb.mxu0 %v2023_v15 }
 0x178   : > { %1343 = vmatpush.bf16.msra.mxu0 %v2062_v27 }
 0x17c   : > { %1344 = vmatpush.bf16.msra.mxu0 %v2061_v28 }
 0x180   : > { %1345 = vmatpush.bf16.msra.mxu0 %v2060_v31 }
 0x184   : > { %1346 = vmatpush.bf16.msra.mxu0 %v2059_v35 }
 0x188   : > { %1347 = vmatpush.bf16.msra.mxu0 %v2058_v40 }
 0x18c   : > { %1348 = vmatpush.bf16.msra.mxu0 %v2057_v45 }
 0x190   : > { %1349 = vmatpush.bf16.msra.mxu0 %v2056_v2 }
 0x194   : > { %1350 = vmatpush.bf16.msra.mxu0 %v2055_v5 }
 0x1d4   : > { %v931_v17 = vpop.f32.mrf.mxu0 }
 0x1d5   : > { %v935_v19 = vpack.c.bf16 %v931_v17, %v931_v17 }
 0x1d6   : > { %v1124_v18 = vpop.f32.mrf.mxu1 }
 0x1d7   : > { %v1128_v20 = vpack.c.bf16 %v1124_v18, %v1124_v18  ;;  %1105 = vmatmul.bf16.vlgmr.msrb.gmra.mxu0 %v935_v19  ;;  %v2166_v19 = vld [vmem:[%s2690_s12] ss:$0 sm:$0xff] }
 0x1d9   : > { %1202 = vmatmul.bf16.vlgmr.msra.gmra.mxu2 %v1128_v20 }
 0x1da   : > { %v966_v21 = vpop.f32.mrf.mxu2 }
 0x1db   : > { %v970_v22 = vpack.c.bf16 %v966_v21, %v966_v21 }
 0x1dc   : > { %v933_v23 = vpop.f32.mrf.mxu0 }
 0x1dd   : > { %1044 = vmatmul.bf16.vlgmr.msrb.gmra.mxu3 %v970_v22  ;;  %v2167_v22 = vld [vmem:[#allocation13] ss:$0 sm:$0xff] }
 0x1de   : > { %v1126_v24 = vpop.f32.mrf.mxu1 }
 0x1e2   : > { %v968_v25 = vpop.f32.mrf.mxu2 }
 0x254   : > { %v1106_v26 = vpop.f32.mrf.mxu0 }
 0x25c   : > { %v1203_v29 = vpop.f32.mrf.mxu2  ;;  %v1108_v30 = vpop.f32.mrf.mxu0 }
 0x260   : > { %v1045_v32 = vpop.f32.mrf.mxu3 }
 0x261   : > { %v1107_v33 = vadd.f32 %v1106_v26, %v1045_v32 }
 0x263   : > { %v1207_v36 = vadd.f32 %v1203_v29, %v1107_v33 }
 0x264   : > { %v1205_v38 = vpop.f32.mrf.mxu2 }
 0x265   : > { %v1212_v39 = vmul.f32 %v2164_v34, %v1207_v36 }
 0x267   : > { %v1217_v41 = vadd.f32 %v2165_v37, %v1212_v39 }
 0x268   : > { %v1047_v42 = vpop.f32.mrf.mxu3 }
 0x269   : > { %v1218_v44 = vmax.f32 %v1217_v41, 0.0 }
 0x26b   : > { %v1220_v46 = vadd.f32 %v1219_v43, %v1218_v44 }
 0x26d   : > { %v1221_v47 = vpack.c.bf16 %v1220_v46, %v1220_v46 }
 0x26f   : > { %v1227_v50 = vsel %vm918_vm2, %v1221_v47, 0 }
 0x270   : > { %1236 = vmatpush.bf16.msrb.mxu1 %v1227_v50  ;;  %1271 = vmatpush.bf16.msra.mxu3 %v1227_v50 }
 0x271   : > { %1429 = vmatpush.bf16.msrb.mxu2 %v1227_v50 }
 0x273   : > { %1898 = vmatmul.msk.bf16.vlgmr.msra.gmra.mxu3 %vm914_vm3, %v1897_v51  ;;  %1896 = vmatmul.msk.bf16.vlgmr.msrb.gmra.mxu1 %vm914_vm3, %v1222_v52 }
 0x274   : > { %1501 = vmatpush.bf16.msrb.mxu3 %v2070_v48  ;;  %1404 = vmatpush.bf16.msra.mxu1 %v2054_v49 }
 0x275   : > { %1964 = vmatmul.msk.bf16.vlgmr.msrb.gmra.mxu2 %vm914_vm3, %v1963_v53 }
 0x278   : > { %1502 = vmatpush.bf16.msrb.mxu3 %v2069_v54  ;;  %1405 = vmatpush.bf16.msra.mxu1 %v2053_v55 }
 0x27c   : > { %1503 = vmatpush.bf16.msrb.mxu3 %v2068_v56  ;;  %1406 = vmatpush.bf16.msra.mxu1 %v2052_v57 }
 0x280   : > { %1504 = vmatpush.bf16.msrb.mxu3 %v2067_v58  ;;  %1407 = vmatpush.bf16.msra.mxu1 %v2051_v59 }
 0x284   : > { %1505 = vmatpush.bf16.msrb.mxu3 %v2066_v60  ;;  %1408 = vmatpush.bf16.msra.mxu1 %v2050_v61 }
 0x288   : > { %1506 = vmatpush.bf16.msrb.mxu3 %v2065_v62  ;;  %1409 = vmatpush.bf16.msra.mxu1 %v2049_v63 }
 0x28c   : > { %1507 = vmatpush.bf16.msrb.mxu3 %v2064_v0  ;;  %1410 = vmatpush.bf16.msra.mxu1 %v2048_v1 }
 0x290   : > { %1411 = vmatpush.bf16.msra.mxu1 %v2047_v3  ;;  %1508 = vmatpush.bf16.msrb.mxu3 %v2063_v4 }
 0x2f0   : > { %v1238_v6 = vpop.f32.mrf.mxu1 }
 0x2f1   : > { %v1242_v7 = vpack.c.bf16 %v1238_v6, %v1238_v6 }
 0x2f3   : > { %1412 = vmatmul.bf16.vlgmr.msra.gmra.mxu1 %v1242_v7 }
 0x2f6   : > { %v1273_v8 = vpop.f32.mrf.mxu3 }
 0x2f7   : > { %v1277_v10 = vpack.c.bf16 %v1273_v8, %v1273_v8 }
 0x2f8   : > { %v1431_v9 = vpop.f32.mrf.mxu2  ;;  %v1240_v12 = vpop.f32.mrf.mxu1 }
 0x2f9   : > { %v1435_v11 = vpack.c.bf16 %v1431_v9, %v1431_v9  ;;  %1351 = vmatmul.bf16.vlgmr.msra.gmra.mxu0 %v1277_v10 }
 0x2fb   : > { %1509 = vmatmul.bf16.vlgmr.msrb.gmra.mxu3 %v1435_v11 }
 0x2fe   : > { %v1275_v13 = vpop.f32.mrf.mxu3 }
 0x300   : > { %v1433_v14 = vpop.f32.mrf.mxu2 }
 0x370   : > { %v1413_v15 = vpop.f32.mrf.mxu1 }
 0x376   : > { %v1352_v16 = vpop.f32.mrf.mxu0 }
 0x377   : > { %v1414_v18 = vadd.f32 %v1413_v15, %v1352_v16 }
 0x378   : > { %v1415_v17 = vpop.f32.mrf.mxu1 }
 0x37e   : > { %v1510_v20 = vpop.f32.mrf.mxu3  ;;  %v1354_v23 = vpop.f32.mrf.mxu0 }
 0x37f   : > { %v1514_v21 = vadd.f32 %v1510_v20, %v1414_v18 }
 0x381   : > { %v1519_v24 = vmul.f32 %v2166_v19, %v1514_v21 }
 0x383   : > { %v1524_v25 = vadd.f32 %v2167_v22, %v1519_v24 }
 0x385   : > { %1525 = vst [vmem:[%s602_s26] sm:$0xff] %v1524_v25 }
 0x386   : > { %v1512_v26 = vpop.f32.mrf.mxu3 }
 0x387 PF: > { %s29_s29 = sadd.s32 1, %s2434_s29  }
 0x388   : > { %p26_p7 = scmp.ge.s32.totalorder %s29_s29, 4  }
 0x38a   :  { %28 = sbr.rel (!%p26_p7) target bundleno = 9 (0x9), region = 154 }
 0x38f   :  { %1545 = vsyncpa [#allocation3], 1 }
 0x390   :  { %1547 = vsyncpa [#allocation3 + $0x1], 1 }
 0x391   :  { %1548 = vsyncpa [#allocation5], 1 }
 0x392   :  { %1549 = vsyncpa [#allocation8], 1 }
 0x393   :  { %1550 = vsyncpa [#allocation11], 1 }
 0x394   :  { %1551 = vsyncpa [#allocation14], 1 }

</bundles_post_ra>
